<compile_context>
chip_gen: v5e
topology: v5e:2x2
jax: 0.10.0
libtpu: 0.0.40
codegen_flags: <defaults>
</compile_context>

<pallas_src>
import functools

import numpy as np

import jax
import jax.numpy as jnp
from jax.experimental import pallas as pl
from jax.experimental.pallas import tpu as pltpu

_PARALLEL_1D = pltpu.CompilerParams(dimension_semantics=("parallel",))


# ----------------------------------------------------------------------------
# In-kernel helpers (operate on (C, L) f32 tiles held in vregs/VMEM)
# ----------------------------------------------------------------------------
def _gn_swish(x, mask, gamma, beta, inv_n, eps):
    """GroupNorm(eps) + swish.  x: (C, L); mask: (C, C) same-group indicator."""
    s = jnp.sum(x, axis=-1, keepdims=True)               # (C, 1)  per-channel sum
    ss = jnp.sum(x * x, axis=-1, keepdims=True)          # (C, 1)  per-channel sumsq
    gsum = jnp.dot(mask, s, preferred_element_type=jnp.float32)    # group sums
    gsumsq = jnp.dot(mask, ss, preferred_element_type=jnp.float32)
    mean = gsum * inv_n
    var = gsumsq * inv_n - mean * mean
    inv_std = jax.lax.rsqrt(var + eps)
    y = (x - mean) * inv_std * gamma + beta
    return y * jax.nn.sigmoid(y)                          # swish (exp+recip on EUP)


def _conv3(x, w_flat, bias):
    """kernel-size-3, padding-1, stride-1 conv as a single folded matmul.

    x: (Cin, L); w_flat: (Cout, 3*Cin) ordered [tap0 | tap1 | tap2]; bias: (Cout, 1).
    """
    cin, L = x.shape
    z = jnp.zeros((cin, 1), jnp.float32)
    t0 = jnp.concatenate([z, x[:, :L - 1]], axis=1)       # x[:, j-1] (left halo = 0)
    t2 = jnp.concatenate([x[:, 1:], z], axis=1)           # x[:, j+1] (right halo = 0)
    if cin % 8 == 0:
        xs = jnp.concatenate([t0, x, t2], axis=0)         # (3*Cin, L), sublane-stacked
        y = jnp.dot(w_flat, xs, preferred_element_type=jnp.float32)
    else:
        # sublane-unaligned Cin (e.g. conv_in with Cin=4): 3 small dots instead
        y = (jnp.dot(w_flat[:, :cin], t0, preferred_element_type=jnp.float32)
             + jnp.dot(w_flat[:, cin:2 * cin], x, preferred_element_type=jnp.float32)
             + jnp.dot(w_flat[:, 2 * cin:], t2, preferred_element_type=jnp.float32))
    return y + bias


# ----------------------------------------------------------------------------
# Fused kernels
# ----------------------------------------------------------------------------
def _conv_kernel(x_ref, w_ref, b_ref, o_ref):
    # Plain k=3 p=1 conv (used for conv_in).
    x = x_ref[0].astype(jnp.float32)
    o_ref[0] = _conv3(x, w_ref[...], b_ref[...]).astype(o_ref.dtype)


def _resblock_kernel(x_ref, m1_ref, g1_ref, be1_ref, w1_ref, c1b_ref,
                     m2_ref, g2_ref, be2_ref, w2_ref, c2b_ref,
                     o_ref, *, inv_n1, inv_n2, eps):
    # Cin == Cout: shortcut is identity.  dropout p=0.0 and temb=None -> no-ops.
    x = x_ref[0].astype(jnp.float32)
    h = _gn_swish(x, m1_ref[...], g1_ref[...], be1_ref[...], inv_n1, eps)
    h = _conv3(h, w1_ref[...], c1b_ref[...])
    h = _gn_swish(h, m2_ref[...], g2_ref[...], be2_ref[...], inv_n2, eps)
    h = _conv3(h, w2_ref[...], c2b_ref[...])
    o_ref[0] = (x + h).astype(o_ref.dtype)


def _resblock_nin_kernel(x_ref, m1_ref, g1_ref, be1_ref, w1_ref, c1b_ref,
                         m2_ref, g2_ref, be2_ref, w2_ref, c2b_ref,
                         nw_ref, nb_ref, o_ref, *, inv_n1, inv_n2, eps):
    # Cin != Cout: 1x1 nin_shortcut fused in as a single dot.
    x = x_ref[0].astype(jnp.float32)
    h = _gn_swish(x, m1_ref[...], g1_ref[...], be1_ref[...], inv_n1, eps)
    h = _conv3(h, w1_ref[...], c1b_ref[...])
    h = _gn_swish(h, m2_ref[...], g2_ref[...], be2_ref[...], inv_n2, eps)
    h = _conv3(h, w2_ref[...], c2b_ref[...])
    sc = jnp.dot(nw_ref[...], x, preferred_element_type=jnp.float32) + nb_ref[...]
    o_ref[0] = (sc + h).astype(o_ref.dtype)


def _upsample_conv_kernel(x_ref, mI_ref, w_ref, b_ref, o_ref):
    # linear interpolate (as matmul with a precomputed (Lin, Lout) matrix) + k=3 conv.
    x = x_ref[0].astype(jnp.float32)
    y = jnp.dot(x, mI_ref[...], preferred_element_type=jnp.float32)   # (C, Lout)
    o_ref[0] = _conv3(y, w_ref[...], b_ref[...]).astype(o_ref.dtype)


def _gn_conv_kernel(x_ref, m_ref, g_ref, be_ref, w_ref, b_ref, o_ref, *, inv_n, eps):
    # norm_out + swish + conv_out fused.
    x = x_ref[0].astype(jnp.float32)
    h = _gn_swish(x, m_ref[...], g_ref[...], be_ref[...], inv_n, eps)
    o_ref[0] = _conv3(h, w_ref[...], b_ref[...]).astype(o_ref.dtype)


# ----------------------------------------------------------------------------
# Pallas wrappers (one pallas_call each; grid over batch marked "parallel")
# ----------------------------------------------------------------------------
def _param_spec(a):
    return pl.BlockSpec(a.shape, lambda b: (0, 0))


def conv3x3(x, w_flat, bias2):
    B, cin, L = x.shape
    cout = w_flat.shape[0]
    return pl.pallas_call(
        _conv_kernel,
        out_shape=jax.ShapeDtypeStruct((B, cout, L), x.dtype),
        grid=(B,),
        in_specs=[pl.BlockSpec((1, cin, L), lambda b: (b, 0, 0)),
                  _param_spec(w_flat), _param_spec(bias2)],
        out_specs=pl.BlockSpec((1, cout, L), lambda b: (b, 0, 0)),
        compiler_params=_PARALLEL_1D,
    )(x, w_flat, bias2)


def resnet_block(x, p, *, num_groups, eps=1e-6):
    B, cin, L = x.shape
    cout = p['w1'].shape[0]
    inv_n1 = 1.0 / float((cin // num_groups) * L)
    inv_n2 = 1.0 / float((cout // num_groups) * L)
    args = [x, p['m1'], p['g1'], p['b1'], p['w1'], p['c1b'],
            p['m2'], p['g2'], p['b2'], p['w2'], p['c2b']]
    if 'nin_w' in p:
        args += [p['nin_w'], p['nin_b']]
        kernel = functools.partial(_resblock_nin_kernel,
                                   inv_n1=inv_n1, inv_n2=inv_n2, eps=float(eps))
    else:
        kernel = functools.partial(_resblock_kernel,
                                   inv_n1=inv_n1, inv_n2=inv_n2, eps=float(eps))
    in_specs = [pl.BlockSpec((1, cin, L), lambda b: (b, 0, 0))]
    in_specs += [_param_spec(a) for a in args[1:]]
    return pl.pallas_call(
        kernel,
        out_shape=jax.ShapeDtypeStruct((B, cout, L), x.dtype),
        grid=(B,),
        in_specs=in_specs,
        out_specs=pl.BlockSpec((1, cout, L), lambda b: (b, 0, 0)),
        compiler_params=_PARALLEL_1D,
    )(*args)


def _linear_interp_matrix(l_in, l_out):
    # Matches F.interpolate(mode='linear', align_corners=False); built with numpy
    # so it is a compile-time constant (hoisted out of the forward path).
    j = np.arange(l_out, dtype=np.float64)
    src = (j + 0.5) * (float(l_in) / float(l_out)) - 0.5
    src = np.maximum(src, 0.0)
    i0 = np.minimum(np.floor(src).astype(np.int64), l_in - 1)
    i1 = np.minimum(i0 + 1, l_in - 1)
    lam = src - i0
    cols = np.arange(l_out)
    m = np.zeros((l_in, l_out), np.float32)
    m[i0, cols] += (1.0 - lam).astype(np.float32)
    m[i1, cols] += lam.astype(np.float32)
    return jnp.asarray(m)


def upsample_conv(x, l_out, w_flat, bias2):
    B, C, l_in = x.shape
    m = _linear_interp_matrix(l_in, int(l_out))
    return pl.pallas_call(
        _upsample_conv_kernel,
        out_shape=jax.ShapeDtypeStruct((B, C, l_out), x.dtype),
        grid=(B,),
        in_specs=[pl.BlockSpec((1, C, l_in), lambda b: (b, 0, 0)),
                  _param_spec(m), _param_spec(w_flat), _param_spec(bias2)],
        out_specs=pl.BlockSpec((1, C, l_out), lambda b: (b, 0, 0)),
        compiler_params=_PARALLEL_1D,
    )(x, m, w_flat, bias2)


def gn_swish_conv(x, mask, gamma2, beta2, w_flat, bias2, *, num_groups, eps=1e-6):
    B, C, L = x.shape
    cout = w_flat.shape[0]
    inv_n = 1.0 / float((C // num_groups) * L)
    kernel = functools.partial(_gn_conv_kernel, inv_n=inv_n, eps=float(eps))
    return pl.pallas_call(
        kernel,
        out_shape=jax.ShapeDtypeStruct((B, cout, L), x.dtype),
        grid=(B,),
        in_specs=[pl.BlockSpec((1, C, L), lambda b: (b, 0, 0)),
                  _param_spec(mask), _param_spec(gamma2), _param_spec(beta2),
                  _param_spec(w_flat), _param_spec(bias2)],
        out_specs=pl.BlockSpec((1, cout, L), lambda b: (b, 0, 0)),
        compiler_params=_PARALLEL_1D,
    )(x, mask, gamma2, beta2, w_flat, bias2)


# ----------------------------------------------------------------------------
# Model glue (mirrors Decoder1d / ResnetBlock1d / Upsample1d forward passes)
# ----------------------------------------------------------------------------
def decoder_forward(z, pp, cfg, final_len=None):
    num_resolutions = len(cfg['ch_mult'])
    G = cfg['gn']
    h = conv3x3(z, pp['conv_in_w'], pp['conv_in_b'])
    for i_level in reversed(range(num_resolutions)):
        lvl = pp['up'][i_level]
        for i_block in range(cfg['num_res_blocks'] + 1):
            h = resnet_block(h, lvl['block'][i_block], num_groups=G)
            # NOTE: up[i_level].attn is an empty ModuleList in Decoder1d -> skipped.
        if i_level != 0:
            l_in = h.shape[-1]
            if i_level == 1 and final_len is not None:
                l_out = int(final_len)
            else:
                l_out = 2 * l_in
            h = upsample_conv(h, l_out, lvl['up_w'], lvl['up_b'])
    return gn_swish_conv(h, pp['norm_out_m'], pp['norm_out_g'], pp['norm_out_b'],
                         pp['conv_out_w'], pp['conv_out_b'], num_groups=G)


# ----------------------------------------------------------------------------
# Deterministic parameter init (PyTorch-like shapes) + one-time preparation
# ----------------------------------------------------------------------------
def _init_conv(key, cout, cin, k):
    kw, kb = jax.random.split(key)
    scale = 0.3 / jnp.sqrt(float(cin * k))
    w = scale * jax.random.normal(kw, (cout, cin, k), jnp.float32)
    b = 0.05 * jax.random.normal(kb, (cout,), jnp.float32)
    return w, b


def _init_norm(key, c):
    kg, kb = jax.random.split(key)
    gamma = 1.0 + 0.05 * jax.random.normal(kg, (c,), jnp.float32)
    beta = 0.05 * jax.random.normal(kb, (c,), jnp.float32)
    return gamma, beta


def init_decoder_params(key, *, in_channels, out_ch, ch, ch_mult, num_res_blocks):
    num_resolutions = len(ch_mult)
    params = {}
    block_in = ch * ch_mult[num_resolutions - 1]
    key, k = jax.random.split(key)
    params['conv_in_w'], params['conv_in_b'] = _init_conv(k, block_in, in_channels, 3)
    up_params = [None] * num_resolutions
    for i_level in reversed(range(num_resolutions)):
        block_out = ch * ch_mult[i_level]
        blocks = []
        for _ in range(num_res_blocks + 1):
            p = {}
            key, k1, k2, k3, k4 = jax.random.split(key, 5)
            p['norm1_g'], p['norm1_b'] = _init_norm(k1, block_in)
            p['conv1_w'], p['conv1_b'] = _init_conv(k2, block_out, block_in, 3)
            p['norm2_g'], p['norm2_b'] = _init_norm(k3, block_out)
            p['conv2_w'], p['conv2_b'] = _init_conv(k4, block_out, block_out, 3)
            if block_in != block_out:
                key, k5 = jax.random.split(key)
                p['nin_w'], p['nin_b'] = _init_conv(k5, block_out, block_in, 1)
            blocks.append(p)
            block_in = block_out
        lvl = {'block': blocks}
        if i_level != 0:
            key, k6 = jax.random.split(key)
            lvl['up_w'], lvl['up_b'] = _init_conv(k6, block_in, block_in, 3)
        up_params[i_level] = lvl
    key, kn, kc = jax.random.split(key, 3)
    params['norm_out_g'], params['norm_out_b'] = _init_norm(kn, block_in)
    params['conv_out_w'], params['conv_out_b'] = _init_conv(kc, out_ch, block_in, 3)
    params['up'] = up_params
    return params


def prepare_decoder_params(raw, *, num_groups):
    """One-time hoisting of all per-call prep: flattened conv weights, (C,1)
    biases/affines and per-channel-count GroupNorm masks (deduplicated)."""
    masks = {}

    def mask_for(c):
        if c not in masks:
            cpg = c // num_groups
            gid = np.arange(c) // cpg
            masks[c] = jnp.asarray((gid[:, None] == gid[None, :]).astype(np.float32))
        return masks[c]

    def conv_flat(w, b):
        cout, cin, k = w.shape
        wf = jnp.transpose(w, (0, 2, 1)).reshape(cout, k * cin).astype(jnp.float32)
        return wf, b.reshape(cout, 1).astype(jnp.float32)

    def norm_prep(g, b):
        c = g.shape[0]
        return (mask_for(c), g.reshape(c, 1).astype(jnp.float32),
                b.reshape(c, 1).astype(jnp.float32))

    pp = {}
    pp['conv_in_w'], pp['conv_in_b'] = conv_flat(raw['conv_in_w'], raw['conv_in_b'])
    up = []
    for lvl_raw in raw['up']:
        blocks = []
        for p in lvl_raw['block']:
            q = {}
            q['m1'], q['g1'], q['b1'] = norm_prep(p['norm1_g'], p['norm1_b'])
            q['w1'], q['c1b'] = conv_flat(p['conv1_w'], p['conv1_b'])
            q['m2'], q['g2'], q['b2'] = norm_prep(p['norm2_g'], p['norm2_b'])
            q['w2'], q['c2b'] = conv_flat(p['conv2_w'], p['conv2_b'])
            if 'nin_w' in p:
                q['nin_w'], q['nin_b'] = conv_flat(p['nin_w'], p['nin_b'])
            blocks.append(q)
        lvl = {'block': blocks}
        if 'up_w' in lvl_raw:
            lvl['up_w'], lvl['up_b'] = conv_flat(lvl_raw['up_w'], lvl_raw['up_b'])
        up.append(lvl)
    pp['up'] = up
    pp['norm_out_m'], pp['norm_out_g'], pp['norm_out_b'] = norm_prep(
        raw['norm_out_g'], raw['norm_out_b'])
    pp['conv_out_w'], pp['conv_out_b'] = conv_flat(raw['conv_out_w'], raw['conv_out_b'])
    return pp


# ----------------------------------------------------------------------------
if __name__ == "__main__":
    # Small Decoder1d config: in_channels=4, out_ch=2, ch=8, ch_mult=(1,2,4),
    # num_res_blocks=2, gn=4, act='swish', resamp_with_conv=True, temb_ch=0.
    cfg = dict(in_channels=4, out_ch=2, ch=8, ch_mult=(1, 2, 4),
               num_res_blocks=2, gn=4)

    key = jax.random.PRNGKey(0)
    kparams, kz = jax.random.split(key)
    raw_params = init_decoder_params(kparams, in_channels=cfg['in_channels'],
                                     out_ch=cfg['out_ch'], ch=cfg['ch'],
                                     ch_mult=cfg['ch_mult'],
                                     num_res_blocks=cfg['num_res_blocks'])
    params = prepare_decoder_params(raw_params, num_groups=cfg['gn'])

    z = jax.random.normal(kz, (2, 4, 16), jnp.float32)   # (B, Cin, L)

    fwd = jax.jit(lambda zz, pp: decoder_forward(zz, pp, cfg, final_len=None))
    out = jax.block_until_ready(fwd(z, params))

    # L: 16 -> (x2 at level 2) 32 -> (x2 at level 1, final_len=None) 64
    assert out.shape == (2, cfg['out_ch'], 64), out.shape
    assert bool(jnp.all(jnp.isfinite(out)))
    print("KERNEL_OK")
</pallas_src>

<mosaic_0001>
module attributes {stable_mosaic.version = 11 : i64} {
  func.func @_resblock_kernel(%arg0: i32, %arg1: memref<1x32x16xf32, #tpu.memory_space<vmem>>, %arg2: memref<32x32xf32, #tpu.memory_space<vmem>>, %arg3: memref<32x1xf32, #tpu.memory_space<vmem>>, %arg4: memref<32x1xf32, #tpu.memory_space<vmem>>, %arg5: memref<32x96xf32, #tpu.memory_space<vmem>>, %arg6: memref<32x1xf32, #tpu.memory_space<vmem>>, %arg7: memref<32x32xf32, #tpu.memory_space<vmem>>, %arg8: memref<32x1xf32, #tpu.memory_space<vmem>>, %arg9: memref<32x1xf32, #tpu.memory_space<vmem>>, %arg10: memref<32x96xf32, #tpu.memory_space<vmem>>, %arg11: memref<32x1xf32, #tpu.memory_space<vmem>>, %arg12: memref<1x32x16xf32, #tpu.memory_space<vmem>>) attributes {dimension_semantics = [#tpu.dimension_semantics<parallel>], iteration_bounds = array<i64: 2>, scalar_prefetch = 0 : i64, scratch_operands = 0 : i64, tpu.core_type = #tpu.core_type<tc>, window_params = [{transform_indices = @transform_0, window_bounds = array<i64: 1, 32, 16>}, {pipeline_mode = #tpu.pipeline_mode<synchronous>, transform_indices = @transform_1, window_bounds = array<i64: 32, 32>}, {pipeline_mode = #tpu.pipeline_mode<synchronous>, transform_indices = @transform_2, window_bounds = array<i64: 32, 1>}, {pipeline_mode = #tpu.pipeline_mode<synchronous>, transform_indices = @transform_3, window_bounds = array<i64: 32, 1>}, {pipeline_mode = #tpu.pipeline_mode<synchronous>, transform_indices = @transform_4, window_bounds = array<i64: 32, 96>}, {pipeline_mode = #tpu.pipeline_mode<synchronous>, transform_indices = @transform_5, window_bounds = array<i64: 32, 1>}, {pipeline_mode = #tpu.pipeline_mode<synchronous>, transform_indices = @transform_6, window_bounds = array<i64: 32, 32>}, {pipeline_mode = #tpu.pipeline_mode<synchronous>, transform_indices = @transform_7, window_bounds = array<i64: 32, 1>}, {pipeline_mode = #tpu.pipeline_mode<synchronous>, transform_indices = @transform_8, window_bounds = array<i64: 32, 1>}, {pipeline_mode = #tpu.pipeline_mode<synchronous>, transform_indices = @transform_9, window_bounds = array<i64: 32, 96>}, {pipeline_mode = #tpu.pipeline_mode<synchronous>, transform_indices = @transform_10, window_bounds = array<i64: 32, 1>}, {transform_indices = @transform_11, window_bounds = array<i64: 1, 32, 16>}]} {
    %c0 = arith.constant 0 : index
    %c0_0 = arith.constant 0 : index
    %c0_1 = arith.constant 0 : index
    %0 = vector.load %arg1[%c0, %c0_0, %c0_1] : memref<1x32x16xf32, #tpu.memory_space<vmem>>, vector<1x32x16xf32>
    %1 = vector.shape_cast %0 : vector<1x32x16xf32> to vector<32x16xf32>
    %c0_2 = arith.constant 0 : index
    %c0_3 = arith.constant 0 : index
    %2 = vector.load %arg2[%c0_2, %c0_3] : memref<32x32xf32, #tpu.memory_space<vmem>>, vector<32x32xf32>
    %c0_4 = arith.constant 0 : index
    %c0_5 = arith.constant 0 : index
    %3 = vector.load %arg3[%c0_4, %c0_5] : memref<32x1xf32, #tpu.memory_space<vmem>>, vector<32x1xf32>
    %c0_6 = arith.constant 0 : index
    %c0_7 = arith.constant 0 : index
    %4 = vector.load %arg4[%c0_6, %c0_7] : memref<32x1xf32, #tpu.memory_space<vmem>>, vector<32x1xf32>
    %cst = arith.constant dense<0.000000e+00> : vector<32xf32>
    %5 = vector.multi_reduction <add>, %1, %cst [1] : vector<32x16xf32> to vector<32xf32>
    %6 = vector.shape_cast %5 : vector<32xf32> to vector<32x1xf32>
    %7 = arith.mulf %1, %1 : vector<32x16xf32>
    %cst_8 = arith.constant dense<0.000000e+00> : vector<32xf32>
    %8 = vector.multi_reduction <add>, %7, %cst_8 [1] : vector<32x16xf32> to vector<32xf32>
    %9 = vector.shape_cast %8 : vector<32xf32> to vector<32x1xf32>
    %cst_9 = arith.constant dense<0.000000e+00> : vector<32x1xf32>
    %10 = tpu.matmul %2, %6, %cst_9 {dimension_numbers = #tpu.dot_dimension_numbers<[1], [0], [0], [1], [0, 0, 1, 1], [], []>} : vector<32x32xf32>, vector<32x1xf32>, vector<32x1xf32> -> vector<32x1xf32>
    %cst_10 = arith.constant dense<0.000000e+00> : vector<32x1xf32>
    %11 = tpu.matmul %2, %9, %cst_10 {dimension_numbers = #tpu.dot_dimension_numbers<[1], [0], [0], [1], [0, 0, 1, 1], [], []>} : vector<32x32xf32>, vector<32x1xf32>, vector<32x1xf32> -> vector<32x1xf32>
    %cst_11 = arith.constant 7.812500e-03 : f32
    %12 = vector.broadcast %cst_11 : f32 to vector<32x1xf32>
    %13 = arith.mulf %10, %12 : vector<32x1xf32>
    %cst_12 = arith.constant 7.812500e-03 : f32
    %14 = vector.broadcast %cst_12 : f32 to vector<32x1xf32>
    %15 = arith.mulf %11, %14 : vector<32x1xf32>
    %16 = arith.mulf %13, %13 : vector<32x1xf32>
    %17 = arith.subf %15, %16 : vector<32x1xf32>
    %cst_13 = arith.constant 9.99999997E-7 : f32
    %18 = vector.broadcast %cst_13 : f32 to vector<32x1xf32>
    %19 = arith.addf %17, %18 : vector<32x1xf32>
    %20 = math.rsqrt %19 : vector<32x1xf32>
    %21 = vector.broadcast %13 : vector<32x1xf32> to vector<32x16xf32>
    %22 = arith.subf %1, %21 : vector<32x16xf32>
    %23 = vector.broadcast %20 : vector<32x1xf32> to vector<32x16xf32>
    %24 = arith.mulf %22, %23 : vector<32x16xf32>
    %25 = vector.broadcast %3 : vector<32x1xf32> to vector<32x16xf32>
    %26 = arith.mulf %24, %25 : vector<32x16xf32>
    %27 = vector.broadcast %4 : vector<32x1xf32> to vector<32x16xf32>
    %28 = arith.addf %26, %27 : vector<32x16xf32>
    %29 = arith.negf %28 : vector<32x16xf32>
    %30 = math.exp %29 : vector<32x16xf32>
    %cst_14 = arith.constant 1.000000e+00 : f32
    %31 = vector.broadcast %cst_14 : f32 to vector<32x16xf32>
    %32 = arith.addf %31, %30 : vector<32x16xf32>
    %33 = arith.divf %31, %32 : vector<32x16xf32>
    %34 = arith.mulf %28, %33 : vector<32x16xf32>
    %c0_15 = arith.constant 0 : index
    %c0_16 = arith.constant 0 : index
    %35 = vector.load %arg5[%c0_15, %c0_16] : memref<32x96xf32, #tpu.memory_space<vmem>>, vector<32x96xf32>
    %c0_17 = arith.constant 0 : index
    %c0_18 = arith.constant 0 : index
    %36 = vector.load %arg6[%c0_17, %c0_18] : memref<32x1xf32, #tpu.memory_space<vmem>>, vector<32x1xf32>
    %cst_19 = arith.constant 0.000000e+00 : f32
    %37 = vector.broadcast %cst_19 : f32 to vector<32x1xf32>
    %38 = vector.extract_strided_slice %34 {offsets = [0, 0], sizes = [32, 15], strides = [1, 1]} : vector<32x16xf32> to vector<32x15xf32>
    %39 = tpu.concatenate %37, %38 in 1 : vector<32x1xf32>, vector<32x15xf32> -> vector<32x16xf32>
    %40 = vector.extract_strided_slice %34 {offsets = [0, 1], sizes = [32, 15], strides = [1, 1]} : vector<32x16xf32> to vector<32x15xf32>
    %41 = tpu.concatenate %40, %37 in 1 : vector<32x15xf32>, vector<32x1xf32> -> vector<32x16xf32>
    %42 = tpu.concatenate %39, %34, %41 in 0 : vector<32x16xf32>, vector<32x16xf32>, vector<32x16xf32> -> vector<96x16xf32>
    %cst_20 = arith.constant dense<0.000000e+00> : vector<32x16xf32>
    %43 = tpu.matmul %35, %42, %cst_20 {dimension_numbers = #tpu.dot_dimension_numbers<[1], [0], [0], [1], [0, 0, 1, 1], [], []>} : vector<32x96xf32>, vector<96x16xf32>, vector<32x16xf32> -> vector<32x16xf32>
    %44 = vector.broadcast %36 : vector<32x1xf32> to vector<32x16xf32>
    %45 = arith.addf %43, %44 : vector<32x16xf32>
    %c0_21 = arith.constant 0 : index
    %c0_22 = arith.constant 0 : index
    %46 = vector.load %arg7[%c0_21, %c0_22] : memref<32x32xf32, #tpu.memory_space<vmem>>, vector<32x32xf32>
    %c0_23 = arith.constant 0 : index
    %c0_24 = arith.constant 0 : index
    %47 = vector.load %arg8[%c0_23, %c0_24] : memref<32x1xf32, #tpu.memory_space<vmem>>, vector<32x1xf32>
    %c0_25 = arith.constant 0 : index
    %c0_26 = arith.constant 0 : index
    %48 = vector.load %arg9[%c0_25, %c0_26] : memref<32x1xf32, #tpu.memory_space<vmem>>, vector<32x1xf32>
    %cst_27 = arith.constant dense<0.000000e+00> : vector<32xf32>
    %49 = vector.multi_reduction <add>, %45, %cst_27 [1] : vector<32x16xf32> to vector<32xf32>
    %50 = vector.shape_cast %49 : vector<32xf32> to vector<32x1xf32>
    %51 = arith.mulf %45, %45 : vector<32x16xf32>
    %cst_28 = arith.constant dense<0.000000e+00> : vector<32xf32>
    %52 = vector.multi_reduction <add>, %51, %cst_28 [1] : vector<32x16xf32> to vector<32xf32>
    %53 = vector.shape_cast %52 : vector<32xf32> to vector<32x1xf32>
    %cst_29 = arith.constant dense<0.000000e+00> : vector<32x1xf32>
    %54 = tpu.matmul %46, %50, %cst_29 {dimension_numbers = #tpu.dot_dimension_numbers<[1], [0], [0], [1], [0, 0, 1, 1], [], []>} : vector<32x32xf32>, vector<32x1xf32>, vector<32x1xf32> -> vector<32x1xf32>
    %cst_30 = arith.constant dense<0.000000e+00> : vector<32x1xf32>
    %55 = tpu.matmul %46, %53, %cst_30 {dimension_numbers = #tpu.dot_dimension_numbers<[1], [0], [0], [1], [0, 0, 1, 1], [], []>} : vector<32x32xf32>, vector<32x1xf32>, vector<32x1xf32> -> vector<32x1xf32>
    %cst_31 = arith.constant 7.812500e-03 : f32
    %56 = vector.broadcast %cst_31 : f32 to vector<32x1xf32>
    %57 = arith.mulf %54, %56 : vector<32x1xf32>
    %cst_32 = arith.constant 7.812500e-03 : f32
    %58 = vector.broadcast %cst_32 : f32 to vector<32x1xf32>
    %59 = arith.mulf %55, %58 : vector<32x1xf32>
    %60 = arith.mulf %57, %57 : vector<32x1xf32>
    %61 = arith.subf %59, %60 : vector<32x1xf32>
    %cst_33 = arith.constant 9.99999997E-7 : f32
    %62 = vector.broadcast %cst_33 : f32 to vector<32x1xf32>
    %63 = arith.addf %61, %62 : vector<32x1xf32>
    %64 = math.rsqrt %63 : vector<32x1xf32>
    %65 = vector.broadcast %57 : vector<32x1xf32> to vector<32x16xf32>
    %66 = arith.subf %45, %65 : vector<32x16xf32>
    %67 = vector.broadcast %64 : vector<32x1xf32> to vector<32x16xf32>
    %68 = arith.mulf %66, %67 : vector<32x16xf32>
    %69 = vector.broadcast %47 : vector<32x1xf32> to vector<32x16xf32>
    %70 = arith.mulf %68, %69 : vector<32x16xf32>
    %71 = vector.broadcast %48 : vector<32x1xf32> to vector<32x16xf32>
    %72 = arith.addf %70, %71 : vector<32x16xf32>
    %73 = arith.negf %72 : vector<32x16xf32>
    %74 = math.exp %73 : vector<32x16xf32>
    %cst_34 = arith.constant 1.000000e+00 : f32
    %75 = vector.broadcast %cst_34 : f32 to vector<32x16xf32>
    %76 = arith.addf %75, %74 : vector<32x16xf32>
    %77 = arith.divf %75, %76 : vector<32x16xf32>
    %78 = arith.mulf %72, %77 : vector<32x16xf32>
    %c0_35 = arith.constant 0 : index
    %c0_36 = arith.constant 0 : index
    %79 = vector.load %arg10[%c0_35, %c0_36] : memref<32x96xf32, #tpu.memory_space<vmem>>, vector<32x96xf32>
    %c0_37 = arith.constant 0 : index
    %c0_38 = arith.constant 0 : index
    %80 = vector.load %arg11[%c0_37, %c0_38] : memref<32x1xf32, #tpu.memory_space<vmem>>, vector<32x1xf32>
    %cst_39 = arith.constant 0.000000e+00 : f32
    %81 = vector.broadcast %cst_39 : f32 to vector<32x1xf32>
    %82 = vector.extract_strided_slice %78 {offsets = [0, 0], sizes = [32, 15], strides = [1, 1]} : vector<32x16xf32> to vector<32x15xf32>
    %83 = tpu.concatenate %81, %82 in 1 : vector<32x1xf32>, vector<32x15xf32> -> vector<32x16xf32>
    %84 = vector.extract_strided_slice %78 {offsets = [0, 1], sizes = [32, 15], strides = [1, 1]} : vector<32x16xf32> to vector<32x15xf32>
    %85 = tpu.concatenate %84, %81 in 1 : vector<32x15xf32>, vector<32x1xf32> -> vector<32x16xf32>
    %86 = tpu.concatenate %83, %78, %85 in 0 : vector<32x16xf32>, vector<32x16xf32>, vector<32x16xf32> -> vector<96x16xf32>
    %cst_40 = arith.constant dense<0.000000e+00> : vector<32x16xf32>
    %87 = tpu.matmul %79, %86, %cst_40 {dimension_numbers = #tpu.dot_dimension_numbers<[1], [0], [0], [1], [0, 0, 1, 1], [], []>} : vector<32x96xf32>, vector<96x16xf32>, vector<32x16xf32> -> vector<32x16xf32>
    %88 = vector.broadcast %80 : vector<32x1xf32> to vector<32x16xf32>
    %89 = arith.addf %87, %88 : vector<32x16xf32>
    %90 = arith.addf %1, %89 : vector<32x16xf32>
    %c0_41 = arith.constant 0 : index
    %c0_42 = arith.constant 0 : index
    %c0_43 = arith.constant 0 : index
    %91 = vector.load %arg12[%c0_41, %c0_42, %c0_43] : memref<1x32x16xf32, #tpu.memory_space<vmem>>, vector<1x32x16xf32>
    %92 = vector.shape_cast %91 : vector<1x32x16xf32> to vector<32x16xf32>
    %93 = vector.shape_cast %90 : vector<32x16xf32> to vector<1x32x16xf32>
    tpu.vector_store %arg12[%c0_41, %c0_42, %c0_43], %93 {strides = array<i32>} : memref<1x32x16xf32, #tpu.memory_space<vmem>>, vector<1x32x16xf32>,
    return
  }
  func.func @transform_0(%arg0: i32) -> (i32, i32, i32) {
    %c0_i32 = arith.constant 0 : i32
    %c0_i32_0 = arith.constant 0 : i32
    %c0_i32_1 = arith.constant 0 : i32
    return %arg0, %c0_i32, %c0_i32_0 : i32, i32, i32
  }
  func.func @transform_1(%arg0: i32) -> (i32, i32) {
    %c0_i32 = arith.constant 0 : i32
    %c0_i32_0 = arith.constant 0 : i32
    %c0_i32_1 = arith.constant 0 : i32
    return %c0_i32, %c0_i32_0 : i32, i32
  }
  func.func @transform_2(%arg0: i32) -> (i32, i32) {
    %c0_i32 = arith.constant 0 : i32
    %c0_i32_0 = arith.constant 0 : i32
    %c0_i32_1 = arith.constant 0 : i32
    return %c0_i32, %c0_i32_0 : i32, i32
  }
  func.func @transform_3(%arg0: i32) -> (i32, i32) {
    %c0_i32 = arith.constant 0 : i32
    %c0_i32_0 = arith.constant 0 : i32
    %c0_i32_1 = arith.constant 0 : i32
    return %c0_i32, %c0_i32_0 : i32, i32
  }
  func.func @transform_4(%arg0: i32) -> (i32, i32) {
    %c0_i32 = arith.constant 0 : i32
    %c0_i32_0 = arith.constant 0 : i32
    %c0_i32_1 = arith.constant 0 : i32
    return %c0_i32, %c0_i32_0 : i32, i32
  }
  func.func @transform_5(%arg0: i32) -> (i32, i32) {
    %c0_i32 = arith.constant 0 : i32
    %c0_i32_0 = arith.constant 0 : i32
    %c0_i32_1 = arith.constant 0 : i32
    return %c0_i32, %c0_i32_0 : i32, i32
  }
  func.func @transform_6(%arg0: i32) -> (i32, i32) {
    %c0_i32 = arith.constant 0 : i32
    %c0_i32_0 = arith.constant 0 : i32
    %c0_i32_1 = arith.constant 0 : i32
    return %c0_i32, %c0_i32_0 : i32, i32
  }
  func.func @transform_7(%arg0: i32) -> (i32, i32) {
    %c0_i32 = arith.constant 0 : i32
    %c0_i32_0 = arith.constant 0 : i32
    %c0_i32_1 = arith.constant 0 : i32
    return %c0_i32, %c0_i32_0 : i32, i32
  }
  func.func @transform_8(%arg0: i32) -> (i32, i32) {
    %c0_i32 = arith.constant 0 : i32
    %c0_i32_0 = arith.constant 0 : i32
    %c0_i32_1 = arith.constant 0 : i32
    return %c0_i32, %c0_i32_0 : i32, i32
  }
  func.func @transform_9(%arg0: i32) -> (i32, i32) {
    %c0_i32 = arith.constant 0 : i32
    %c0_i32_0 = arith.constant 0 : i32
    %c0_i32_1 = arith.constant 0 : i32
    return %c0_i32, %c0_i32_0 : i32, i32
  }
  func.func @transform_10(%arg0: i32) -> (i32, i32) {
    %c0_i32 = arith.constant 0 : i32
    %c0_i32_0 = arith.constant 0 : i32
    %c0_i32_1 = arith.constant 0 : i32
    return %c0_i32, %c0_i32_0 : i32, i32
  }
  func.func @transform_11(%arg0: i32) -> (i32, i32, i32) {
    %c0_i32 = arith.constant 0 : i32
    %c0_i32_0 = arith.constant 0 : i32
    %c0_i32_1 = arith.constant 0 : i32
    return %arg0, %c0_i32, %c0_i32_0 : i32, i32, i32
  }
}

module attributes {stable_mosaic.version = 11 : i64} {
  func.func @_conv_kernel(%arg0: i32, %arg1: memref<1x4x16xf32, #tpu.memory_space<vmem>>, %arg2: memref<32x12xf32, #tpu.memory_space<vmem>>, %arg3: memref<32x1xf32, #tpu.memory_space<vmem>>, %arg4: memref<1x32x16xf32, #tpu.memory_space<vmem>>) attributes {dimension_semantics = [#tpu.dimension_semantics<parallel>], iteration_bounds = array<i64: 2>, scalar_prefetch = 0 : i64, scratch_operands = 0 : i64, tpu.core_type = #tpu.core_type<tc>, window_params = [{transform_indices = @transform_0, window_bounds = array<i64: 1, 4, 16>}, {pipeline_mode = #tpu.pipeline_mode<synchronous>, transform_indices = @transform_1, window_bounds = array<i64: 32, 12>}, {pipeline_mode = #tpu.pipeline_mode<synchronous>, transform_indices = @transform_2, window_bounds = array<i64: 32, 1>}, {transform_indices = @transform_3, window_bounds = array<i64: 1, 32, 16>}]} {
    %c0 = arith.constant 0 : index
    %c0_0 = arith.constant 0 : index
    %c0_1 = arith.constant 0 : index
    %0 = vector.load %arg1[%c0, %c0_0, %c0_1] : memref<1x4x16xf32, #tpu.memory_space<vmem>>, vector<1x4x16xf32>
    %1 = vector.shape_cast %0 : vector<1x4x16xf32> to vector<4x16xf32>
    %c0_2 = arith.constant 0 : index
    %c0_3 = arith.constant 0 : index
    %2 = vector.load %arg2[%c0_2, %c0_3] : memref<32x12xf32, #tpu.memory_space<vmem>>, vector<32x12xf32>
    %c0_4 = arith.constant 0 : index
    %c0_5 = arith.constant 0 : index
    %3 = vector.load %arg3[%c0_4, %c0_5] : memref<32x1xf32, #tpu.memory_space<vmem>>, vector<32x1xf32>
    %cst = arith.constant 0.000000e+00 : f32
    %4 = vector.broadcast %cst : f32 to vector<4x1xf32>
    %5 = vector.extract_strided_slice %1 {offsets = [0, 0], sizes = [4, 15], strides = [1, 1]} : vector<4x16xf32> to vector<4x15xf32>
    %6 = tpu.concatenate %4, %5 in 1 : vector<4x1xf32>, vector<4x15xf32> -> vector<4x16xf32>
    %7 = vector.extract_strided_slice %1 {offsets = [0, 1], sizes = [4, 15], strides = [1, 1]} : vector<4x16xf32> to vector<4x15xf32>
    %8 = tpu.concatenate %7, %4 in 1 : vector<4x15xf32>, vector<4x1xf32> -> vector<4x16xf32>
    %9 = vector.extract_strided_slice %2 {offsets = [0, 0], sizes = [32, 4], strides = [1, 1]} : vector<32x12xf32> to vector<32x4xf32>
    %cst_6 = arith.constant dense<0.000000e+00> : vector<32x16xf32>
    %10 = tpu.matmul %9, %6, %cst_6 {dimension_numbers = #tpu.dot_dimension_numbers<[1], [0], [0], [1], [0, 0, 1, 1], [], []>} : vector<32x4xf32>, vector<4x16xf32>, vector<32x16xf32> -> vector<32x16xf32>
    %11 = vector.extract_strided_slice %2 {offsets = [0, 4], sizes = [32, 4], strides = [1, 1]} : vector<32x12xf32> to vector<32x4xf32>
    %cst_7 = arith.constant dense<0.000000e+00> : vector<32x16xf32>
    %12 = tpu.matmul %11, %1, %cst_7 {dimension_numbers = #tpu.dot_dimension_numbers<[1], [0], [0], [1], [0, 0, 1, 1], [], []>} : vector<32x4xf32>, vector<4x16xf32>, vector<32x16xf32> -> vector<32x16xf32>
    %13 = arith.addf %10, %12 : vector<32x16xf32>
    %14 = vector.extract_strided_slice %2 {offsets = [0, 8], sizes = [32, 4], strides = [1, 1]} : vector<32x12xf32> to vector<32x4xf32>
    %cst_8 = arith.constant dense<0.000000e+00> : vector<32x16xf32>
    %15 = tpu.matmul %14, %8, %cst_8 {dimension_numbers = #tpu.dot_dimension_numbers<[1], [0], [0], [1], [0, 0, 1, 1], [], []>} : vector<32x4xf32>, vector<4x16xf32>, vector<32x16xf32> -> vector<32x16xf32>
    %16 = arith.addf %13, %15 : vector<32x16xf32>
    %17 = vector.broadcast %3 : vector<32x1xf32> to vector<32x16xf32>
    %18 = arith.addf %16, %17 : vector<32x16xf32>
    %c0_9 = arith.constant 0 : index
    %c0_10 = arith.constant 0 : index
    %c0_11 = arith.constant 0 : index
    %19 = vector.load %arg4[%c0_9, %c0_10, %c0_11] : memref<1x32x16xf32, #tpu.memory_space<vmem>>, vector<1x32x16xf32>
    %20 = vector.shape_cast %19 : vector<1x32x16xf32> to vector<32x16xf32>
    %21 = vector.shape_cast %18 : vector<32x16xf32> to vector<1x32x16xf32>
    tpu.vector_store %arg4[%c0_9, %c0_10, %c0_11], %21 {strides = array<i32>} : memref<1x32x16xf32, #tpu.memory_space<vmem>>, vector<1x32x16xf32>,
    return
  }
  func.func @transform_0(%arg0: i32) -> (i32, i32, i32) {
    %c0_i32 = arith.constant 0 : i32
    %c0_i32_0 = arith.constant 0 : i32
    %c0_i32_1 = arith.constant 0 : i32
    return %arg0, %c0_i32, %c0_i32_0 : i32, i32, i32
  }
  func.func @transform_1(%arg0: i32) -> (i32, i32) {
    %c0_i32 = arith.constant 0 : i32
    %c0_i32_0 = arith.constant 0 : i32
    %c0_i32_1 = arith.constant 0 : i32
    return %c0_i32, %c0_i32_0 : i32, i32
  }
  func.func @transform_2(%arg0: i32) -> (i32, i32) {
    %c0_i32 = arith.constant 0 : i32
    %c0_i32_0 = arith.constant 0 : i32
    %c0_i32_1 = arith.constant 0 : i32
    return %c0_i32, %c0_i32_0 : i32, i32
  }
  func.func @transform_3(%arg0: i32) -> (i32, i32, i32) {
    %c0_i32 = arith.constant 0 : i32
    %c0_i32_0 = arith.constant 0 : i32
    %c0_i32_1 = arith.constant 0 : i32
    return %arg0, %c0_i32, %c0_i32_0 : i32, i32, i32
  }
}

module attributes {stable_mosaic.version = 11 : i64} {
  func.func @_upsample_conv_kernel(%arg0: i32, %arg1: memref<1x32x16xf32, #tpu.memory_space<vmem>>, %arg2: memref<16x32xf32, #tpu.memory_space<vmem>>, %arg3: memref<32x96xf32, #tpu.memory_space<vmem>>, %arg4: memref<32x1xf32, #tpu.memory_space<vmem>>, %arg5: memref<1x32x32xf32, #tpu.memory_space<vmem>>) attributes {dimension_semantics = [#tpu.dimension_semantics<parallel>], iteration_bounds = array<i64: 2>, scalar_prefetch = 0 : i64, scratch_operands = 0 : i64, tpu.core_type = #tpu.core_type<tc>, window_params = [{transform_indices = @transform_0, window_bounds = array<i64: 1, 32, 16>}, {pipeline_mode = #tpu.pipeline_mode<synchronous>, transform_indices = @transform_1, window_bounds = array<i64: 16, 32>}, {pipeline_mode = #tpu.pipeline_mode<synchronous>, transform_indices = @transform_2, window_bounds = array<i64: 32, 96>}, {pipeline_mode = #tpu.pipeline_mode<synchronous>, transform_indices = @transform_3, window_bounds = array<i64: 32, 1>}, {transform_indices = @transform_4, window_bounds = array<i64: 1, 32, 32>}]} {
    %c0 = arith.constant 0 : index
    %c0_0 = arith.constant 0 : index
    %c0_1 = arith.constant 0 : index
    %0 = vector.load %arg1[%c0, %c0_0, %c0_1] : memref<1x32x16xf32, #tpu.memory_space<vmem>>, vector<1x32x16xf32>
    %1 = vector.shape_cast %0 : vector<1x32x16xf32> to vector<32x16xf32>
    %c0_2 = arith.constant 0 : index
    %c0_3 = arith.constant 0 : index
    %2 = vector.load %arg2[%c0_2, %c0_3] : memref<16x32xf32, #tpu.memory_space<vmem>>, vector<16x32xf32>
    %cst = arith.constant dense<0.000000e+00> : vector<32x32xf32>
    %3 = tpu.matmul %1, %2, %cst {dimension_numbers = #tpu.dot_dimension_numbers<[1], [0], [0], [1], [0, 0, 1, 1], [], []>} : vector<32x16xf32>, vector<16x32xf32>, vector<32x32xf32> -> vector<32x32xf32>
    %c0_4 = arith.constant 0 : index
    %c0_5 = arith.constant 0 : index
    %4 = vector.load %arg3[%c0_4, %c0_5] : memref<32x96xf32, #tpu.memory_space<vmem>>, vector<32x96xf32>
    %c0_6 = arith.constant 0 : index
    %c0_7 = arith.constant 0 : index
    %5 = vector.load %arg4[%c0_6, %c0_7] : memref<32x1xf32, #tpu.memory_space<vmem>>, vector<32x1xf32>
    %cst_8 = arith.constant 0.000000e+00 : f32
    %6 = vector.broadcast %cst_8 : f32 to vector<32x1xf32>
    %7 = vector.extract_strided_slice %3 {offsets = [0, 0], sizes = [32, 31], strides = [1, 1]} : vector<32x32xf32> to vector<32x31xf32>
    %8 = tpu.concatenate %6, %7 in 1 : vector<32x1xf32>, vector<32x31xf32> -> vector<32x32xf32>
    %9 = vector.extract_strided_slice %3 {offsets = [0, 1], sizes = [32, 31], strides = [1, 1]} : vector<32x32xf32> to vector<32x31xf32>
    %10 = tpu.concatenate %9, %6 in 1 : vector<32x31xf32>, vector<32x1xf32> -> vector<32x32xf32>
    %11 = tpu.concatenate %8, %3, %10 in 0 : vector<32x32xf32>, vector<32x32xf32>, vector<32x32xf32> -> vector<96x32xf32>
    %cst_9 = arith.constant dense<0.000000e+00> : vector<32x32xf32>
    %12 = tpu.matmul %4, %11, %cst_9 {dimension_numbers = #tpu.dot_dimension_numbers<[1], [0], [0], [1], [0, 0, 1, 1], [], []>} : vector<32x96xf32>, vector<96x32xf32>, vector<32x32xf32> -> vector<32x32xf32>
    %13 = vector.broadcast %5 : vector<32x1xf32> to vector<32x32xf32>
    %14 = arith.addf %12, %13 : vector<32x32xf32>
    %c0_10 = arith.constant 0 : index
    %c0_11 = arith.constant 0 : index
    %c0_12 = arith.constant 0 : index
    %15 = vector.load %arg5[%c0_10, %c0_11, %c0_12] : memref<1x32x32xf32, #tpu.memory_space<vmem>>, vector<1x32x32xf32>
    %16 = vector.shape_cast %15 : vector<1x32x32xf32> to vector<32x32xf32>
    %17 = vector.shape_cast %14 : vector<32x32xf32> to vector<1x32x32xf32>
    tpu.vector_store %arg5[%c0_10, %c0_11, %c0_12], %17 {strides = array<i32>} : memref<1x32x32xf32, #tpu.memory_space<vmem>>, vector<1x32x32xf32>,
    return
  }
  func.func @transform_0(%arg0: i32) -> (i32, i32, i32) {
    %c0_i32 = arith.constant 0 : i32
    %c0_i32_0 = arith.constant 0 : i32
    %c0_i32_1 = arith.constant 0 : i32
    return %arg0, %c0_i32, %c0_i32_0 : i32, i32, i32
  }
  func.func @transform_1(%arg0: i32) -> (i32, i32) {
    %c0_i32 = arith.constant 0 : i32
    %c0_i32_0 = arith.constant 0 : i32
    %c0_i32_1 = arith.constant 0 : i32
    return %c0_i32, %c0_i32_0 : i32, i32
  }
  func.func @transform_2(%arg0: i32) -> (i32, i32) {
    %c0_i32 = arith.constant 0 : i32
    %c0_i32_0 = arith.constant 0 : i32
    %c0_i32_1 = arith.constant 0 : i32
    return %c0_i32, %c0_i32_0 : i32, i32
  }
  func.func @transform_3(%arg0: i32) -> (i32, i32) {
    %c0_i32 = arith.constant 0 : i32
    %c0_i32_0 = arith.constant 0 : i32
    %c0_i32_1 = arith.constant 0 : i32
    return %c0_i32, %c0_i32_0 : i32, i32
  }
  func.func @transform_4(%arg0: i32) -> (i32, i32, i32) {
    %c0_i32 = arith.constant 0 : i32
    %c0_i32_0 = arith.constant 0 : i32
    %c0_i32_1 = arith.constant 0 : i32
    return %arg0, %c0_i32, %c0_i32_0 : i32, i32, i32
  }
}

module attributes {stable_mosaic.version = 11 : i64} {
  func.func @_resblock_nin_kernel(%arg0: i32, %arg1: memref<1x32x32xf32, #tpu.memory_space<vmem>>, %arg2: memref<32x32xf32, #tpu.memory_space<vmem>>, %arg3: memref<32x1xf32, #tpu.memory_space<vmem>>, %arg4: memref<32x1xf32, #tpu.memory_space<vmem>>, %arg5: memref<16x96xf32, #tpu.memory_space<vmem>>, %arg6: memref<16x1xf32, #tpu.memory_space<vmem>>, %arg7: memref<16x16xf32, #tpu.memory_space<vmem>>, %arg8: memref<16x1xf32, #tpu.memory_space<vmem>>, %arg9: memref<16x1xf32, #tpu.memory_space<vmem>>, %arg10: memref<16x48xf32, #tpu.memory_space<vmem>>, %arg11: memref<16x1xf32, #tpu.memory_space<vmem>>, %arg12: memref<16x32xf32, #tpu.memory_space<vmem>>, %arg13: memref<16x1xf32, #tpu.memory_space<vmem>>, %arg14: memref<1x16x32xf32, #tpu.memory_space<vmem>>) attributes {dimension_semantics = [#tpu.dimension_semantics<parallel>], iteration_bounds = array<i64: 2>, scalar_prefetch = 0 : i64, scratch_operands = 0 : i64, tpu.core_type = #tpu.core_type<tc>, window_params = [{transform_indices = @transform_0, window_bounds = array<i64: 1, 32, 32>}, {pipeline_mode = #tpu.pipeline_mode<synchronous>, transform_indices = @transform_1, window_bounds = array<i64: 32, 32>}, {pipeline_mode = #tpu.pipeline_mode<synchronous>, transform_indices = @transform_2, window_bounds = array<i64: 32, 1>}, {pipeline_mode = #tpu.pipeline_mode<synchronous>, transform_indices = @transform_3, window_bounds = array<i64: 32, 1>}, {pipeline_mode = #tpu.pipeline_mode<synchronous>, transform_indices = @transform_4, window_bounds = array<i64: 16, 96>}, {pipeline_mode = #tpu.pipeline_mode<synchronous>, transform_indices = @transform_5, window_bounds = array<i64: 16, 1>}, {pipeline_mode = #tpu.pipeline_mode<synchronous>, transform_indices = @transform_6, window_bounds = array<i64: 16, 16>}, {pipeline_mode = #tpu.pipeline_mode<synchronous>, transform_indices = @transform_7, window_bounds = array<i64: 16, 1>}, {pipeline_mode = #tpu.pipeline_mode<synchronous>, transform_indices = @transform_8, window_bounds = array<i64: 16, 1>}, {pipeline_mode = #tpu.pipeline_mode<synchronous>, transform_indices = @transform_9, window_bounds = array<i64: 16, 48>}, {pipeline_mode = #tpu.pipeline_mode<synchronous>, transform_indices = @transform_10, window_bounds = array<i64: 16, 1>}, {pipeline_mode = #tpu.pipeline_mode<synchronous>, transform_indices = @transform_11, window_bounds = array<i64: 16, 32>}, {pipeline_mode = #tpu.pipeline_mode<synchronous>, transform_indices = @transform_12, window_bounds = array<i64: 16, 1>}, {transform_indices = @transform_13, window_bounds = array<i64: 1, 16, 32>}]} {
    %c0 = arith.constant 0 : index
    %c0_0 = arith.constant 0 : index
    %c0_1 = arith.constant 0 : index
    %0 = vector.load %arg1[%c0, %c0_0, %c0_1] : memref<1x32x32xf32, #tpu.memory_space<vmem>>, vector<1x32x32xf32>
    %1 = vector.shape_cast %0 : vector<1x32x32xf32> to vector<32x32xf32>
    %c0_2 = arith.constant 0 : index
    %c0_3 = arith.constant 0 : index
    %2 = vector.load %arg2[%c0_2, %c0_3] : memref<32x32xf32, #tpu.memory_space<vmem>>, vector<32x32xf32>
    %c0_4 = arith.constant 0 : index
    %c0_5 = arith.constant 0 : index
    %3 = vector.load %arg3[%c0_4, %c0_5] : memref<32x1xf32, #tpu.memory_space<vmem>>, vector<32x1xf32>
    %c0_6 = arith.constant 0 : index
    %c0_7 = arith.constant 0 : index
    %4 = vector.load %arg4[%c0_6, %c0_7] : memref<32x1xf32, #tpu.memory_space<vmem>>, vector<32x1xf32>
    %cst = arith.constant dense<0.000000e+00> : vector<32xf32>
    %5 = vector.multi_reduction <add>, %1, %cst [1] : vector<32x32xf32> to vector<32xf32>
    %6 = vector.shape_cast %5 : vector<32xf32> to vector<32x1xf32>
    %7 = arith.mulf %1, %1 : vector<32x32xf32>
    %cst_8 = arith.constant dense<0.000000e+00> : vector<32xf32>
    %8 = vector.multi_reduction <add>, %7, %cst_8 [1] : vector<32x32xf32> to vector<32xf32>
    %9 = vector.shape_cast %8 : vector<32xf32> to vector<32x1xf32>
    %cst_9 = arith.constant dense<0.000000e+00> : vector<32x1xf32>
    %10 = tpu.matmul %2, %6, %cst_9 {dimension_numbers = #tpu.dot_dimension_numbers<[1], [0], [0], [1], [0, 0, 1, 1], [], []>} : vector<32x32xf32>, vector<32x1xf32>, vector<32x1xf32> -> vector<32x1xf32>
    %cst_10 = arith.constant dense<0.000000e+00> : vector<32x1xf32>
    %11 = tpu.matmul %2, %9, %cst_10 {dimension_numbers = #tpu.dot_dimension_numbers<[1], [0], [0], [1], [0, 0, 1, 1], [], []>} : vector<32x32xf32>, vector<32x1xf32>, vector<32x1xf32> -> vector<32x1xf32>
    %cst_11 = arith.constant 3.906250e-03 : f32
    %12 = vector.broadcast %cst_11 : f32 to vector<32x1xf32>
    %13 = arith.mulf %10, %12 : vector<32x1xf32>
    %cst_12 = arith.constant 3.906250e-03 : f32
    %14 = vector.broadcast %cst_12 : f32 to vector<32x1xf32>
    %15 = arith.mulf %11, %14 : vector<32x1xf32>
    %16 = arith.mulf %13, %13 : vector<32x1xf32>
    %17 = arith.subf %15, %16 : vector<32x1xf32>
    %cst_13 = arith.constant 9.99999997E-7 : f32
    %18 = vector.broadcast %cst_13 : f32 to vector<32x1xf32>
    %19 = arith.addf %17, %18 : vector<32x1xf32>
    %20 = math.rsqrt %19 : vector<32x1xf32>
    %21 = vector.broadcast %13 : vector<32x1xf32> to vector<32x32xf32>
    %22 = arith.subf %1, %21 : vector<32x32xf32>
    %23 = vector.broadcast %20 : vector<32x1xf32> to vector<32x32xf32>
    %24 = arith.mulf %22, %23 : vector<32x32xf32>
    %25 = vector.broadcast %3 : vector<32x1xf32> to vector<32x32xf32>
    %26 = arith.mulf %24, %25 : vector<32x32xf32>
    %27 = vector.broadcast %4 : vector<32x1xf32> to vector<32x32xf32>
    %28 = arith.addf %26, %27 : vector<32x32xf32>
    %29 = arith.negf %28 : vector<32x32xf32>
    %30 = math.exp %29 : vector<32x32xf32>
    %cst_14 = arith.constant 1.000000e+00 : f32
    %31 = vector.broadcast %cst_14 : f32 to vector<32x32xf32>
    %32 = arith.addf %31, %30 : vector<32x32xf32>
    %33 = arith.divf %31, %32 : vector<32x32xf32>
    %34 = arith.mulf %28, %33 : vector<32x32xf32>
    %c0_15 = arith.constant 0 : index
    %c0_16 = arith.constant 0 : index
    %35 = vector.load %arg5[%c0_15, %c0_16] : memref<16x96xf32, #tpu.memory_space<vmem>>, vector<16x96xf32>
    %c0_17 = arith.constant 0 : index
    %c0_18 = arith.constant 0 : index
    %36 = vector.load %arg6[%c0_17, %c0_18] : memref<16x1xf32, #tpu.memory_space<vmem>>, vector<16x1xf32>
    %cst_19 = arith.constant 0.000000e+00 : f32
    %37 = vector.broadcast %cst_19 : f32 to vector<32x1xf32>
    %38 = vector.extract_strided_slice %34 {offsets = [0, 0], sizes = [32, 31], strides = [1, 1]} : vector<32x32xf32> to vector<32x31xf32>
    %39 = tpu.concatenate %37, %38 in 1 : vector<32x1xf32>, vector<32x31xf32> -> vector<32x32xf32>
    %40 = vector.extract_strided_slice %34 {offsets = [0, 1], sizes = [32, 31], strides = [1, 1]} : vector<32x32xf32> to vector<32x31xf32>
    %41 = tpu.concatenate %40, %37 in 1 : vector<32x31xf32>, vector<32x1xf32> -> vector<32x32xf32>
    %42 = tpu.concatenate %39, %34, %41 in 0 : vector<32x32xf32>, vector<32x32xf32>, vector<32x32xf32> -> vector<96x32xf32>
    %cst_20 = arith.constant dense<0.000000e+00> : vector<16x32xf32>
    %43 = tpu.matmul %35, %42, %cst_20 {dimension_numbers = #tpu.dot_dimension_numbers<[1], [0], [0], [1], [0, 0, 1, 1], [], []>} : vector<16x96xf32>, vector<96x32xf32>, vector<16x32xf32> -> vector<16x32xf32>
    %44 = vector.broadcast %36 : vector<16x1xf32> to vector<16x32xf32>
    %45 = arith.addf %43, %44 : vector<16x32xf32>
    %c0_21 = arith.constant 0 : index
    %c0_22 = arith.constant 0 : index
    %46 = vector.load %arg7[%c0_21, %c0_22] : memref<16x16xf32, #tpu.memory_space<vmem>>, vector<16x16xf32>
    %c0_23 = arith.constant 0 : index
    %c0_24 = arith.constant 0 : index
    %47 = vector.load %arg8[%c0_23, %c0_24] : memref<16x1xf32, #tpu.memory_space<vmem>>, vector<16x1xf32>
    %c0_25 = arith.constant 0 : index
    %c0_26 = arith.constant 0 : index
    %48 = vector.load %arg9[%c0_25, %c0_26] : memref<16x1xf32, #tpu.memory_space<vmem>>, vector<16x1xf32>
    %cst_27 = arith.constant dense<0.000000e+00> : vector<16xf32>
    %49 = vector.multi_reduction <add>, %45, %cst_27 [1] : vector<16x32xf32> to vector<16xf32>
    %50 = vector.shape_cast %49 : vector<16xf32> to vector<16x1xf32>
    %51 = arith.mulf %45, %45 : vector<16x32xf32>
    %cst_28 = arith.constant dense<0.000000e+00> : vector<16xf32>
    %52 = vector.multi_reduction <add>, %51, %cst_28 [1] : vector<16x32xf32> to vector<16xf32>
    %53 = vector.shape_cast %52 : vector<16xf32> to vector<16x1xf32>
    %cst_29 = arith.constant dense<0.000000e+00> : vector<16x1xf32>
    %54 = tpu.matmul %46, %50, %cst_29 {dimension_numbers = #tpu.dot_dimension_numbers<[1], [0], [0], [1], [0, 0, 1, 1], [], []>} : vector<16x16xf32>, vector<16x1xf32>, vector<16x1xf32> -> vector<16x1xf32>
    %cst_30 = arith.constant dense<0.000000e+00> : vector<16x1xf32>
    %55 = tpu.matmul %46, %53, %cst_30 {dimension_numbers = #tpu.dot_dimension_numbers<[1], [0], [0], [1], [0, 0, 1, 1], [], []>} : vector<16x16xf32>, vector<16x1xf32>, vector<16x1xf32> -> vector<16x1xf32>
    %cst_31 = arith.constant 7.812500e-03 : f32
    %56 = vector.broadcast %cst_31 : f32 to vector<16x1xf32>
    %57 = arith.mulf %54, %56 : vector<16x1xf32>
    %cst_32 = arith.constant 7.812500e-03 : f32
    %58 = vector.broadcast %cst_32 : f32 to vector<16x1xf32>
    %59 = arith.mulf %55, %58 : vector<16x1xf32>
    %60 = arith.mulf %57, %57 : vector<16x1xf32>
    %61 = arith.subf %59, %60 : vector<16x1xf32>
    %cst_33 = arith.constant 9.99999997E-7 : f32
    %62 = vector.broadcast %cst_33 : f32 to vector<16x1xf32>
    %63 = arith.addf %61, %62 : vector<16x1xf32>
    %64 = math.rsqrt %63 : vector<16x1xf32>
    %65 = vector.broadcast %57 : vector<16x1xf32> to vector<16x32xf32>
    %66 = arith.subf %45, %65 : vector<16x32xf32>
    %67 = vector.broadcast %64 : vector<16x1xf32> to vector<16x32xf32>
    %68 = arith.mulf %66, %67 : vector<16x32xf32>
    %69 = vector.broadcast %47 : vector<16x1xf32> to vector<16x32xf32>
    %70 = arith.mulf %68, %69 : vector<16x32xf32>
    %71 = vector.broadcast %48 : vector<16x1xf32> to vector<16x32xf32>
    %72 = arith.addf %70, %71 : vector<16x32xf32>
    %73 = arith.negf %72 : vector<16x32xf32>
    %74 = math.exp %73 : vector<16x32xf32>
    %cst_34 = arith.constant 1.000000e+00 : f32
    %75 = vector.broadcast %cst_34 : f32 to vector<16x32xf32>
    %76 = arith.addf %75, %74 : vector<16x32xf32>
    %77 = arith.divf %75, %76 : vector<16x32xf32>
    %78 = arith.mulf %72, %77 : vector<16x32xf32>
    %c0_35 = arith.constant 0 : index
    %c0_36 = arith.constant 0 : index
    %79 = vector.load %arg10[%c0_35, %c0_36] : memref<16x48xf32, #tpu.memory_space<vmem>>, vector<16x48xf32>
    %c0_37 = arith.constant 0 : index
    %c0_38 = arith.constant 0 : index
    %80 = vector.load %arg11[%c0_37, %c0_38] : memref<16x1xf32, #tpu.memory_space<vmem>>, vector<16x1xf32>
    %cst_39 = arith.constant 0.000000e+00 : f32
    %81 = vector.broadcast %cst_39 : f32 to vector<16x1xf32>
    %82 = vector.extract_strided_slice %78 {offsets = [0, 0], sizes = [16, 31], strides = [1, 1]} : vector<16x32xf32> to vector<16x31xf32>
    %83 = tpu.concatenate %81, %82 in 1 : vector<16x1xf32>, vector<16x31xf32> -> vector<16x32xf32>
    %84 = vector.extract_strided_slice %78 {offsets = [0, 1], sizes = [16, 31], strides = [1, 1]} : vector<16x32xf32> to vector<16x31xf32>
    %85 = tpu.concatenate %84, %81 in 1 : vector<16x31xf32>, vector<16x1xf32> -> vector<16x32xf32>
    %86 = tpu.concatenate %83, %78, %85 in 0 : vector<16x32xf32>, vector<16x32xf32>, vector<16x32xf32> -> vector<48x32xf32>
    %cst_40 = arith.constant dense<0.000000e+00> : vector<16x32xf32>
    %87 = tpu.matmul %79, %86, %cst_40 {dimension_numbers = #tpu.dot_dimension_numbers<[1], [0], [0], [1], [0, 0, 1, 1], [], []>} : vector<16x48xf32>, vector<48x32xf32>, vector<16x32xf32> -> vector<16x32xf32>
    %88 = vector.broadcast %80 : vector<16x1xf32> to vector<16x32xf32>
    %89 = arith.addf %87, %88 : vector<16x32xf32>
    %c0_41 = arith.constant 0 : index
    %c0_42 = arith.constant 0 : index
    %90 = vector.load %arg12[%c0_41, %c0_42] : memref<16x32xf32, #tpu.memory_space<vmem>>, vector<16x32xf32>
    %cst_43 = arith.constant dense<0.000000e+00> : vector<16x32xf32>
    %91 = tpu.matmul %90, %1, %cst_43 {dimension_numbers = #tpu.dot_dimension_numbers<[1], [0], [0], [1], [0, 0, 1, 1], [], []>} : vector<16x32xf32>, vector<32x32xf32>, vector<16x32xf32> -> vector<16x32xf32>
    %c0_44 = arith.constant 0 : index
    %c0_45 = arith.constant 0 : index
    %92 = vector.load %arg13[%c0_44, %c0_45] : memref<16x1xf32, #tpu.memory_space<vmem>>, vector<16x1xf32>
    %93 = vector.broadcast %92 : vector<16x1xf32> to vector<16x32xf32>
    %94 = arith.addf %91, %93 : vector<16x32xf32>
    %95 = arith.addf %94, %89 : vector<16x32xf32>
    %c0_46 = arith.constant 0 : index
    %c0_47 = arith.constant 0 : index
    %c0_48 = arith.constant 0 : index
    %96 = vector.load %arg14[%c0_46, %c0_47, %c0_48] : memref<1x16x32xf32, #tpu.memory_space<vmem>>, vector<1x16x32xf32>
    %97 = vector.shape_cast %96 : vector<1x16x32xf32> to vector<16x32xf32>
    %98 = vector.shape_cast %95 : vector<16x32xf32> to vector<1x16x32xf32>
    tpu.vector_store %arg14[%c0_46, %c0_47, %c0_48], %98 {strides = array<i32>} : memref<1x16x32xf32, #tpu.memory_space<vmem>>, vector<1x16x32xf32>,
    return
  }
  func.func @transform_0(%arg0: i32) -> (i32, i32, i32) {
    %c0_i32 = arith.constant 0 : i32
    %c0_i32_0 = arith.constant 0 : i32
    %c0_i32_1 = arith.constant 0 : i32
    return %arg0, %c0_i32, %c0_i32_0 : i32, i32, i32
  }
  func.func @transform_1(%arg0: i32) -> (i32, i32) {
    %c0_i32 = arith.constant 0 : i32
    %c0_i32_0 = arith.constant 0 : i32
    %c0_i32_1 = arith.constant 0 : i32
    return %c0_i32, %c0_i32_0 : i32, i32
  }
  func.func @transform_2(%arg0: i32) -> (i32, i32) {
    %c0_i32 = arith.constant 0 : i32
    %c0_i32_0 = arith.constant 0 : i32
    %c0_i32_1 = arith.constant 0 : i32
    return %c0_i32, %c0_i32_0 : i32, i32
  }
  func.func @transform_3(%arg0: i32) -> (i32, i32) {
    %c0_i32 = arith.constant 0 : i32
    %c0_i32_0 = arith.constant 0 : i32
    %c0_i32_1 = arith.constant 0 : i32
    return %c0_i32, %c0_i32_0 : i32, i32
  }
  func.func @transform_4(%arg0: i32) -> (i32, i32) {
    %c0_i32 = arith.constant 0 : i32
    %c0_i32_0 = arith.constant 0 : i32
    %c0_i32_1 = arith.constant 0 : i32
    return %c0_i32, %c0_i32_0 : i32, i32
  }
  func.func @transform_5(%arg0: i32) -> (i32, i32) {
    %c0_i32 = arith.constant 0 : i32
    %c0_i32_0 = arith.constant 0 : i32
    %c0_i32_1 = arith.constant 0 : i32
    return %c0_i32, %c0_i32_0 : i32, i32
  }
  func.func @transform_6(%arg0: i32) -> (i32, i32) {
    %c0_i32 = arith.constant 0 : i32
    %c0_i32_0 = arith.constant 0 : i32
    %c0_i32_1 = arith.constant 0 : i32
    return %c0_i32, %c0_i32_0 : i32, i32
  }
  func.func @transform_7(%arg0: i32) -> (i32, i32) {
    %c0_i32 = arith.constant 0 : i32
    %c0_i32_0 = arith.constant 0 : i32
    %c0_i32_1 = arith.constant 0 : i32
    return %c0_i32, %c0_i32_0 : i32, i32
  }
  func.func @transform_8(%arg0: i32) -> (i32, i32) {
    %c0_i32 = arith.constant 0 : i32
    %c0_i32_0 = arith.constant 0 : i32
    %c0_i32_1 = arith.constant 0 : i32
    return %c0_i32, %c0_i32_0 : i32, i32
  }
  func.func @transform_9(%arg0: i32) -> (i32, i32) {
    %c0_i32 = arith.constant 0 : i32
    %c0_i32_0 = arith.constant 0 : i32
    %c0_i32_1 = arith.constant 0 : i32
    return %c0_i32, %c0_i32_0 : i32, i32
  }
  func.func @transform_10(%arg0: i32) -> (i32, i32) {
    %c0_i32 = arith.constant 0 : i32
    %c0_i32_0 = arith.constant 0 : i32
    %c0_i32_1 = arith.constant 0 : i32
    return %c0_i32, %c0_i32_0 : i32, i32
  }
  func.func @transform_11(%arg0: i32) -> (i32, i32) {
    %c0_i32 = arith.constant 0 : i32
    %c0_i32_0 = arith.constant 0 : i32
    %c0_i32_1 = arith.constant 0 : i32
    return %c0_i32, %c0_i32_0 : i32, i32
  }
  func.func @transform_12(%arg0: i32) -> (i32, i32) {
    %c0_i32 = arith.constant 0 : i32
    %c0_i32_0 = arith.constant 0 : i32
    %c0_i32_1 = arith.constant 0 : i32
    return %c0_i32, %c0_i32_0 : i32, i32
  }
  func.func @transform_13(%arg0: i32) -> (i32, i32, i32) {
    %c0_i32 = arith.constant 0 : i32
    %c0_i32_0 = arith.constant 0 : i32
    %c0_i32_1 = arith.constant 0 : i32
    return %arg0, %c0_i32, %c0_i32_0 : i32, i32, i32
  }
}

module attributes {stable_mosaic.version = 11 : i64} {
  func.func @_upsample_conv_kernel(%arg0: i32, %arg1: memref<1x16x32xf32, #tpu.memory_space<vmem>>, %arg2: memref<32x64xf32, #tpu.memory_space<vmem>>, %arg3: memref<16x48xf32, #tpu.memory_space<vmem>>, %arg4: memref<16x1xf32, #tpu.memory_space<vmem>>, %arg5: memref<1x16x64xf32, #tpu.memory_space<vmem>>) attributes {dimension_semantics = [#tpu.dimension_semantics<parallel>], iteration_bounds = array<i64: 2>, scalar_prefetch = 0 : i64, scratch_operands = 0 : i64, tpu.core_type = #tpu.core_type<tc>, window_params = [{transform_indices = @transform_0, window_bounds = array<i64: 1, 16, 32>}, {pipeline_mode = #tpu.pipeline_mode<synchronous>, transform_indices = @transform_1, window_bounds = array<i64: 32, 64>}, {pipeline_mode = #tpu.pipeline_mode<synchronous>, transform_indices = @transform_2, window_bounds = array<i64: 16, 48>}, {pipeline_mode = #tpu.pipeline_mode<synchronous>, transform_indices = @transform_3, window_bounds = array<i64: 16, 1>}, {transform_indices = @transform_4, window_bounds = array<i64: 1, 16, 64>}]} {
    %c0 = arith.constant 0 : index
    %c0_0 = arith.constant 0 : index
    %c0_1 = arith.constant 0 : index
    %0 = vector.load %arg1[%c0, %c0_0, %c0_1] : memref<1x16x32xf32, #tpu.memory_space<vmem>>, vector<1x16x32xf32>
    %1 = vector.shape_cast %0 : vector<1x16x32xf32> to vector<16x32xf32>
    %c0_2 = arith.constant 0 : index
    %c0_3 = arith.constant 0 : index
    %2 = vector.load %arg2[%c0_2, %c0_3] : memref<32x64xf32, #tpu.memory_space<vmem>>, vector<32x64xf32>
    %cst = arith.constant dense<0.000000e+00> : vector<16x64xf32>
    %3 = tpu.matmul %1, %2, %cst {dimension_numbers = #tpu.dot_dimension_numbers<[1], [0], [0], [1], [0, 0, 1, 1], [], []>} : vector<16x32xf32>, vector<32x64xf32>, vector<16x64xf32> -> vector<16x64xf32>
    %c0_4 = arith.constant 0 : index
    %c0_5 = arith.constant 0 : index
    %4 = vector.load %arg3[%c0_4, %c0_5] : memref<16x48xf32, #tpu.memory_space<vmem>>, vector<16x48xf32>
    %c0_6 = arith.constant 0 : index
    %c0_7 = arith.constant 0 : index
    %5 = vector.load %arg4[%c0_6, %c0_7] : memref<16x1xf32, #tpu.memory_space<vmem>>, vector<16x1xf32>
    %cst_8 = arith.constant 0.000000e+00 : f32
    %6 = vector.broadcast %cst_8 : f32 to vector<16x1xf32>
    %7 = vector.extract_strided_slice %3 {offsets = [0, 0], sizes = [16, 63], strides = [1, 1]} : vector<16x64xf32> to vector<16x63xf32>
    %8 = tpu.concatenate %6, %7 in 1 : vector<16x1xf32>, vector<16x63xf32> -> vector<16x64xf32>
    %9 = vector.extract_strided_slice %3 {offsets = [0, 1], sizes = [16, 63], strides = [1, 1]} : vector<16x64xf32> to vector<16x63xf32>
    %10 = tpu.concatenate %9, %6 in 1 : vector<16x63xf32>, vector<16x1xf32> -> vector<16x64xf32>
    %11 = tpu.concatenate %8, %3, %10 in 0 : vector<16x64xf32>, vector<16x64xf32>, vector<16x64xf32> -> vector<48x64xf32>
    %cst_9 = arith.constant dense<0.000000e+00> : vector<16x64xf32>
    %12 = tpu.matmul %4, %11, %cst_9 {dimension_numbers = #tpu.dot_dimension_numbers<[1], [0], [0], [1], [0, 0, 1, 1], [], []>} : vector<16x48xf32>, vector<48x64xf32>, vector<16x64xf32> -> vector<16x64xf32>
    %13 = vector.broadcast %5 : vector<16x1xf32> to vector<16x64xf32>
    %14 = arith.addf %12, %13 : vector<16x64xf32>
    %c0_10 = arith.constant 0 : index
    %c0_11 = arith.constant 0 : index
    %c0_12 = arith.constant 0 : index
    %15 = vector.load %arg5[%c0_10, %c0_11, %c0_12] : memref<1x16x64xf32, #tpu.memory_space<vmem>>, vector<1x16x64xf32>
    %16 = vector.shape_cast %15 : vector<1x16x64xf32> to vector<16x64xf32>
    %17 = vector.shape_cast %14 : vector<16x64xf32> to vector<1x16x64xf32>
    tpu.vector_store %arg5[%c0_10, %c0_11, %c0_12], %17 {strides = array<i32>} : memref<1x16x64xf32, #tpu.memory_space<vmem>>, vector<1x16x64xf32>,
    return
  }
  func.func @transform_0(%arg0: i32) -> (i32, i32, i32) {
    %c0_i32 = arith.constant 0 : i32
    %c0_i32_0 = arith.constant 0 : i32
    %c0_i32_1 = arith.constant 0 : i32
    return %arg0, %c0_i32, %c0_i32_0 : i32, i32, i32
  }
  func.func @transform_1(%arg0: i32) -> (i32, i32) {
    %c0_i32 = arith.constant 0 : i32
    %c0_i32_0 = arith.constant 0 : i32
    %c0_i32_1 = arith.constant 0 : i32
    return %c0_i32, %c0_i32_0 : i32, i32
  }
  func.func @transform_2(%arg0: i32) -> (i32, i32) {
    %c0_i32 = arith.constant 0 : i32
    %c0_i32_0 = arith.constant 0 : i32
    %c0_i32_1 = arith.constant 0 : i32
    return %c0_i32, %c0_i32_0 : i32, i32
  }
  func.func @transform_3(%arg0: i32) -> (i32, i32) {
    %c0_i32 = arith.constant 0 : i32
    %c0_i32_0 = arith.constant 0 : i32
    %c0_i32_1 = arith.constant 0 : i32
    return %c0_i32, %c0_i32_0 : i32, i32
  }
  func.func @transform_4(%arg0: i32) -> (i32, i32, i32) {
    %c0_i32 = arith.constant 0 : i32
    %c0_i32_0 = arith.constant 0 : i32
    %c0_i32_1 = arith.constant 0 : i32
    return %arg0, %c0_i32, %c0_i32_0 : i32, i32, i32
  }
}

module attributes {stable_mosaic.version = 11 : i64} {
  func.func @_resblock_kernel(%arg0: i32, %arg1: memref<1x16x32xf32, #tpu.memory_space<vmem>>, %arg2: memref<16x16xf32, #tpu.memory_space<vmem>>, %arg3: memref<16x1xf32, #tpu.memory_space<vmem>>, %arg4: memref<16x1xf32, #tpu.memory_space<vmem>>, %arg5: memref<16x48xf32, #tpu.memory_space<vmem>>, %arg6: memref<16x1xf32, #tpu.memory_space<vmem>>, %arg7: memref<16x16xf32, #tpu.memory_space<vmem>>, %arg8: memref<16x1xf32, #tpu.memory_space<vmem>>, %arg9: memref<16x1xf32, #tpu.memory_space<vmem>>, %arg10: memref<16x48xf32, #tpu.memory_space<vmem>>, %arg11: memref<16x1xf32, #tpu.memory_space<vmem>>, %arg12: memref<1x16x32xf32, #tpu.memory_space<vmem>>) attributes {dimension_semantics = [#tpu.dimension_semantics<parallel>], iteration_bounds = array<i64: 2>, scalar_prefetch = 0 : i64, scratch_operands = 0 : i64, tpu.core_type = #tpu.core_type<tc>, window_params = [{transform_indices = @transform_0, window_bounds = array<i64: 1, 16, 32>}, {pipeline_mode = #tpu.pipeline_mode<synchronous>, transform_indices = @transform_1, window_bounds = array<i64: 16, 16>}, {pipeline_mode = #tpu.pipeline_mode<synchronous>, transform_indices = @transform_2, window_bounds = array<i64: 16, 1>}, {pipeline_mode = #tpu.pipeline_mode<synchronous>, transform_indices = @transform_3, window_bounds = array<i64: 16, 1>}, {pipeline_mode = #tpu.pipeline_mode<synchronous>, transform_indices = @transform_4, window_bounds = array<i64: 16, 48>}, {pipeline_mode = #tpu.pipeline_mode<synchronous>, transform_indices = @transform_5, window_bounds = array<i64: 16, 1>}, {pipeline_mode = #tpu.pipeline_mode<synchronous>, transform_indices = @transform_6, window_bounds = array<i64: 16, 16>}, {pipeline_mode = #tpu.pipeline_mode<synchronous>, transform_indices = @transform_7, window_bounds = array<i64: 16, 1>}, {pipeline_mode = #tpu.pipeline_mode<synchronous>, transform_indices = @transform_8, window_bounds = array<i64: 16, 1>}, {pipeline_mode = #tpu.pipeline_mode<synchronous>, transform_indices = @transform_9, window_bounds = array<i64: 16, 48>}, {pipeline_mode = #tpu.pipeline_mode<synchronous>, transform_indices = @transform_10, window_bounds = array<i64: 16, 1>}, {transform_indices = @transform_11, window_bounds = array<i64: 1, 16, 32>}]} {
    %c0 = arith.constant 0 : index
    %c0_0 = arith.constant 0 : index
    %c0_1 = arith.constant 0 : index
    %0 = vector.load %arg1[%c0, %c0_0, %c0_1] : memref<1x16x32xf32, #tpu.memory_space<vmem>>, vector<1x16x32xf32>
    %1 = vector.shape_cast %0 : vector<1x16x32xf32> to vector<16x32xf32>
    %c0_2 = arith.constant 0 : index
    %c0_3 = arith.constant 0 : index
    %2 = vector.load %arg2[%c0_2, %c0_3] : memref<16x16xf32, #tpu.memory_space<vmem>>, vector<16x16xf32>
    %c0_4 = arith.constant 0 : index
    %c0_5 = arith.constant 0 : index
    %3 = vector.load %arg3[%c0_4, %c0_5] : memref<16x1xf32, #tpu.memory_space<vmem>>, vector<16x1xf32>
    %c0_6 = arith.constant 0 : index
    %c0_7 = arith.constant 0 : index
    %4 = vector.load %arg4[%c0_6, %c0_7] : memref<16x1xf32, #tpu.memory_space<vmem>>, vector<16x1xf32>
    %cst = arith.constant dense<0.000000e+00> : vector<16xf32>
    %5 = vector.multi_reduction <add>, %1, %cst [1] : vector<16x32xf32> to vector<16xf32>
    %6 = vector.shape_cast %5 : vector<16xf32> to vector<16x1xf32>
    %7 = arith.mulf %1, %1 : vector<16x32xf32>
    %cst_8 = arith.constant dense<0.000000e+00> : vector<16xf32>
    %8 = vector.multi_reduction <add>, %7, %cst_8 [1] : vector<16x32xf32> to vector<16xf32>
    %9 = vector.shape_cast %8 : vector<16xf32> to vector<16x1xf32>
    %cst_9 = arith.constant dense<0.000000e+00> : vector<16x1xf32>
    %10 = tpu.matmul %2, %6, %cst_9 {dimension_numbers = #tpu.dot_dimension_numbers<[1], [0], [0], [1], [0, 0, 1, 1], [], []>} : vector<16x16xf32>, vector<16x1xf32>, vector<16x1xf32> -> vector<16x1xf32>
    %cst_10 = arith.constant dense<0.000000e+00> : vector<16x1xf32>
    %11 = tpu.matmul %2, %9, %cst_10 {dimension_numbers = #tpu.dot_dimension_numbers<[1], [0], [0], [1], [0, 0, 1, 1], [], []>} : vector<16x16xf32>, vector<16x1xf32>, vector<16x1xf32> -> vector<16x1xf32>
    %cst_11 = arith.constant 7.812500e-03 : f32
    %12 = vector.broadcast %cst_11 : f32 to vector<16x1xf32>
    %13 = arith.mulf %10, %12 : vector<16x1xf32>
    %cst_12 = arith.constant 7.812500e-03 : f32
    %14 = vector.broadcast %cst_12 : f32 to vector<16x1xf32>
    %15 = arith.mulf %11, %14 : vector<16x1xf32>
    %16 = arith.mulf %13, %13 : vector<16x1xf32>
    %17 = arith.subf %15, %16 : vector<16x1xf32>
    %cst_13 = arith.constant 9.99999997E-7 : f32
    %18 = vector.broadcast %cst_13 : f32 to vector<16x1xf32>
    %19 = arith.addf %17, %18 : vector<16x1xf32>
    %20 = math.rsqrt %19 : vector<16x1xf32>
    %21 = vector.broadcast %13 : vector<16x1xf32> to vector<16x32xf32>
    %22 = arith.subf %1, %21 : vector<16x32xf32>
    %23 = vector.broadcast %20 : vector<16x1xf32> to vector<16x32xf32>
    %24 = arith.mulf %22, %23 : vector<16x32xf32>
    %25 = vector.broadcast %3 : vector<16x1xf32> to vector<16x32xf32>
    %26 = arith.mulf %24, %25 : vector<16x32xf32>
    %27 = vector.broadcast %4 : vector<16x1xf32> to vector<16x32xf32>
    %28 = arith.addf %26, %27 : vector<16x32xf32>
    %29 = arith.negf %28 : vector<16x32xf32>
    %30 = math.exp %29 : vector<16x32xf32>
    %cst_14 = arith.constant 1.000000e+00 : f32
    %31 = vector.broadcast %cst_14 : f32 to vector<16x32xf32>
    %32 = arith.addf %31, %30 : vector<16x32xf32>
    %33 = arith.divf %31, %32 : vector<16x32xf32>
    %34 = arith.mulf %28, %33 : vector<16x32xf32>
    %c0_15 = arith.constant 0 : index
    %c0_16 = arith.constant 0 : index
    %35 = vector.load %arg5[%c0_15, %c0_16] : memref<16x48xf32, #tpu.memory_space<vmem>>, vector<16x48xf32>
    %c0_17 = arith.constant 0 : index
    %c0_18 = arith.constant 0 : index
    %36 = vector.load %arg6[%c0_17, %c0_18] : memref<16x1xf32, #tpu.memory_space<vmem>>, vector<16x1xf32>
    %cst_19 = arith.constant 0.000000e+00 : f32
    %37 = vector.broadcast %cst_19 : f32 to vector<16x1xf32>
    %38 = vector.extract_strided_slice %34 {offsets = [0, 0], sizes = [16, 31], strides = [1, 1]} : vector<16x32xf32> to vector<16x31xf32>
    %39 = tpu.concatenate %37, %38 in 1 : vector<16x1xf32>, vector<16x31xf32> -> vector<16x32xf32>
    %40 = vector.extract_strided_slice %34 {offsets = [0, 1], sizes = [16, 31], strides = [1, 1]} : vector<16x32xf32> to vector<16x31xf32>
    %41 = tpu.concatenate %40, %37 in 1 : vector<16x31xf32>, vector<16x1xf32> -> vector<16x32xf32>
    %42 = tpu.concatenate %39, %34, %41 in 0 : vector<16x32xf32>, vector<16x32xf32>, vector<16x32xf32> -> vector<48x32xf32>
    %cst_20 = arith.constant dense<0.000000e+00> : vector<16x32xf32>
    %43 = tpu.matmul %35, %42, %cst_20 {dimension_numbers = #tpu.dot_dimension_numbers<[1], [0], [0], [1], [0, 0, 1, 1], [], []>} : vector<16x48xf32>, vector<48x32xf32>, vector<16x32xf32> -> vector<16x32xf32>
    %44 = vector.broadcast %36 : vector<16x1xf32> to vector<16x32xf32>
    %45 = arith.addf %43, %44 : vector<16x32xf32>
    %c0_21 = arith.constant 0 : index
    %c0_22 = arith.constant 0 : index
    %46 = vector.load %arg7[%c0_21, %c0_22] : memref<16x16xf32, #tpu.memory_space<vmem>>, vector<16x16xf32>
    %c0_23 = arith.constant 0 : index
    %c0_24 = arith.constant 0 : index
    %47 = vector.load %arg8[%c0_23, %c0_24] : memref<16x1xf32, #tpu.memory_space<vmem>>, vector<16x1xf32>
    %c0_25 = arith.constant 0 : index
    %c0_26 = arith.constant 0 : index
    %48 = vector.load %arg9[%c0_25, %c0_26] : memref<16x1xf32, #tpu.memory_space<vmem>>, vector<16x1xf32>
    %cst_27 = arith.constant dense<0.000000e+00> : vector<16xf32>
    %49 = vector.multi_reduction <add>, %45, %cst_27 [1] : vector<16x32xf32> to vector<16xf32>
    %50 = vector.shape_cast %49 : vector<16xf32> to vector<16x1xf32>
    %51 = arith.mulf %45, %45 : vector<16x32xf32>
    %cst_28 = arith.constant dense<0.000000e+00> : vector<16xf32>
    %52 = vector.multi_reduction <add>, %51, %cst_28 [1] : vector<16x32xf32> to vector<16xf32>
    %53 = vector.shape_cast %52 : vector<16xf32> to vector<16x1xf32>
    %cst_29 = arith.constant dense<0.000000e+00> : vector<16x1xf32>
    %54 = tpu.matmul %46, %50, %cst_29 {dimension_numbers = #tpu.dot_dimension_numbers<[1], [0], [0], [1], [0, 0, 1, 1], [], []>} : vector<16x16xf32>, vector<16x1xf32>, vector<16x1xf32> -> vector<16x1xf32>
    %cst_30 = arith.constant dense<0.000000e+00> : vector<16x1xf32>
    %55 = tpu.matmul %46, %53, %cst_30 {dimension_numbers = #tpu.dot_dimension_numbers<[1], [0], [0], [1], [0, 0, 1, 1], [], []>} : vector<16x16xf32>, vector<16x1xf32>, vector<16x1xf32> -> vector<16x1xf32>
    %cst_31 = arith.constant 7.812500e-03 : f32
    %56 = vector.broadcast %cst_31 : f32 to vector<16x1xf32>
    %57 = arith.mulf %54, %56 : vector<16x1xf32>
    %cst_32 = arith.constant 7.812500e-03 : f32
    %58 = vector.broadcast %cst_32 : f32 to vector<16x1xf32>
    %59 = arith.mulf %55, %58 : vector<16x1xf32>
    %60 = arith.mulf %57, %57 : vector<16x1xf32>
    %61 = arith.subf %59, %60 : vector<16x1xf32>
    %cst_33 = arith.constant 9.99999997E-7 : f32
    %62 = vector.broadcast %cst_33 : f32 to vector<16x1xf32>
    %63 = arith.addf %61, %62 : vector<16x1xf32>
    %64 = math.rsqrt %63 : vector<16x1xf32>
    %65 = vector.broadcast %57 : vector<16x1xf32> to vector<16x32xf32>
    %66 = arith.subf %45, %65 : vector<16x32xf32>
    %67 = vector.broadcast %64 : vector<16x1xf32> to vector<16x32xf32>
    %68 = arith.mulf %66, %67 : vector<16x32xf32>
    %69 = vector.broadcast %47 : vector<16x1xf32> to vector<16x32xf32>
    %70 = arith.mulf %68, %69 : vector<16x32xf32>
    %71 = vector.broadcast %48 : vector<16x1xf32> to vector<16x32xf32>
    %72 = arith.addf %70, %71 : vector<16x32xf32>
    %73 = arith.negf %72 : vector<16x32xf32>
    %74 = math.exp %73 : vector<16x32xf32>
    %cst_34 = arith.constant 1.000000e+00 : f32
    %75 = vector.broadcast %cst_34 : f32 to vector<16x32xf32>
    %76 = arith.addf %75, %74 : vector<16x32xf32>
    %77 = arith.divf %75, %76 : vector<16x32xf32>
    %78 = arith.mulf %72, %77 : vector<16x32xf32>
    %c0_35 = arith.constant 0 : index
    %c0_36 = arith.constant 0 : index
    %79 = vector.load %arg10[%c0_35, %c0_36] : memref<16x48xf32, #tpu.memory_space<vmem>>, vector<16x48xf32>
    %c0_37 = arith.constant 0 : index
    %c0_38 = arith.constant 0 : index
    %80 = vector.load %arg11[%c0_37, %c0_38] : memref<16x1xf32, #tpu.memory_space<vmem>>, vector<16x1xf32>
    %cst_39 = arith.constant 0.000000e+00 : f32
    %81 = vector.broadcast %cst_39 : f32 to vector<16x1xf32>
    %82 = vector.extract_strided_slice %78 {offsets = [0, 0], sizes = [16, 31], strides = [1, 1]} : vector<16x32xf32> to vector<16x31xf32>
    %83 = tpu.concatenate %81, %82 in 1 : vector<16x1xf32>, vector<16x31xf32> -> vector<16x32xf32>
    %84 = vector.extract_strided_slice %78 {offsets = [0, 1], sizes = [16, 31], strides = [1, 1]} : vector<16x32xf32> to vector<16x31xf32>
    %85 = tpu.concatenate %84, %81 in 1 : vector<16x31xf32>, vector<16x1xf32> -> vector<16x32xf32>
    %86 = tpu.concatenate %83, %78, %85 in 0 : vector<16x32xf32>, vector<16x32xf32>, vector<16x32xf32> -> vector<48x32xf32>
    %cst_40 = arith.constant dense<0.000000e+00> : vector<16x32xf32>
    %87 = tpu.matmul %79, %86, %cst_40 {dimension_numbers = #tpu.dot_dimension_numbers<[1], [0], [0], [1], [0, 0, 1, 1], [], []>} : vector<16x48xf32>, vector<48x32xf32>, vector<16x32xf32> -> vector<16x32xf32>
    %88 = vector.broadcast %80 : vector<16x1xf32> to vector<16x32xf32>
    %89 = arith.addf %87, %88 : vector<16x32xf32>
    %90 = arith.addf %1, %89 : vector<16x32xf32>
    %c0_41 = arith.constant 0 : index
    %c0_42 = arith.constant 0 : index
    %c0_43 = arith.constant 0 : index
    %91 = vector.load %arg12[%c0_41, %c0_42, %c0_43] : memref<1x16x32xf32, #tpu.memory_space<vmem>>, vector<1x16x32xf32>
    %92 = vector.shape_cast %91 : vector<1x16x32xf32> to vector<16x32xf32>
    %93 = vector.shape_cast %90 : vector<16x32xf32> to vector<1x16x32xf32>
    tpu.vector_store %arg12[%c0_41, %c0_42, %c0_43], %93 {strides = array<i32>} : memref<1x16x32xf32, #tpu.memory_space<vmem>>, vector<1x16x32xf32>,
    return
  }
  func.func @transform_0(%arg0: i32) -> (i32, i32, i32) {
    %c0_i32 = arith.constant 0 : i32
    %c0_i32_0 = arith.constant 0 : i32
    %c0_i32_1 = arith.constant 0 : i32
    return %arg0, %c0_i32, %c0_i32_0 : i32, i32, i32
  }
  func.func @transform_1(%arg0: i32) -> (i32, i32) {
    %c0_i32 = arith.constant 0 : i32
    %c0_i32_0 = arith.constant 0 : i32
    %c0_i32_1 = arith.constant 0 : i32
    return %c0_i32, %c0_i32_0 : i32, i32
  }
  func.func @transform_2(%arg0: i32) -> (i32, i32) {
    %c0_i32 = arith.constant 0 : i32
    %c0_i32_0 = arith.constant 0 : i32
    %c0_i32_1 = arith.constant 0 : i32
    return %c0_i32, %c0_i32_0 : i32, i32
  }
  func.func @transform_3(%arg0: i32) -> (i32, i32) {
    %c0_i32 = arith.constant 0 : i32
    %c0_i32_0 = arith.constant 0 : i32
    %c0_i32_1 = arith.constant 0 : i32
    return %c0_i32, %c0_i32_0 : i32, i32
  }
  func.func @transform_4(%arg0: i32) -> (i32, i32) {
    %c0_i32 = arith.constant 0 : i32
    %c0_i32_0 = arith.constant 0 : i32
    %c0_i32_1 = arith.constant 0 : i32
    return %c0_i32, %c0_i32_0 : i32, i32
  }
  func.func @transform_5(%arg0: i32) -> (i32, i32) {
    %c0_i32 = arith.constant 0 : i32
    %c0_i32_0 = arith.constant 0 : i32
    %c0_i32_1 = arith.constant 0 : i32
    return %c0_i32, %c0_i32_0 : i32, i32
  }
  func.func @transform_6(%arg0: i32) -> (i32, i32) {
    %c0_i32 = arith.constant 0 : i32
    %c0_i32_0 = arith.constant 0 : i32
    %c0_i32_1 = arith.constant 0 : i32
    return %c0_i32, %c0_i32_0 : i32, i32
  }
  func.func @transform_7(%arg0: i32) -> (i32, i32) {
    %c0_i32 = arith.constant 0 : i32
    %c0_i32_0 = arith.constant 0 : i32
    %c0_i32_1 = arith.constant 0 : i32
    return %c0_i32, %c0_i32_0 : i32, i32
  }
  func.func @transform_8(%arg0: i32) -> (i32, i32) {
    %c0_i32 = arith.constant 0 : i32
    %c0_i32_0 = arith.constant 0 : i32
    %c0_i32_1 = arith.constant 0 : i32
    return %c0_i32, %c0_i32_0 : i32, i32
  }
  func.func @transform_9(%arg0: i32) -> (i32, i32) {
    %c0_i32 = arith.constant 0 : i32
    %c0_i32_0 = arith.constant 0 : i32
    %c0_i32_1 = arith.constant 0 : i32
    return %c0_i32, %c0_i32_0 : i32, i32
  }
  func.func @transform_10(%arg0: i32) -> (i32, i32) {
    %c0_i32 = arith.constant 0 : i32
    %c0_i32_0 = arith.constant 0 : i32
    %c0_i32_1 = arith.constant 0 : i32
    return %c0_i32, %c0_i32_0 : i32, i32
  }
  func.func @transform_11(%arg0: i32) -> (i32, i32, i32) {
    %c0_i32 = arith.constant 0 : i32
    %c0_i32_0 = arith.constant 0 : i32
    %c0_i32_1 = arith.constant 0 : i32
    return %arg0, %c0_i32, %c0_i32_0 : i32, i32, i32
  }
}

module attributes {stable_mosaic.version = 11 : i64} {
  func.func @_resblock_nin_kernel(%arg0: i32, %arg1: memref<1x16x64xf32, #tpu.memory_space<vmem>>, %arg2: memref<16x16xf32, #tpu.memory_space<vmem>>, %arg3: memref<16x1xf32, #tpu.memory_space<vmem>>, %arg4: memref<16x1xf32, #tpu.memory_space<vmem>>, %arg5: memref<8x48xf32, #tpu.memory_space<vmem>>, %arg6: memref<8x1xf32, #tpu.memory_space<vmem>>, %arg7: memref<8x8xf32, #tpu.memory_space<vmem>>, %arg8: memref<8x1xf32, #tpu.memory_space<vmem>>, %arg9: memref<8x1xf32, #tpu.memory_space<vmem>>, %arg10: memref<8x24xf32, #tpu.memory_space<vmem>>, %arg11: memref<8x1xf32, #tpu.memory_space<vmem>>, %arg12: memref<8x16xf32, #tpu.memory_space<vmem>>, %arg13: memref<8x1xf32, #tpu.memory_space<vmem>>, %arg14: memref<1x8x64xf32, #tpu.memory_space<vmem>>) attributes {dimension_semantics = [#tpu.dimension_semantics<parallel>], iteration_bounds = array<i64: 2>, scalar_prefetch = 0 : i64, scratch_operands = 0 : i64, tpu.core_type = #tpu.core_type<tc>, window_params = [{transform_indices = @transform_0, window_bounds = array<i64: 1, 16, 64>}, {pipeline_mode = #tpu.pipeline_mode<synchronous>, transform_indices = @transform_1, window_bounds = array<i64: 16, 16>}, {pipeline_mode = #tpu.pipeline_mode<synchronous>, transform_indices = @transform_2, window_bounds = array<i64: 16, 1>}, {pipeline_mode = #tpu.pipeline_mode<synchronous>, transform_indices = @transform_3, window_bounds = array<i64: 16, 1>}, {pipeline_mode = #tpu.pipeline_mode<synchronous>, transform_indices = @transform_4, window_bounds = array<i64: 8, 48>}, {pipeline_mode = #tpu.pipeline_mode<synchronous>, transform_indices = @transform_5, window_bounds = array<i64: 8, 1>}, {pipeline_mode = #tpu.pipeline_mode<synchronous>, transform_indices = @transform_6, window_bounds = array<i64: 8, 8>}, {pipeline_mode = #tpu.pipeline_mode<synchronous>, transform_indices = @transform_7, window_bounds = array<i64: 8, 1>}, {pipeline_mode = #tpu.pipeline_mode<synchronous>, transform_indices = @transform_8, window_bounds = array<i64: 8, 1>}, {pipeline_mode = #tpu.pipeline_mode<synchronous>, transform_indices = @transform_9, window_bounds = array<i64: 8, 24>}, {pipeline_mode = #tpu.pipeline_mode<synchronous>, transform_indices = @transform_10, window_bounds = array<i64: 8, 1>}, {pipeline_mode = #tpu.pipeline_mode<synchronous>, transform_indices = @transform_11, window_bounds = array<i64: 8, 16>}, {pipeline_mode = #tpu.pipeline_mode<synchronous>, transform_indices = @transform_12, window_bounds = array<i64: 8, 1>}, {transform_indices = @transform_13, window_bounds = array<i64: 1, 8, 64>}]} {
    %c0 = arith.constant 0 : index
    %c0_0 = arith.constant 0 : index
    %c0_1 = arith.constant 0 : index
    %0 = vector.load %arg1[%c0, %c0_0, %c0_1] : memref<1x16x64xf32, #tpu.memory_space<vmem>>, vector<1x16x64xf32>
    %1 = vector.shape_cast %0 : vector<1x16x64xf32> to vector<16x64xf32>
    %c0_2 = arith.constant 0 : index
    %c0_3 = arith.constant 0 : index
    %2 = vector.load %arg2[%c0_2, %c0_3] : memref<16x16xf32, #tpu.memory_space<vmem>>, vector<16x16xf32>
    %c0_4 = arith.constant 0 : index
    %c0_5 = arith.constant 0 : index
    %3 = vector.load %arg3[%c0_4, %c0_5] : memref<16x1xf32, #tpu.memory_space<vmem>>, vector<16x1xf32>
    %c0_6 = arith.constant 0 : index
    %c0_7 = arith.constant 0 : index
    %4 = vector.load %arg4[%c0_6, %c0_7] : memref<16x1xf32, #tpu.memory_space<vmem>>, vector<16x1xf32>
    %cst = arith.constant dense<0.000000e+00> : vector<16xf32>
    %5 = vector.multi_reduction <add>, %1, %cst [1] : vector<16x64xf32> to vector<16xf32>
    %6 = vector.shape_cast %5 : vector<16xf32> to vector<16x1xf32>
    %7 = arith.mulf %1, %1 : vector<16x64xf32>
    %cst_8 = arith.constant dense<0.000000e+00> : vector<16xf32>
    %8 = vector.multi_reduction <add>, %7, %cst_8 [1] : vector<16x64xf32> to vector<16xf32>
    %9 = vector.shape_cast %8 : vector<16xf32> to vector<16x1xf32>
    %cst_9 = arith.constant dense<0.000000e+00> : vector<16x1xf32>
    %10 = tpu.matmul %2, %6, %cst_9 {dimension_numbers = #tpu.dot_dimension_numbers<[1], [0], [0], [1], [0, 0, 1, 1], [], []>} : vector<16x16xf32>, vector<16x1xf32>, vector<16x1xf32> -> vector<16x1xf32>
    %cst_10 = arith.constant dense<0.000000e+00> : vector<16x1xf32>
    %11 = tpu.matmul %2, %9, %cst_10 {dimension_numbers = #tpu.dot_dimension_numbers<[1], [0], [0], [1], [0, 0, 1, 1], [], []>} : vector<16x16xf32>, vector<16x1xf32>, vector<16x1xf32> -> vector<16x1xf32>
    %cst_11 = arith.constant 3.906250e-03 : f32
    %12 = vector.broadcast %cst_11 : f32 to vector<16x1xf32>
    %13 = arith.mulf %10, %12 : vector<16x1xf32>
    %cst_12 = arith.constant 3.906250e-03 : f32
    %14 = vector.broadcast %cst_12 : f32 to vector<16x1xf32>
    %15 = arith.mulf %11, %14 : vector<16x1xf32>
    %16 = arith.mulf %13, %13 : vector<16x1xf32>
    %17 = arith.subf %15, %16 : vector<16x1xf32>
    %cst_13 = arith.constant 9.99999997E-7 : f32
    %18 = vector.broadcast %cst_13 : f32 to vector<16x1xf32>
    %19 = arith.addf %17, %18 : vector<16x1xf32>
    %20 = math.rsqrt %19 : vector<16x1xf32>
    %21 = vector.broadcast %13 : vector<16x1xf32> to vector<16x64xf32>
    %22 = arith.subf %1, %21 : vector<16x64xf32>
    %23 = vector.broadcast %20 : vector<16x1xf32> to vector<16x64xf32>
    %24 = arith.mulf %22, %23 : vector<16x64xf32>
    %25 = vector.broadcast %3 : vector<16x1xf32> to vector<16x64xf32>
    %26 = arith.mulf %24, %25 : vector<16x64xf32>
    %27 = vector.broadcast %4 : vector<16x1xf32> to vector<16x64xf32>
    %28 = arith.addf %26, %27 : vector<16x64xf32>
    %29 = arith.negf %28 : vector<16x64xf32>
    %30 = math.exp %29 : vector<16x64xf32>
    %cst_14 = arith.constant 1.000000e+00 : f32
    %31 = vector.broadcast %cst_14 : f32 to vector<16x64xf32>
    %32 = arith.addf %31, %30 : vector<16x64xf32>
    %33 = arith.divf %31, %32 : vector<16x64xf32>
    %34 = arith.mulf %28, %33 : vector<16x64xf32>
    %c0_15 = arith.constant 0 : index
    %c0_16 = arith.constant 0 : index
    %35 = vector.load %arg5[%c0_15, %c0_16] : memref<8x48xf32, #tpu.memory_space<vmem>>, vector<8x48xf32>
    %c0_17 = arith.constant 0 : index
    %c0_18 = arith.constant 0 : index
    %36 = vector.load %arg6[%c0_17, %c0_18] : memref<8x1xf32, #tpu.memory_space<vmem>>, vector<8x1xf32>
    %cst_19 = arith.constant 0.000000e+00 : f32
    %37 = vector.broadcast %cst_19 : f32 to vector<16x1xf32>
    %38 = vector.extract_strided_slice %34 {offsets = [0, 0], sizes = [16, 63], strides = [1, 1]} : vector<16x64xf32> to vector<16x63xf32>
    %39 = tpu.concatenate %37, %38 in 1 : vector<16x1xf32>, vector<16x63xf32> -> vector<16x64xf32>
    %40 = vector.extract_strided_slice %34 {offsets = [0, 1], sizes = [16, 63], strides = [1, 1]} : vector<16x64xf32> to vector<16x63xf32>
    %41 = tpu.concatenate %40, %37 in 1 : vector<16x63xf32>, vector<16x1xf32> -> vector<16x64xf32>
    %42 = tpu.concatenate %39, %34, %41 in 0 : vector<16x64xf32>, vector<16x64xf32>, vector<16x64xf32> -> vector<48x64xf32>
    %cst_20 = arith.constant dense<0.000000e+00> : vector<8x64xf32>
    %43 = tpu.matmul %35, %42, %cst_20 {dimension_numbers = #tpu.dot_dimension_numbers<[1], [0], [0], [1], [0, 0, 1, 1], [], []>} : vector<8x48xf32>, vector<48x64xf32>, vector<8x64xf32> -> vector<8x64xf32>
    %44 = vector.broadcast %36 : vector<8x1xf32> to vector<8x64xf32>
    %45 = arith.addf %43, %44 : vector<8x64xf32>
    %c0_21 = arith.constant 0 : index
    %c0_22 = arith.constant 0 : index
    %46 = vector.load %arg7[%c0_21, %c0_22] : memref<8x8xf32, #tpu.memory_space<vmem>>, vector<8x8xf32>
    %c0_23 = arith.constant 0 : index
    %c0_24 = arith.constant 0 : index
    %47 = vector.load %arg8[%c0_23, %c0_24] : memref<8x1xf32, #tpu.memory_space<vmem>>, vector<8x1xf32>
    %c0_25 = arith.constant 0 : index
    %c0_26 = arith.constant 0 : index
    %48 = vector.load %arg9[%c0_25, %c0_26] : memref<8x1xf32, #tpu.memory_space<vmem>>, vector<8x1xf32>
    %cst_27 = arith.constant dense<0.000000e+00> : vector<8xf32>
    %49 = vector.multi_reduction <add>, %45, %cst_27 [1] : vector<8x64xf32> to vector<8xf32>
    %50 = vector.shape_cast %49 : vector<8xf32> to vector<8x1xf32>
    %51 = arith.mulf %45, %45 : vector<8x64xf32>
    %cst_28 = arith.constant dense<0.000000e+00> : vector<8xf32>
    %52 = vector.multi_reduction <add>, %51, %cst_28 [1] : vector<8x64xf32> to vector<8xf32>
    %53 = vector.shape_cast %52 : vector<8xf32> to vector<8x1xf32>
    %cst_29 = arith.constant dense<0.000000e+00> : vector<8x1xf32>
    %54 = tpu.matmul %46, %50, %cst_29 {dimension_numbers = #tpu.dot_dimension_numbers<[1], [0], [0], [1], [0, 0, 1, 1], [], []>} : vector<8x8xf32>, vector<8x1xf32>, vector<8x1xf32> -> vector<8x1xf32>
    %cst_30 = arith.constant dense<0.000000e+00> : vector<8x1xf32>
    %55 = tpu.matmul %46, %53, %cst_30 {dimension_numbers = #tpu.dot_dimension_numbers<[1], [0], [0], [1], [0, 0, 1, 1], [], []>} : vector<8x8xf32>, vector<8x1xf32>, vector<8x1xf32> -> vector<8x1xf32>
    %cst_31 = arith.constant 7.812500e-03 : f32
    %56 = vector.broadcast %cst_31 : f32 to vector<8x1xf32>
    %57 = arith.mulf %54, %56 : vector<8x1xf32>
    %cst_32 = arith.constant 7.812500e-03 : f32
    %58 = vector.broadcast %cst_32 : f32 to vector<8x1xf32>
    %59 = arith.mulf %55, %58 : vector<8x1xf32>
    %60 = arith.mulf %57, %57 : vector<8x1xf32>
    %61 = arith.subf %59, %60 : vector<8x1xf32>
    %cst_33 = arith.constant 9.99999997E-7 : f32
    %62 = vector.broadcast %cst_33 : f32 to vector<8x1xf32>
    %63 = arith.addf %61, %62 : vector<8x1xf32>
    %64 = math.rsqrt %63 : vector<8x1xf32>
    %65 = vector.broadcast %57 : vector<8x1xf32> to vector<8x64xf32>
    %66 = arith.subf %45, %65 : vector<8x64xf32>
    %67 = vector.broadcast %64 : vector<8x1xf32> to vector<8x64xf32>
    %68 = arith.mulf %66, %67 : vector<8x64xf32>
    %69 = vector.broadcast %47 : vector<8x1xf32> to vector<8x64xf32>
    %70 = arith.mulf %68, %69 : vector<8x64xf32>
    %71 = vector.broadcast %48 : vector<8x1xf32> to vector<8x64xf32>
    %72 = arith.addf %70, %71 : vector<8x64xf32>
    %73 = arith.negf %72 : vector<8x64xf32>
    %74 = math.exp %73 : vector<8x64xf32>
    %cst_34 = arith.constant 1.000000e+00 : f32
    %75 = vector.broadcast %cst_34 : f32 to vector<8x64xf32>
    %76 = arith.addf %75, %74 : vector<8x64xf32>
    %77 = arith.divf %75, %76 : vector<8x64xf32>
    %78 = arith.mulf %72, %77 : vector<8x64xf32>
    %c0_35 = arith.constant 0 : index
    %c0_36 = arith.constant 0 : index
    %79 = vector.load %arg10[%c0_35, %c0_36] : memref<8x24xf32, #tpu.memory_space<vmem>>, vector<8x24xf32>
    %c0_37 = arith.constant 0 : index
    %c0_38 = arith.constant 0 : index
    %80 = vector.load %arg11[%c0_37, %c0_38] : memref<8x1xf32, #tpu.memory_space<vmem>>, vector<8x1xf32>
    %cst_39 = arith.constant 0.000000e+00 : f32
    %81 = vector.broadcast %cst_39 : f32 to vector<8x1xf32>
    %82 = vector.extract_strided_slice %78 {offsets = [0, 0], sizes = [8, 63], strides = [1, 1]} : vector<8x64xf32> to vector<8x63xf32>
    %83 = tpu.concatenate %81, %82 in 1 : vector<8x1xf32>, vector<8x63xf32> -> vector<8x64xf32>
    %84 = vector.extract_strided_slice %78 {offsets = [0, 1], sizes = [8, 63], strides = [1, 1]} : vector<8x64xf32> to vector<8x63xf32>
    %85 = tpu.concatenate %84, %81 in 1 : vector<8x63xf32>, vector<8x1xf32> -> vector<8x64xf32>
    %86 = tpu.concatenate %83, %78, %85 in 0 : vector<8x64xf32>, vector<8x64xf32>, vector<8x64xf32> -> vector<24x64xf32>
    %cst_40 = arith.constant dense<0.000000e+00> : vector<8x64xf32>
    %87 = tpu.matmul %79, %86, %cst_40 {dimension_numbers = #tpu.dot_dimension_numbers<[1], [0], [0], [1], [0, 0, 1, 1], [], []>} : vector<8x24xf32>, vector<24x64xf32>, vector<8x64xf32> -> vector<8x64xf32>
    %88 = vector.broadcast %80 : vector<8x1xf32> to vector<8x64xf32>
    %89 = arith.addf %87, %88 : vector<8x64xf32>
    %c0_41 = arith.constant 0 : index
    %c0_42 = arith.constant 0 : index
    %90 = vector.load %arg12[%c0_41, %c0_42] : memref<8x16xf32, #tpu.memory_space<vmem>>, vector<8x16xf32>
    %cst_43 = arith.constant dense<0.000000e+00> : vector<8x64xf32>
    %91 = tpu.matmul %90, %1, %cst_43 {dimension_numbers = #tpu.dot_dimension_numbers<[1], [0], [0], [1], [0, 0, 1, 1], [], []>} : vector<8x16xf32>, vector<16x64xf32>, vector<8x64xf32> -> vector<8x64xf32>
    %c0_44 = arith.constant 0 : index
    %c0_45 = arith.constant 0 : index
    %92 = vector.load %arg13[%c0_44, %c0_45] : memref<8x1xf32, #tpu.memory_space<vmem>>, vector<8x1xf32>
    %93 = vector.broadcast %92 : vector<8x1xf32> to vector<8x64xf32>
    %94 = arith.addf %91, %93 : vector<8x64xf32>
    %95 = arith.addf %94, %89 : vector<8x64xf32>
    %c0_46 = arith.constant 0 : index
    %c0_47 = arith.constant 0 : index
    %c0_48 = arith.constant 0 : index
    %96 = vector.load %arg14[%c0_46, %c0_47, %c0_48] : memref<1x8x64xf32, #tpu.memory_space<vmem>>, vector<1x8x64xf32>
    %97 = vector.shape_cast %96 : vector<1x8x64xf32> to vector<8x64xf32>
    %98 = vector.shape_cast %95 : vector<8x64xf32> to vector<1x8x64xf32>
    tpu.vector_store %arg14[%c0_46, %c0_47, %c0_48], %98 {strides = array<i32>} : memref<1x8x64xf32, #tpu.memory_space<vmem>>, vector<1x8x64xf32>,
    return
  }
  func.func @transform_0(%arg0: i32) -> (i32, i32, i32) {
    %c0_i32 = arith.constant 0 : i32
    %c0_i32_0 = arith.constant 0 : i32
    %c0_i32_1 = arith.constant 0 : i32
    return %arg0, %c0_i32, %c0_i32_0 : i32, i32, i32
  }
  func.func @transform_1(%arg0: i32) -> (i32, i32) {
    %c0_i32 = arith.constant 0 : i32
    %c0_i32_0 = arith.constant 0 : i32
    %c0_i32_1 = arith.constant 0 : i32
    return %c0_i32, %c0_i32_0 : i32, i32
  }
  func.func @transform_2(%arg0: i32) -> (i32, i32) {
    %c0_i32 = arith.constant 0 : i32
    %c0_i32_0 = arith.constant 0 : i32
    %c0_i32_1 = arith.constant 0 : i32
    return %c0_i32, %c0_i32_0 : i32, i32
  }
  func.func @transform_3(%arg0: i32) -> (i32, i32) {
    %c0_i32 = arith.constant 0 : i32
    %c0_i32_0 = arith.constant 0 : i32
    %c0_i32_1 = arith.constant 0 : i32
    return %c0_i32, %c0_i32_0 : i32, i32
  }
  func.func @transform_4(%arg0: i32) -> (i32, i32) {
    %c0_i32 = arith.constant 0 : i32
    %c0_i32_0 = arith.constant 0 : i32
    %c0_i32_1 = arith.constant 0 : i32
    return %c0_i32, %c0_i32_0 : i32, i32
  }
  func.func @transform_5(%arg0: i32) -> (i32, i32) {
    %c0_i32 = arith.constant 0 : i32
    %c0_i32_0 = arith.constant 0 : i32
    %c0_i32_1 = arith.constant 0 : i32
    return %c0_i32, %c0_i32_0 : i32, i32
  }
  func.func @transform_6(%arg0: i32) -> (i32, i32) {
    %c0_i32 = arith.constant 0 : i32
    %c0_i32_0 = arith.constant 0 : i32
    %c0_i32_1 = arith.constant 0 : i32
    return %c0_i32, %c0_i32_0 : i32, i32
  }
  func.func @transform_7(%arg0: i32) -> (i32, i32) {
    %c0_i32 = arith.constant 0 : i32
    %c0_i32_0 = arith.constant 0 : i32
    %c0_i32_1 = arith.constant 0 : i32
    return %c0_i32, %c0_i32_0 : i32, i32
  }
  func.func @transform_8(%arg0: i32) -> (i32, i32) {
    %c0_i32 = arith.constant 0 : i32
    %c0_i32_0 = arith.constant 0 : i32
    %c0_i32_1 = arith.constant 0 : i32
    return %c0_i32, %c0_i32_0 : i32, i32
  }
  func.func @transform_9(%arg0: i32) -> (i32, i32) {
    %c0_i32 = arith.constant 0 : i32
    %c0_i32_0 = arith.constant 0 : i32
    %c0_i32_1 = arith.constant 0 : i32
    return %c0_i32, %c0_i32_0 : i32, i32
  }
  func.func @transform_10(%arg0: i32) -> (i32, i32) {
    %c0_i32 = arith.constant 0 : i32
    %c0_i32_0 = arith.constant 0 : i32
    %c0_i32_1 = arith.constant 0 : i32
    return %c0_i32, %c0_i32_0 : i32, i32
  }
  func.func @transform_11(%arg0: i32) -> (i32, i32) {
    %c0_i32 = arith.constant 0 : i32
    %c0_i32_0 = arith.constant 0 : i32
    %c0_i32_1 = arith.constant 0 : i32
    return %c0_i32, %c0_i32_0 : i32, i32
  }
  func.func @transform_12(%arg0: i32) -> (i32, i32) {
    %c0_i32 = arith.constant 0 : i32
    %c0_i32_0 = arith.constant 0 : i32
    %c0_i32_1 = arith.constant 0 : i32
    return %c0_i32, %c0_i32_0 : i32, i32
  }
  func.func @transform_13(%arg0: i32) -> (i32, i32, i32) {
    %c0_i32 = arith.constant 0 : i32
    %c0_i32_0 = arith.constant 0 : i32
    %c0_i32_1 = arith.constant 0 : i32
    return %arg0, %c0_i32, %c0_i32_0 : i32, i32, i32
  }
}

module attributes {stable_mosaic.version = 11 : i64} {
  func.func @_resblock_kernel(%arg0: i32, %arg1: memref<1x8x64xf32, #tpu.memory_space<vmem>>, %arg2: memref<8x8xf32, #tpu.memory_space<vmem>>, %arg3: memref<8x1xf32, #tpu.memory_space<vmem>>, %arg4: memref<8x1xf32, #tpu.memory_space<vmem>>, %arg5: memref<8x24xf32, #tpu.memory_space<vmem>>, %arg6: memref<8x1xf32, #tpu.memory_space<vmem>>, %arg7: memref<8x8xf32, #tpu.memory_space<vmem>>, %arg8: memref<8x1xf32, #tpu.memory_space<vmem>>, %arg9: memref<8x1xf32, #tpu.memory_space<vmem>>, %arg10: memref<8x24xf32, #tpu.memory_space<vmem>>, %arg11: memref<8x1xf32, #tpu.memory_space<vmem>>, %arg12: memref<1x8x64xf32, #tpu.memory_space<vmem>>) attributes {dimension_semantics = [#tpu.dimension_semantics<parallel>], iteration_bounds = array<i64: 2>, scalar_prefetch = 0 : i64, scratch_operands = 0 : i64, tpu.core_type = #tpu.core_type<tc>, window_params = [{transform_indices = @transform_0, window_bounds = array<i64: 1, 8, 64>}, {pipeline_mode = #tpu.pipeline_mode<synchronous>, transform_indices = @transform_1, window_bounds = array<i64: 8, 8>}, {pipeline_mode = #tpu.pipeline_mode<synchronous>, transform_indices = @transform_2, window_bounds = array<i64: 8, 1>}, {pipeline_mode = #tpu.pipeline_mode<synchronous>, transform_indices = @transform_3, window_bounds = array<i64: 8, 1>}, {pipeline_mode = #tpu.pipeline_mode<synchronous>, transform_indices = @transform_4, window_bounds = array<i64: 8, 24>}, {pipeline_mode = #tpu.pipeline_mode<synchronous>, transform_indices = @transform_5, window_bounds = array<i64: 8, 1>}, {pipeline_mode = #tpu.pipeline_mode<synchronous>, transform_indices = @transform_6, window_bounds = array<i64: 8, 8>}, {pipeline_mode = #tpu.pipeline_mode<synchronous>, transform_indices = @transform_7, window_bounds = array<i64: 8, 1>}, {pipeline_mode = #tpu.pipeline_mode<synchronous>, transform_indices = @transform_8, window_bounds = array<i64: 8, 1>}, {pipeline_mode = #tpu.pipeline_mode<synchronous>, transform_indices = @transform_9, window_bounds = array<i64: 8, 24>}, {pipeline_mode = #tpu.pipeline_mode<synchronous>, transform_indices = @transform_10, window_bounds = array<i64: 8, 1>}, {transform_indices = @transform_11, window_bounds = array<i64: 1, 8, 64>}]} {
    %c0 = arith.constant 0 : index
    %c0_0 = arith.constant 0 : index
    %c0_1 = arith.constant 0 : index
    %0 = vector.load %arg1[%c0, %c0_0, %c0_1] : memref<1x8x64xf32, #tpu.memory_space<vmem>>, vector<1x8x64xf32>
    %1 = vector.shape_cast %0 : vector<1x8x64xf32> to vector<8x64xf32>
    %c0_2 = arith.constant 0 : index
    %c0_3 = arith.constant 0 : index
    %2 = vector.load %arg2[%c0_2, %c0_3] : memref<8x8xf32, #tpu.memory_space<vmem>>, vector<8x8xf32>
    %c0_4 = arith.constant 0 : index
    %c0_5 = arith.constant 0 : index
    %3 = vector.load %arg3[%c0_4, %c0_5] : memref<8x1xf32, #tpu.memory_space<vmem>>, vector<8x1xf32>
    %c0_6 = arith.constant 0 : index
    %c0_7 = arith.constant 0 : index
    %4 = vector.load %arg4[%c0_6, %c0_7] : memref<8x1xf32, #tpu.memory_space<vmem>>, vector<8x1xf32>
    %cst = arith.constant dense<0.000000e+00> : vector<8xf32>
    %5 = vector.multi_reduction <add>, %1, %cst [1] : vector<8x64xf32> to vector<8xf32>
    %6 = vector.shape_cast %5 : vector<8xf32> to vector<8x1xf32>
    %7 = arith.mulf %1, %1 : vector<8x64xf32>
    %cst_8 = arith.constant dense<0.000000e+00> : vector<8xf32>
    %8 = vector.multi_reduction <add>, %7, %cst_8 [1] : vector<8x64xf32> to vector<8xf32>
    %9 = vector.shape_cast %8 : vector<8xf32> to vector<8x1xf32>
    %cst_9 = arith.constant dense<0.000000e+00> : vector<8x1xf32>
    %10 = tpu.matmul %2, %6, %cst_9 {dimension_numbers = #tpu.dot_dimension_numbers<[1], [0], [0], [1], [0, 0, 1, 1], [], []>} : vector<8x8xf32>, vector<8x1xf32>, vector<8x1xf32> -> vector<8x1xf32>
    %cst_10 = arith.constant dense<0.000000e+00> : vector<8x1xf32>
    %11 = tpu.matmul %2, %9, %cst_10 {dimension_numbers = #tpu.dot_dimension_numbers<[1], [0], [0], [1], [0, 0, 1, 1], [], []>} : vector<8x8xf32>, vector<8x1xf32>, vector<8x1xf32> -> vector<8x1xf32>
    %cst_11 = arith.constant 7.812500e-03 : f32
    %12 = vector.broadcast %cst_11 : f32 to vector<8x1xf32>
    %13 = arith.mulf %10, %12 : vector<8x1xf32>
    %cst_12 = arith.constant 7.812500e-03 : f32
    %14 = vector.broadcast %cst_12 : f32 to vector<8x1xf32>
    %15 = arith.mulf %11, %14 : vector<8x1xf32>
    %16 = arith.mulf %13, %13 : vector<8x1xf32>
    %17 = arith.subf %15, %16 : vector<8x1xf32>
    %cst_13 = arith.constant 9.99999997E-7 : f32
    %18 = vector.broadcast %cst_13 : f32 to vector<8x1xf32>
    %19 = arith.addf %17, %18 : vector<8x1xf32>
    %20 = math.rsqrt %19 : vector<8x1xf32>
    %21 = vector.broadcast %13 : vector<8x1xf32> to vector<8x64xf32>
    %22 = arith.subf %1, %21 : vector<8x64xf32>
    %23 = vector.broadcast %20 : vector<8x1xf32> to vector<8x64xf32>
    %24 = arith.mulf %22, %23 : vector<8x64xf32>
    %25 = vector.broadcast %3 : vector<8x1xf32> to vector<8x64xf32>
    %26 = arith.mulf %24, %25 : vector<8x64xf32>
    %27 = vector.broadcast %4 : vector<8x1xf32> to vector<8x64xf32>
    %28 = arith.addf %26, %27 : vector<8x64xf32>
    %29 = arith.negf %28 : vector<8x64xf32>
    %30 = math.exp %29 : vector<8x64xf32>
    %cst_14 = arith.constant 1.000000e+00 : f32
    %31 = vector.broadcast %cst_14 : f32 to vector<8x64xf32>
    %32 = arith.addf %31, %30 : vector<8x64xf32>
    %33 = arith.divf %31, %32 : vector<8x64xf32>
    %34 = arith.mulf %28, %33 : vector<8x64xf32>
    %c0_15 = arith.constant 0 : index
    %c0_16 = arith.constant 0 : index
    %35 = vector.load %arg5[%c0_15, %c0_16] : memref<8x24xf32, #tpu.memory_space<vmem>>, vector<8x24xf32>
    %c0_17 = arith.constant 0 : index
    %c0_18 = arith.constant 0 : index
    %36 = vector.load %arg6[%c0_17, %c0_18] : memref<8x1xf32, #tpu.memory_space<vmem>>, vector<8x1xf32>
    %cst_19 = arith.constant 0.000000e+00 : f32
    %37 = vector.broadcast %cst_19 : f32 to vector<8x1xf32>
    %38 = vector.extract_strided_slice %34 {offsets = [0, 0], sizes = [8, 63], strides = [1, 1]} : vector<8x64xf32> to vector<8x63xf32>
    %39 = tpu.concatenate %37, %38 in 1 : vector<8x1xf32>, vector<8x63xf32> -> vector<8x64xf32>
    %40 = vector.extract_strided_slice %34 {offsets = [0, 1], sizes = [8, 63], strides = [1, 1]} : vector<8x64xf32> to vector<8x63xf32>
    %41 = tpu.concatenate %40, %37 in 1 : vector<8x63xf32>, vector<8x1xf32> -> vector<8x64xf32>
    %42 = tpu.concatenate %39, %34, %41 in 0 : vector<8x64xf32>, vector<8x64xf32>, vector<8x64xf32> -> vector<24x64xf32>
    %cst_20 = arith.constant dense<0.000000e+00> : vector<8x64xf32>
    %43 = tpu.matmul %35, %42, %cst_20 {dimension_numbers = #tpu.dot_dimension_numbers<[1], [0], [0], [1], [0, 0, 1, 1], [], []>} : vector<8x24xf32>, vector<24x64xf32>, vector<8x64xf32> -> vector<8x64xf32>
    %44 = vector.broadcast %36 : vector<8x1xf32> to vector<8x64xf32>
    %45 = arith.addf %43, %44 : vector<8x64xf32>
    %c0_21 = arith.constant 0 : index
    %c0_22 = arith.constant 0 : index
    %46 = vector.load %arg7[%c0_21, %c0_22] : memref<8x8xf32, #tpu.memory_space<vmem>>, vector<8x8xf32>
    %c0_23 = arith.constant 0 : index
    %c0_24 = arith.constant 0 : index
    %47 = vector.load %arg8[%c0_23, %c0_24] : memref<8x1xf32, #tpu.memory_space<vmem>>, vector<8x1xf32>
    %c0_25 = arith.constant 0 : index
    %c0_26 = arith.constant 0 : index
    %48 = vector.load %arg9[%c0_25, %c0_26] : memref<8x1xf32, #tpu.memory_space<vmem>>, vector<8x1xf32>
    %cst_27 = arith.constant dense<0.000000e+00> : vector<8xf32>
    %49 = vector.multi_reduction <add>, %45, %cst_27 [1] : vector<8x64xf32> to vector<8xf32>
    %50 = vector.shape_cast %49 : vector<8xf32> to vector<8x1xf32>
    %51 = arith.mulf %45, %45 : vector<8x64xf32>
    %cst_28 = arith.constant dense<0.000000e+00> : vector<8xf32>
    %52 = vector.multi_reduction <add>, %51, %cst_28 [1] : vector<8x64xf32> to vector<8xf32>
    %53 = vector.shape_cast %52 : vector<8xf32> to vector<8x1xf32>
    %cst_29 = arith.constant dense<0.000000e+00> : vector<8x1xf32>
    %54 = tpu.matmul %46, %50, %cst_29 {dimension_numbers = #tpu.dot_dimension_numbers<[1], [0], [0], [1], [0, 0, 1, 1], [], []>} : vector<8x8xf32>, vector<8x1xf32>, vector<8x1xf32> -> vector<8x1xf32>
    %cst_30 = arith.constant dense<0.000000e+00> : vector<8x1xf32>
    %55 = tpu.matmul %46, %53, %cst_30 {dimension_numbers = #tpu.dot_dimension_numbers<[1], [0], [0], [1], [0, 0, 1, 1], [], []>} : vector<8x8xf32>, vector<8x1xf32>, vector<8x1xf32> -> vector<8x1xf32>
    %cst_31 = arith.constant 7.812500e-03 : f32
    %56 = vector.broadcast %cst_31 : f32 to vector<8x1xf32>
    %57 = arith.mulf %54, %56 : vector<8x1xf32>
    %cst_32 = arith.constant 7.812500e-03 : f32
    %58 = vector.broadcast %cst_32 : f32 to vector<8x1xf32>
    %59 = arith.mulf %55, %58 : vector<8x1xf32>
    %60 = arith.mulf %57, %57 : vector<8x1xf32>
    %61 = arith.subf %59, %60 : vector<8x1xf32>
    %cst_33 = arith.constant 9.99999997E-7 : f32
    %62 = vector.broadcast %cst_33 : f32 to vector<8x1xf32>
    %63 = arith.addf %61, %62 : vector<8x1xf32>
    %64 = math.rsqrt %63 : vector<8x1xf32>
    %65 = vector.broadcast %57 : vector<8x1xf32> to vector<8x64xf32>
    %66 = arith.subf %45, %65 : vector<8x64xf32>
    %67 = vector.broadcast %64 : vector<8x1xf32> to vector<8x64xf32>
    %68 = arith.mulf %66, %67 : vector<8x64xf32>
    %69 = vector.broadcast %47 : vector<8x1xf32> to vector<8x64xf32>
    %70 = arith.mulf %68, %69 : vector<8x64xf32>
    %71 = vector.broadcast %48 : vector<8x1xf32> to vector<8x64xf32>
    %72 = arith.addf %70, %71 : vector<8x64xf32>
    %73 = arith.negf %72 : vector<8x64xf32>
    %74 = math.exp %73 : vector<8x64xf32>
    %cst_34 = arith.constant 1.000000e+00 : f32
    %75 = vector.broadcast %cst_34 : f32 to vector<8x64xf32>
    %76 = arith.addf %75, %74 : vector<8x64xf32>
    %77 = arith.divf %75, %76 : vector<8x64xf32>
    %78 = arith.mulf %72, %77 : vector<8x64xf32>
    %c0_35 = arith.constant 0 : index
    %c0_36 = arith.constant 0 : index
    %79 = vector.load %arg10[%c0_35, %c0_36] : memref<8x24xf32, #tpu.memory_space<vmem>>, vector<8x24xf32>
    %c0_37 = arith.constant 0 : index
    %c0_38 = arith.constant 0 : index
    %80 = vector.load %arg11[%c0_37, %c0_38] : memref<8x1xf32, #tpu.memory_space<vmem>>, vector<8x1xf32>
    %cst_39 = arith.constant 0.000000e+00 : f32
    %81 = vector.broadcast %cst_39 : f32 to vector<8x1xf32>
    %82 = vector.extract_strided_slice %78 {offsets = [0, 0], sizes = [8, 63], strides = [1, 1]} : vector<8x64xf32> to vector<8x63xf32>
    %83 = tpu.concatenate %81, %82 in 1 : vector<8x1xf32>, vector<8x63xf32> -> vector<8x64xf32>
    %84 = vector.extract_strided_slice %78 {offsets = [0, 1], sizes = [8, 63], strides = [1, 1]} : vector<8x64xf32> to vector<8x63xf32>
    %85 = tpu.concatenate %84, %81 in 1 : vector<8x63xf32>, vector<8x1xf32> -> vector<8x64xf32>
    %86 = tpu.concatenate %83, %78, %85 in 0 : vector<8x64xf32>, vector<8x64xf32>, vector<8x64xf32> -> vector<24x64xf32>
    %cst_40 = arith.constant dense<0.000000e+00> : vector<8x64xf32>
    %87 = tpu.matmul %79, %86, %cst_40 {dimension_numbers = #tpu.dot_dimension_numbers<[1], [0], [0], [1], [0, 0, 1, 1], [], []>} : vector<8x24xf32>, vector<24x64xf32>, vector<8x64xf32> -> vector<8x64xf32>
    %88 = vector.broadcast %80 : vector<8x1xf32> to vector<8x64xf32>
    %89 = arith.addf %87, %88 : vector<8x64xf32>
    %90 = arith.addf %1, %89 : vector<8x64xf32>
    %c0_41 = arith.constant 0 : index
    %c0_42 = arith.constant 0 : index
    %c0_43 = arith.constant 0 : index
    %91 = vector.load %arg12[%c0_41, %c0_42, %c0_43] : memref<1x8x64xf32, #tpu.memory_space<vmem>>, vector<1x8x64xf32>
    %92 = vector.shape_cast %91 : vector<1x8x64xf32> to vector<8x64xf32>
    %93 = vector.shape_cast %90 : vector<8x64xf32> to vector<1x8x64xf32>
    tpu.vector_store %arg12[%c0_41, %c0_42, %c0_43], %93 {strides = array<i32>} : memref<1x8x64xf32, #tpu.memory_space<vmem>>, vector<1x8x64xf32>,
    return
  }
  func.func @transform_0(%arg0: i32) -> (i32, i32, i32) {
    %c0_i32 = arith.constant 0 : i32
    %c0_i32_0 = arith.constant 0 : i32
    %c0_i32_1 = arith.constant 0 : i32
    return %arg0, %c0_i32, %c0_i32_0 : i32, i32, i32
  }
  func.func @transform_1(%arg0: i32) -> (i32, i32) {
    %c0_i32 = arith.constant 0 : i32
    %c0_i32_0 = arith.constant 0 : i32
    %c0_i32_1 = arith.constant 0 : i32
    return %c0_i32, %c0_i32_0 : i32, i32
  }
  func.func @transform_2(%arg0: i32) -> (i32, i32) {
    %c0_i32 = arith.constant 0 : i32
    %c0_i32_0 = arith.constant 0 : i32
    %c0_i32_1 = arith.constant 0 : i32
    return %c0_i32, %c0_i32_0 : i32, i32
  }
  func.func @transform_3(%arg0: i32) -> (i32, i32) {
    %c0_i32 = arith.constant 0 : i32
    %c0_i32_0 = arith.constant 0 : i32
    %c0_i32_1 = arith.constant 0 : i32
    return %c0_i32, %c0_i32_0 : i32, i32
  }
  func.func @transform_4(%arg0: i32) -> (i32, i32) {
    %c0_i32 = arith.constant 0 : i32
    %c0_i32_0 = arith.constant 0 : i32
    %c0_i32_1 = arith.constant 0 : i32
    return %c0_i32, %c0_i32_0 : i32, i32
  }
  func.func @transform_5(%arg0: i32) -> (i32, i32) {
    %c0_i32 = arith.constant 0 : i32
    %c0_i32_0 = arith.constant 0 : i32
    %c0_i32_1 = arith.constant 0 : i32
    return %c0_i32, %c0_i32_0 : i32, i32
  }
  func.func @transform_6(%arg0: i32) -> (i32, i32) {
    %c0_i32 = arith.constant 0 : i32
    %c0_i32_0 = arith.constant 0 : i32
    %c0_i32_1 = arith.constant 0 : i32
    return %c0_i32, %c0_i32_0 : i32, i32
  }
  func.func @transform_7(%arg0: i32) -> (i32, i32) {
    %c0_i32 = arith.constant 0 : i32
    %c0_i32_0 = arith.constant 0 : i32
    %c0_i32_1 = arith.constant 0 : i32
    return %c0_i32, %c0_i32_0 : i32, i32
  }
  func.func @transform_8(%arg0: i32) -> (i32, i32) {
    %c0_i32 = arith.constant 0 : i32
    %c0_i32_0 = arith.constant 0 : i32
    %c0_i32_1 = arith.constant 0 : i32
    return %c0_i32, %c0_i32_0 : i32, i32
  }
  func.func @transform_9(%arg0: i32) -> (i32, i32) {
    %c0_i32 = arith.constant 0 : i32
    %c0_i32_0 = arith.constant 0 : i32
    %c0_i32_1 = arith.constant 0 : i32
    return %c0_i32, %c0_i32_0 : i32, i32
  }
  func.func @transform_10(%arg0: i32) -> (i32, i32) {
    %c0_i32 = arith.constant 0 : i32
    %c0_i32_0 = arith.constant 0 : i32
    %c0_i32_1 = arith.constant 0 : i32
    return %c0_i32, %c0_i32_0 : i32, i32
  }
  func.func @transform_11(%arg0: i32) -> (i32, i32, i32) {
    %c0_i32 = arith.constant 0 : i32
    %c0_i32_0 = arith.constant 0 : i32
    %c0_i32_1 = arith.constant 0 : i32
    return %arg0, %c0_i32, %c0_i32_0 : i32, i32, i32
  }
}

module attributes {stable_mosaic.version = 11 : i64} {
  func.func @_gn_conv_kernel(%arg0: i32, %arg1: memref<1x8x64xf32, #tpu.memory_space<vmem>>, %arg2: memref<8x8xf32, #tpu.memory_space<vmem>>, %arg3: memref<8x1xf32, #tpu.memory_space<vmem>>, %arg4: memref<8x1xf32, #tpu.memory_space<vmem>>, %arg5: memref<2x24xf32, #tpu.memory_space<vmem>>, %arg6: memref<2x1xf32, #tpu.memory_space<vmem>>, %arg7: memref<1x2x64xf32, #tpu.memory_space<vmem>>) attributes {dimension_semantics = [#tpu.dimension_semantics<parallel>], iteration_bounds = array<i64: 2>, scalar_prefetch = 0 : i64, scratch_operands = 0 : i64, tpu.core_type = #tpu.core_type<tc>, window_params = [{transform_indices = @transform_0, window_bounds = array<i64: 1, 8, 64>}, {pipeline_mode = #tpu.pipeline_mode<synchronous>, transform_indices = @transform_1, window_bounds = array<i64: 8, 8>}, {pipeline_mode = #tpu.pipeline_mode<synchronous>, transform_indices = @transform_2, window_bounds = array<i64: 8, 1>}, {pipeline_mode = #tpu.pipeline_mode<synchronous>, transform_indices = @transform_3, window_bounds = array<i64: 8, 1>}, {pipeline_mode = #tpu.pipeline_mode<synchronous>, transform_indices = @transform_4, window_bounds = array<i64: 2, 24>}, {pipeline_mode = #tpu.pipeline_mode<synchronous>, transform_indices = @transform_5, window_bounds = array<i64: 2, 1>}, {transform_indices = @transform_6, window_bounds = array<i64: 1, 2, 64>}]} {
    %c0 = arith.constant 0 : index
    %c0_0 = arith.constant 0 : index
    %c0_1 = arith.constant 0 : index
    %0 = vector.load %arg1[%c0, %c0_0, %c0_1] : memref<1x8x64xf32, #tpu.memory_space<vmem>>, vector<1x8x64xf32>
    %1 = vector.shape_cast %0 : vector<1x8x64xf32> to vector<8x64xf32>
    %c0_2 = arith.constant 0 : index
    %c0_3 = arith.constant 0 : index
    %2 = vector.load %arg2[%c0_2, %c0_3] : memref<8x8xf32, #tpu.memory_space<vmem>>, vector<8x8xf32>
    %c0_4 = arith.constant 0 : index
    %c0_5 = arith.constant 0 : index
    %3 = vector.load %arg3[%c0_4, %c0_5] : memref<8x1xf32, #tpu.memory_space<vmem>>, vector<8x1xf32>
    %c0_6 = arith.constant 0 : index
    %c0_7 = arith.constant 0 : index
    %4 = vector.load %arg4[%c0_6, %c0_7] : memref<8x1xf32, #tpu.memory_space<vmem>>, vector<8x1xf32>
    %cst = arith.constant dense<0.000000e+00> : vector<8xf32>
    %5 = vector.multi_reduction <add>, %1, %cst [1] : vector<8x64xf32> to vector<8xf32>
    %6 = vector.shape_cast %5 : vector<8xf32> to vector<8x1xf32>
    %7 = arith.mulf %1, %1 : vector<8x64xf32>
    %cst_8 = arith.constant dense<0.000000e+00> : vector<8xf32>
    %8 = vector.multi_reduction <add>, %7, %cst_8 [1] : vector<8x64xf32> to vector<8xf32>
    %9 = vector.shape_cast %8 : vector<8xf32> to vector<8x1xf32>
    %cst_9 = arith.constant dense<0.000000e+00> : vector<8x1xf32>
    %10 = tpu.matmul %2, %6, %cst_9 {dimension_numbers = #tpu.dot_dimension_numbers<[1], [0], [0], [1], [0, 0, 1, 1], [], []>} : vector<8x8xf32>, vector<8x1xf32>, vector<8x1xf32> -> vector<8x1xf32>
    %cst_10 = arith.constant dense<0.000000e+00> : vector<8x1xf32>
    %11 = tpu.matmul %2, %9, %cst_10 {dimension_numbers = #tpu.dot_dimension_numbers<[1], [0], [0], [1], [0, 0, 1, 1], [], []>} : vector<8x8xf32>, vector<8x1xf32>, vector<8x1xf32> -> vector<8x1xf32>
    %cst_11 = arith.constant 7.812500e-03 : f32
    %12 = vector.broadcast %cst_11 : f32 to vector<8x1xf32>
    %13 = arith.mulf %10, %12 : vector<8x1xf32>
    %cst_12 = arith.constant 7.812500e-03 : f32
    %14 = vector.broadcast %cst_12 : f32 to vector<8x1xf32>
    %15 = arith.mulf %11, %14 : vector<8x1xf32>
    %16 = arith.mulf %13, %13 : vector<8x1xf32>
    %17 = arith.subf %15, %16 : vector<8x1xf32>
    %cst_13 = arith.constant 9.99999997E-7 : f32
    %18 = vector.broadcast %cst_13 : f32 to vector<8x1xf32>
    %19 = arith.addf %17, %18 : vector<8x1xf32>
    %20 = math.rsqrt %19 : vector<8x1xf32>
    %21 = vector.broadcast %13 : vector<8x1xf32> to vector<8x64xf32>
    %22 = arith.subf %1, %21 : vector<8x64xf32>
    %23 = vector.broadcast %20 : vector<8x1xf32> to vector<8x64xf32>
    %24 = arith.mulf %22, %23 : vector<8x64xf32>
    %25 = vector.broadcast %3 : vector<8x1xf32> to vector<8x64xf32>
    %26 = arith.mulf %24, %25 : vector<8x64xf32>
    %27 = vector.broadcast %4 : vector<8x1xf32> to vector<8x64xf32>
    %28 = arith.addf %26, %27 : vector<8x64xf32>
    %29 = arith.negf %28 : vector<8x64xf32>
    %30 = math.exp %29 : vector<8x64xf32>
    %cst_14 = arith.constant 1.000000e+00 : f32
    %31 = vector.broadcast %cst_14 : f32 to vector<8x64xf32>
    %32 = arith.addf %31, %30 : vector<8x64xf32>
    %33 = arith.divf %31, %32 : vector<8x64xf32>
    %34 = arith.mulf %28, %33 : vector<8x64xf32>
    %c0_15 = arith.constant 0 : index
    %c0_16 = arith.constant 0 : index
    %35 = vector.load %arg5[%c0_15, %c0_16] : memref<2x24xf32, #tpu.memory_space<vmem>>, vector<2x24xf32>
    %c0_17 = arith.constant 0 : index
    %c0_18 = arith.constant 0 : index
    %36 = vector.load %arg6[%c0_17, %c0_18] : memref<2x1xf32, #tpu.memory_space<vmem>>, vector<2x1xf32>
    %cst_19 = arith.constant 0.000000e+00 : f32
    %37 = vector.broadcast %cst_19 : f32 to vector<8x1xf32>
    %38 = vector.extract_strided_slice %34 {offsets = [0, 0], sizes = [8, 63], strides = [1, 1]} : vector<8x64xf32> to vector<8x63xf32>
    %39 = tpu.concatenate %37, %38 in 1 : vector<8x1xf32>, vector<8x63xf32> -> vector<8x64xf32>
    %40 = vector.extract_strided_slice %34 {offsets = [0, 1], sizes = [8, 63], strides = [1, 1]} : vector<8x64xf32> to vector<8x63xf32>
    %41 = tpu.concatenate %40, %37 in 1 : vector<8x63xf32>, vector<8x1xf32> -> vector<8x64xf32>
    %42 = tpu.concatenate %39, %34, %41 in 0 : vector<8x64xf32>, vector<8x64xf32>, vector<8x64xf32> -> vector<24x64xf32>
    %cst_20 = arith.constant dense<0.000000e+00> : vector<2x64xf32>
    %43 = tpu.matmul %35, %42, %cst_20 {dimension_numbers = #tpu.dot_dimension_numbers<[1], [0], [0], [1], [0, 0, 1, 1], [], []>} : vector<2x24xf32>, vector<24x64xf32>, vector<2x64xf32> -> vector<2x64xf32>
    %44 = vector.broadcast %36 : vector<2x1xf32> to vector<2x64xf32>
    %45 = arith.addf %43, %44 : vector<2x64xf32>
    %c0_21 = arith.constant 0 : index
    %c0_22 = arith.constant 0 : index
    %c0_23 = arith.constant 0 : index
    %46 = vector.load %arg7[%c0_21, %c0_22, %c0_23] : memref<1x2x64xf32, #tpu.memory_space<vmem>>, vector<1x2x64xf32>
    %47 = vector.shape_cast %46 : vector<1x2x64xf32> to vector<2x64xf32>
    %48 = vector.shape_cast %45 : vector<2x64xf32> to vector<1x2x64xf32>
    tpu.vector_store %arg7[%c0_21, %c0_22, %c0_23], %48 {strides = array<i32>} : memref<1x2x64xf32, #tpu.memory_space<vmem>>, vector<1x2x64xf32>,
    return
  }
  func.func @transform_0(%arg0: i32) -> (i32, i32, i32) {
    %c0_i32 = arith.constant 0 : i32
    %c0_i32_0 = arith.constant 0 : i32
    %c0_i32_1 = arith.constant 0 : i32
    return %arg0, %c0_i32, %c0_i32_0 : i32, i32, i32
  }
  func.func @transform_1(%arg0: i32) -> (i32, i32) {
    %c0_i32 = arith.constant 0 : i32
    %c0_i32_0 = arith.constant 0 : i32
    %c0_i32_1 = arith.constant 0 : i32
    return %c0_i32, %c0_i32_0 : i32, i32
  }
  func.func @transform_2(%arg0: i32) -> (i32, i32) {
    %c0_i32 = arith.constant 0 : i32
    %c0_i32_0 = arith.constant 0 : i32
    %c0_i32_1 = arith.constant 0 : i32
    return %c0_i32, %c0_i32_0 : i32, i32
  }
  func.func @transform_3(%arg0: i32) -> (i32, i32) {
    %c0_i32 = arith.constant 0 : i32
    %c0_i32_0 = arith.constant 0 : i32
    %c0_i32_1 = arith.constant 0 : i32
    return %c0_i32, %c0_i32_0 : i32, i32
  }
  func.func @transform_4(%arg0: i32) -> (i32, i32) {
    %c0_i32 = arith.constant 0 : i32
    %c0_i32_0 = arith.constant 0 : i32
    %c0_i32_1 = arith.constant 0 : i32
    return %c0_i32, %c0_i32_0 : i32, i32
  }
  func.func @transform_5(%arg0: i32) -> (i32, i32) {
    %c0_i32 = arith.constant 0 : i32
    %c0_i32_0 = arith.constant 0 : i32
    %c0_i32_1 = arith.constant 0 : i32
    return %c0_i32, %c0_i32_0 : i32, i32
  }
  func.func @transform_6(%arg0: i32) -> (i32, i32, i32) {
    %c0_i32 = arith.constant 0 : i32
    %c0_i32_0 = arith.constant 0 : i32
    %c0_i32_1 = arith.constant 0 : i32
    return %arg0, %c0_i32, %c0_i32_0 : i32, i32, i32
  }
}

</mosaic_0001>

<bundles_post_ra>
// kernel: _lambda_.13
= control target key start
LH: loop header
LB: loop body
LE: loop exit
PB: predicated region body
PF: predicated region fallthrough
CT: control target
= control target key end

     0   :  { %s495_s12 = smov 0   ;;  %s562_s0 = inlined_call_operand.vmem [shape: f32[2,4,16], index: 0, kind: input, shape index: {}]   ;;  %s563_s1 = inlined_call_operand.vmem [shape: f32[32,12], index: 1, kind: input, shape index: {}]   ;;  %s564_s2 = inlined_call_operand.vmem [shape: f32[32,1], index: 2, kind: input, shape index: {}]   ;;  %s565_s3 = inlined_call_operand.vmem [shape: f32[2,32,16], index: 3, kind: output, shape index: {}]  }
   0x1 LB: > { %s417_s13 = sadd.s32 4294967295, %s468_s12   ;;  %p421_p0 = scmp.ge.s32.totalorder %s468_s12, 1  ;;  %s468_s12 = sphi %s495_s12, %s13_s12  }
   0x2   : > { %p136_p1 = scmp.lt.s32.totalorder %s468_s12, 3 }
   0x4   : > { %p137_p2 = pnand %p421_p0, %p136_p1 }
   0x5   : > { %p159_p3 = scmp.lt.s32.totalorder (!%p137_p2), %s417_s13, 1  ;;  %s470_s16 = smov (!%p137_p2), 120  }
   0x6   : > { %140 = sbr.rel (%p137_p2) target bundleno = 293 (0x125), region = 32  ;;  %s471_s20 = smov (!%p137_p2), 124  }
   0x7   : > { %s472_s24 = smov (!%p137_p2), 127   ;;  %s473_s25 = smov (!%p137_p2), 1  }
   0xb   : > { %v170_v0 = vld [vmem:[%s563_s1 + $0x8] sm:$0xff]  ;;  %v169_v1 = vld [vmem:[%s563_s1] sm:$0xff]  ;;  %s567_s13 = smov (!%p159_p3, %s417_s13), 1  ;;  %v171_v3 = vld [vmem:[%s563_s1 + $0x10] sm:$0xff]  ;;  %vm209_vm0 = vcmask 1043456   ;;  %vm200_vm1 = vcmask 31744  }
   0xc   : > { %283 = vrot.lane.b32.xlu1 %v170_v0, %s470_s16  ;;  %s422_s19 = sshll.u32 %s567_s13, 2  ;;  %192 = vrot.lane.b32.xlu2 %v169_v1, %s471_s20  ;;  %v172_v4 = vld [vmem:[%s563_s1 + $0x18] sm:$0xff]  ;;  %v173_v7 = vld [vmem:[%s564_s2] sm:$0xff]  ;;  %v474_v9 = vmov 0   ;;  %vm186_vm2 = vcmask 121856   ;;  %vm181_vm3 = vcmask 7168  }
   0xd   : > { %s162_s23 = scalar_lea.vmem %s562_s0, %s422_s19  ;;  %v175_v8 = vld [vmem:[%s564_s2 + $0x10] sm:$0xff]  ;;  %459 = vset.pattern.permute.xlu1 %v474_v9  ;;  %461 = vset.pattern.permute.xlu0 %v474_v9  ;;  %v174_v10 = vld [vmem:[%s564_s2 + $0x8] sm:$0xff]  ;;  %v176_v15 = vld [vmem:[%s564_s2 + $0x18] sm:$0xff]  ;;  %s442_s11 = sshll.u32 %s567_s13, 5  ;;  %vm357_vm4 = vcmask 130048  }
   0xe   : > { %v168_v2 = vld [vmem:[%s162_s23] sm:$0xf]  ;;  %460 = vset.pattern.permute.xlu2 %v474_v9 }
   0xf   : > { %183 = vrot.lane.b32.xlu0 %v168_v2, %s472_s24  ;;  %425 = vmatpush.msk.msra.mxu0 %vm209_vm0, %v168_v2 }
  0x10   : > { %443 = vmatpush.msk.msra.mxu3 %vm209_vm0, %v168_v2 }
  0x14   : > { %178 = vrot.lane.b32.xlu1 %v168_v2, %s473_s25  ;;  %196 = vrot.lane.b32.xlu2 %v171_v3, %s471_s20 }
  0x17   : > { %194 = vrot.lane.b32.xlu0 %v170_v0, %s471_s20 }
  0x1c   : > { %198 = vrot.lane.b32.xlu1 %v172_v4, %s471_s20  ;;  %287 = vrot.lane.b32.xlu2 %v172_v4, %s470_s16 }
  0x1f   : > { %285 = vrot.lane.b32.xlu0 %v171_v3, %s470_s16 }
  0x24   : > { %335 = vperm.xlu1 %459, %v173_v7   ;;  %340 = vperm.xlu2 %460, %v174_v10  }
  0x27   : > { %281 = vrot.lane.b32.xlu0 %v169_v1, %s470_s16  ;;  %s167_s16 = scalar_lea.vmem %s565_s3, %s442_s11 }
  0x2c   : > { %350 = vperm.xlu1 %459, %v176_v15  }
  0x2f   : > { %345 = vperm.xlu0 %461, %v175_v8  }
  0x66   : > { %v193_v5 = vpop.permute.xlu2 %192 }
  0x67   : > { %426 = vmatmul.msk.f32.vlgmr.msra.gmra.mxu0 %vm200_vm1, %v193_v5 }
  0x6e   : > { %v197_v17 = vpop.permute.xlu2 %196 }
  0x76   : > { %v288_v20 = vpop.permute.xlu2 %287 }
  0x7e   : > { %v284_v6 = vpop.permute.xlu1 %283  ;;  %v341_v28 = vpop.permute.xlu2 %340 }
  0x81   : > { %v184_v11 = vpop.permute.xlu0 %183 }
  0x82   : > { %v187_v12 = vsel %vm186_vm2, %v184_v11, 0.0 }
  0x83   : > { %445 = vmatpush.msk.msra.mxu2 %vm209_vm0, %v187_v12 }
  0x84   : > { %437 = vmatmul.msk.f32.vlgmr.msra.gmra.mxu2 %vm200_vm1, %v284_v6 }
  0x86   : > { %v179_v13 = vpop.permute.xlu1 %178 }
  0x87   : > { %v182_v14 = vsel %vm181_vm3, 0.0, %v179_v13 }
  0x88   : > { %430 = vmatpush.msk.msrb.mxu0 %vm209_vm0, %v182_v14  ;;  %444 = vmatpush.msk.msra.mxu1 %vm209_vm0, %v182_v14 }
  0x89   : > { %432 = vmatmul.msk.f32.vlgmr.msra.gmra.mxu1 %vm200_vm1, %v170_v0  ;;  %431 = vmatmul.msk.f32.vlgmr.msrb.gmra.mxu0 %vm200_vm1, %v169_v1  ;;  %v195_v16 = vpop.permute.xlu0 %194 }
  0x8a   : > { %435 = vmatpush.msk.msra.mxu0 %vm209_vm0, %v187_v12  ;;  %427 = vmatmul.msk.f32.vlgmr.msra.gmra.mxu3 %vm200_vm1, %v195_v16 }
  0x8e   : > { %v199_v19 = vpop.permute.xlu1 %198 }
  0x91   : > { %433 = vmatmul.msk.f32.gmra.mxu1 %vm200_vm1, %v171_v3  ;;  %v286_v18 = vpop.permute.xlu0 %285 }
  0x92   : > { %428 = vmatmul.msk.f32.gmra.mxu3 %vm200_vm1, %v197_v17  ;;  %438 = vmatmul.msk.f32.gmra.mxu2 %vm200_vm1, %v286_v18 }
  0x96   : > { %v336_v35 = vpop.permute.xlu1 %335 }
  0x99   : > { %434 = vmatmul.msk.f32.gmra.mxu1 %vm200_vm1, %v172_v4  ;;  %v282_v21 = vpop.permute.xlu0 %281 }
  0x9a   : > { %429 = vmatmul.msk.f32.gmra.mxu3 %vm200_vm1, %v199_v19  ;;  %436 = vmatmul.msk.f32.vlgmr.msra.gmra.mxu0 %vm200_vm1, %v282_v21 }
  0x9b   : > { %439 = vmatmul.msk.f32.gmra.mxu2 %vm200_vm1, %v288_v20 }
  0x9e   : > { %v351_v48 = vpop.permute.xlu1 %350 }
  0xa1   : > { %v346_v38 = vpop.permute.xlu0 %345 }
  0xe4   : > { %v229_v22 = vpop.f32.mrf.mxu0 }
 0x106   : > { %v272_v23 = vpop.f32.mrf.mxu1  ;;  %v269_v27 = vpop.f32.mrf.mxu0 }
 0x107   : > { %v320_v24 = vpop.f32.mrf.mxu2  ;;  %v270_v34 = vadd.f32 %v269_v27, %v229_v22 }
 0x10d   : > { %v232_v25 = vpop.f32.mrf.mxu3 }
 0x10e   : > { %v273_v26 = vadd.f32 %v272_v23, %v232_v25  ;;  %v275_v30 = vpop.f32.mrf.mxu1 }
 0x110   : > { %v330_v29 = vadd.f32 %v320_v24, %v273_v26 }
 0x112   : > { %v354_v31 = vadd.f32 %v341_v28, %v330_v29 }
 0x114   : > { %359 = vst.msk [vmem:[%s167_s16 + $0x8] sm:$0xff] %vm357_vm4, %v354_v31 }
 0x115   : > { %v235_v32 = vpop.f32.mrf.mxu3  ;;  %v323_v33 = vpop.f32.mrf.mxu2 }
 0x116   : > { %v276_v36 = vadd.f32 %v275_v30, %v235_v32  ;;  %v278_v43 = vpop.f32.mrf.mxu1 }
 0x117   : > { %v317_v37 = vpop.f32.mrf.mxu0 }
 0x118   : > { %v329_v39 = vadd.f32 %v317_v37, %v270_v34  ;;  %v331_v40 = vadd.f32 %v323_v33, %v276_v36 }
 0x11a   : > { %v353_v41 = vadd.f32 %v336_v35, %v329_v39  ;;  %v355_v42 = vadd.f32 %v346_v38, %v331_v40 }
 0x11c   : > { %358 = vst.msk [vmem:[%s167_s16] sm:$0xff] %vm357_vm4, %v353_v41 }
 0x11d   : > { %360 = vst.msk [vmem:[%s167_s16 + $0x10] sm:$0xff] %vm357_vm4, %v355_v42  ;;  %v238_v44 = vpop.f32.mrf.mxu3 }
 0x11e   : > { %v279_v45 = vadd.f32 %v278_v43, %v238_v44  ;;  %v326_v46 = vpop.f32.mrf.mxu2 }
 0x120   : > { %v332_v47 = vadd.f32 %v326_v46, %v279_v45 }
 0x122   : > { %v356_v49 = vadd.f32 %v351_v48, %v332_v47 }
 0x124   : > { %361 = vst.msk [vmem:[%s167_s16 + $0x18] sm:$0xff] %vm357_vm4, %v356_v49 }
 0x125 PF: > { %s13_s12 = sadd.s32 1, %s468_s12  }
 0x126   : > { %p10_p4 = scmp.ge.s32.totalorder %s13_s12, 4  }
 0x128   :  { %12 = sbr.rel (!%p10_p4) target bundleno = 1 (0x1), region = 62 }

// kernel: _lambda_.17
= control target key start
LH: loop header
LB: loop body
LE: loop exit
PB: predicated region body
PF: predicated region fallthrough
CT: control target
= control target key end

     0   :  { %s521_s15 = smov 0   ;;  %s615_s0 = inlined_call_operand.vmem [shape: f32[2,32,16], index: 0, kind: input, shape index: {}]   ;;  %s616_s1 = inlined_call_operand.vmem [shape: f32[16,32], index: 1, kind: input, shape index: {}]   ;;  %s617_s2 = inlined_call_operand.vmem [shape: f32[32,96], index: 2, kind: input, shape index: {}]   ;;  %s618_s3 = inlined_call_operand.vmem [shape: f32[32,1], index: 3, kind: input, shape index: {}]   ;;  %s619_s4 = inlined_call_operand.vmem [shape: f32[2,32,32], index: 4, kind: output, shape index: {}]  }
   0x1 LB: > { %s414_s16 = sadd.s32 4294967295, %s491_s15   ;;  %p418_p0 = scmp.ge.s32.totalorder %s491_s15, 1  ;;  %s491_s15 = sphi %s521_s15, %s14_s15  }
   0x2   : > { %p162_p1 = scmp.lt.s32.totalorder %s491_s15, 3 }
   0x4   : > { %p163_p2 = pnand %p418_p0, %p162_p1 }
   0x5   : > { %p188_p3 = scmp.lt.s32.totalorder (!%p163_p2), %s414_s16, 1  ;;  %s493_s25 = smov (!%p163_p2), 127  }
   0x6   : > { %166 = sbr.rel (%p163_p2) target bundleno = 454 (0x1c6), region = 36  ;;  %s494_s26 = smov (!%p163_p2), 1  }
   0xb   : > { %v203_v0 = vld [vmem:[%s616_s1 + $0x8] sm:$0xff]  ;;  %v202_v1 = vld [vmem:[%s616_s1] sm:$0xff]  ;;  %s623_s16 = smov (!%p188_p3, %s414_s16), 1  ;;  %vm204_vm0 = vcmask 130048   ;;  %vm287_vm1 = vcmask 252928   ;;  %v252_v12 = vld [vmem:[%s618_s3 + $0x10] sm:$0xff] }
   0xc   : > { %231 = vmatpush.msra.mxu0 %v203_v0  ;;  %s445_s21 = sshll.u32 %s623_s16, 5  ;;  %v495_v14 = vmov 0   ;;  %v251_v15 = vld [vmem:[%s618_s3 + $0x8] sm:$0xff]  ;;  %v250_v17 = vld [vmem:[%s618_s3] sm:$0xff]  ;;  %vm270_vm2 = vcmask 7168   ;;  %v253_v20 = vld [vmem:[%s618_s3 + $0x18] sm:$0xff] }
   0xd   : > { %s192_s24 = scalar_lea.vmem %s615_s0, %s445_s21  ;;  %484 = vset.pattern.permute.xlu1 %v495_v14  ;;  %483 = vset.pattern.permute.xlu0 %v495_v14  ;;  %vm564_vm3 = vmneg %vm270_vm2  ;;  %v246_v23 = vld [vmem:[%s617_s2] sm:$0xff]  ;;  %v248_v25 = vld [vmem:[%s617_s2 + $0x10] sm:$0xff]  ;;  %vm312_vm4 = vcmask 785408   ;;  %s197_s22 = scalar_lea.vmem %s619_s4, %s445_s21  ;;  %vm354_vm5 = vcmask 261120  }
   0xe   : > { %232 = vmatpush.msra.mxu0 %v202_v1  ;;  %v198_v2 = vld [vmem:[%s192_s24] sm:$0xff]  ;;  %v199_v3 = vld [vmem:[%s192_s24 + $0x8] sm:$0xff]  ;;  %v200_v4 = vld [vmem:[%s192_s24 + $0x10] sm:$0xff]  ;;  %482 = vset.pattern.permute.xlu2 %v495_v14 }
   0xf   : > { %423 = vmatmul.msk.f32.vlgmr.msra.gmra.mxu0 %vm204_vm0, %v198_v2  ;;  %v201_v5 = vld [vmem:[%s192_s24 + $0x18] sm:$0xff]  ;;  %v247_v26 = vld [vmem:[%s617_s2 + $0x8] sm:$0xff] }
  0x10   : > { %v249_v27 = vld [vmem:[%s617_s2 + $0x18] sm:$0xff] }
  0x17   : > { %424 = vmatmul.msk.f32.gmra.mxu0 %vm204_vm0, %v199_v3 }
  0x1f   : > { %425 = vmatmul.msk.f32.gmra.mxu0 %vm204_vm0, %v200_v4 }
  0x27   : > { %426 = vmatmul.msk.f32.gmra.mxu0 %vm204_vm0, %v201_v5 }
  0x8c   : > { %v234_v6 = vpop.f32.mrf.mxu0 }
  0x94   : > { %v237_v7 = vpop.f32.mrf.mxu0 }
  0x95   : > { %277 = vrot.lane.b32.xlu1 %v237_v7, %s493_s25 }
  0x9c   : > { %v240_v8 = vpop.f32.mrf.mxu0 }
  0x9d   : > { %275 = vrot.lane.b32.xlu1 %v234_v6, %s493_s25 }
  0xa4   : > { %v243_v9 = vpop.f32.mrf.mxu0 }
  0xa5   : > { %258 = vrot.lane.b32.xlu1 %v234_v6, %s494_s26  ;;  %264 = vrot.lane.b32.xlu2 %v243_v9, %s494_s26 }
  0xa6   : > { %281 = vrot.lane.b32.xlu0 %v243_v9, %s493_s25 }
  0xad   : > { %262 = vrot.lane.b32.xlu2 %v240_v8, %s494_s26  ;;  %304 = vperm.xlu1 %484, %v252_v12  }
  0xae   : > { %279 = vrot.lane.b32.xlu0 %v240_v8, %s493_s25 }
  0xb5   : > { %294 = vperm.xlu2 %482, %v250_v17  }
  0xb6   : > { %260 = vrot.lane.b32.xlu0 %v237_v7, %s494_s26 }
  0xbd   : > { %309 = vperm.xlu2 %482, %v253_v20  }
  0xbe   : > { %299 = vperm.xlu0 %483, %v251_v15  }
  0xff   : > { %v265_v18 = vpop.permute.xlu2 %264 }
 0x107   : > { %v278_v11 = vpop.permute.xlu1 %277  ;;  %v263_v21 = vpop.permute.xlu2 %262 }
 0x10f   : > { %v276_v16 = vpop.permute.xlu1 %275  ;;  %v295_v28 = vpop.permute.xlu2 %294 }
 0x117   : > { %v259_v24 = vpop.permute.xlu1 %258  ;;  %v310_v37 = vpop.permute.xlu2 %309 }
 0x118   : > { %v282_v10 = vpop.permute.xlu0 %281 }
 0x119   : > { %427 = vmatpush.msk.msra.mxu1 %vm287_vm1, %v282_v10  ;;  %447 = vmatpush.msk.msra.mxu2 %vm287_vm1, %v282_v10 }
 0x11a   : > { %448 = vmatpush.msk.msra.mxu3 %vm287_vm1, %v282_v10 }
 0x11f   : > { %v305_v31 = vpop.permute.xlu1 %304 }
 0x120   : > { %v280_v13 = vpop.permute.xlu0 %279 }
 0x121   : > { %428 = vmatpush.msk.msra.mxu1 %vm287_vm1, %v280_v13  ;;  %449 = vmatpush.msk.msra.mxu2 %vm287_vm1, %v280_v13 }
 0x122   : > { %450 = vmatpush.msk.msra.mxu3 %vm287_vm1, %v280_v13 }
 0x123   : > { %429 = vmatpush.msk.msra.mxu1 %vm287_vm1, %v278_v11  ;;  %451 = vmatpush.msk.msra.mxu2 %vm287_vm1, %v278_v11 }
 0x124   : > { %452 = vmatpush.msk.msra.mxu3 %vm287_vm1, %v278_v11 }
 0x125   : > { %430 = vmatpush.msk.msra.mxu1 %vm287_vm1, %v276_v16  ;;  %453 = vmatpush.msk.msra.mxu2 %vm287_vm1, %v276_v16 }
 0x126   : > { %454 = vmatpush.msk.msra.mxu3 %vm287_vm1, %v276_v16 }
 0x127   : > { %333 = vmatpush.msra.mxu1 %v243_v9  ;;  %455 = vmatpush.msra.mxu2 %v243_v9 }
 0x128   : > { %456 = vmatpush.msra.mxu3 %v243_v9  ;;  %v261_v22 = vpop.permute.xlu0 %260 }
 0x129   : > { %334 = vmatpush.msra.mxu1 %v240_v8  ;;  %457 = vmatpush.msra.mxu2 %v240_v8 }
 0x12a   : > { %458 = vmatpush.msra.mxu3 %v240_v8 }
 0x12b   : > { %335 = vmatpush.msra.mxu1 %v237_v7  ;;  %459 = vmatpush.msra.mxu2 %v237_v7 }
 0x12c   : > { %460 = vmatpush.msra.mxu3 %v237_v7 }
 0x12d   : > { %336 = vmatpush.msra.mxu1 %v234_v6  ;;  %461 = vmatpush.msra.mxu2 %v234_v6 }
 0x12e   : > { %462 = vmatpush.msra.mxu3 %v234_v6 }
 0x12f   : > { %432 = vmatpush.msk.msra.mxu1 %vm564_vm3, %v265_v18  ;;  %463 = vmatpush.msk.msra.mxu2 %vm564_vm3, %v265_v18 }
 0x130   : > { %464 = vmatpush.msk.msra.mxu3 %vm564_vm3, %v265_v18  ;;  %v300_v32 = vpop.permute.xlu0 %299 }
 0x131   : > { %434 = vmatpush.msk.msra.mxu1 %vm564_vm3, %v263_v21  ;;  %465 = vmatpush.msk.msra.mxu2 %vm564_vm3, %v263_v21 }
 0x132   : > { %466 = vmatpush.msk.msra.mxu3 %vm564_vm3, %v263_v21 }
 0x133   : > { %436 = vmatpush.msk.msra.mxu1 %vm564_vm3, %v261_v22  ;;  %467 = vmatpush.msk.msra.mxu2 %vm564_vm3, %v261_v22 }
 0x134   : > { %468 = vmatpush.msk.msra.mxu3 %vm564_vm3, %v261_v22 }
 0x135   : > { %438 = vmatpush.msk.msra.mxu1 %vm564_vm3, %v259_v24  ;;  %469 = vmatpush.msk.msra.mxu2 %vm564_vm3, %v259_v24 }
 0x136   : > { %470 = vmatpush.msk.msra.mxu3 %vm564_vm3, %v259_v24  ;;  %439 = vmatmul.msk.f32.vlgmr.msra.gmra.mxu1 %vm312_vm4, %v246_v23 }
 0x137   : > { %441 = vmatmul.msk.f32.vlgmr.msra.gmra.mxu3 %vm312_vm4, %v248_v25  ;;  %440 = vmatmul.msk.f32.vlgmr.msra.gmra.mxu2 %vm312_vm4, %v247_v26 }
 0x13f   : > { %442 = vmatmul.msk.f32.gmra.mxu3 %vm312_vm4, %v249_v27 }
 0x1b3   : > { %v342_v29 = vpop.f32.mrf.mxu1 }
 0x1b4   : > { %v343_v30 = vadd.f32 %v342_v29, %v295_v28 }
 0x1b6   : > { %355 = vst.msk [vmem:[%s197_s22] sm:$0xff] %vm354_vm5, %v343_v30 }
 0x1ba   : > { %v348_v33 = vpop.f32.mrf.mxu3  ;;  %v345_v34 = vpop.f32.mrf.mxu2 }
 0x1bb   : > { %v349_v35 = vadd.f32 %v348_v33, %v305_v31  ;;  %v346_v36 = vadd.f32 %v345_v34, %v300_v32 }
 0x1bd   : > { %357 = vst.msk [vmem:[%s197_s22 + $0x10] sm:$0xff] %vm354_vm5, %v349_v35 }
 0x1be   : > { %356 = vst.msk [vmem:[%s197_s22 + $0x8] sm:$0xff] %vm354_vm5, %v346_v36 }
 0x1c2   : > { %v351_v38 = vpop.f32.mrf.mxu3 }
 0x1c3   : > { %v352_v39 = vadd.f32 %v351_v38, %v310_v37 }
 0x1c5   : > { %358 = vst.msk [vmem:[%s197_s22 + $0x18] sm:$0xff] %vm354_vm5, %v352_v39 }
 0x1c6 PF: > { %s14_s15 = sadd.s32 1, %s491_s15  }
 0x1c7   : > { %p11_p4 = scmp.ge.s32.totalorder %s14_s15, 4  }
 0x1c9   :  { %13 = sbr.rel (!%p11_p4) target bundleno = 1 (0x1), region = 66 }

// kernel: _lambda_.14
= control target key start
LH: loop header
LB: loop body
LE: loop exit
PB: predicated region body
PF: predicated region fallthrough
CT: control target
= control target key end

     0   :  { %s1575_s17 = smov 0   ;;  %s1887_s0 = inlined_call_operand.vmem [shape: f32[2,32,16], index: 0, kind: input, shape index: {}]   ;;  %s1888_s1 = inlined_call_operand.vmem [shape: f32[32,32], index: 1, kind: input, shape index: {}]   ;;  %s1889_s2 = inlined_call_operand.vmem [shape: f32[32,1], index: 2, kind: input, shape index: {}]   ;;  %s1890_s3 = inlined_call_operand.vmem [shape: f32[32,1], index: 3, kind: input, shape index: {}]   ;;  %s1891_s4 = inlined_call_operand.vmem [shape: f32[32,96], index: 4, kind: input, shape index: {}]   ;;  %s1892_s5 = inlined_call_operand.vmem [shape: f32[32,1], index: 5, kind: input, shape index: {}]   ;;  %s1893_s6 = inlined_call_operand.vmem [shape: f32[32,32], index: 6, kind: input, shape index: {}]   ;;  %s1894_s7 = inlined_call_operand.vmem [shape: f32[32,1], index: 7, kind: input, shape index: {}]   ;;  %s1895_s8 = inlined_call_operand.vmem [shape: f32[32,1], index: 8, kind: input, shape index: {}]   ;;  %s1896_s9 = inlined_call_operand.vmem [shape: f32[32,96], index: 9, kind: input, shape index: {}]   ;;  %s1897_s10 = inlined_call_operand.vmem [shape: f32[32,1], index: 10, kind: input, shape index: {}]   ;;  %s1898_s11 = inlined_call_operand.vmem [shape: f32[2,32,16], index: 11, kind: output, shape index: {}]  }
   0x1 LB: > { %s1361_s18 = sadd.s32 4294967295, %s1510_s17   ;;  %p1365_p0 = scmp.ge.s32.totalorder %s1510_s17, 1  ;;  %s1510_s17 = sphi %s1575_s17, %s21_s17  }
   0x2   : > { %p337_p1 = scmp.lt.s32.totalorder %s1510_s17, 3 }
   0x4   : > { %p338_p2 = pnand %p1365_p0, %p337_p1 }
   0x5   : > { %p377_p3 = scmp.lt.s32.totalorder (!%p338_p2), %s1361_s18, 1  ;;  %s1513_s13 = smov (!%p338_p2), 127  }
   0x6   : > { %341 = sbr.rel (%p338_p2) target bundleno = 1516 (0x5ec), region = 64  ;;  %s1514_s14 = smov (!%p338_p2), 1  }
   0xb   : > { %s1902_s18 = smov (!%p377_p3, %s1361_s18), 1  ;;  %vm403_vm0 = vcmask 130048   ;;  %v402_v19 = vld [vmem:[%s1890_s3 + $0x18] sm:$0xff]  ;;  %v1512_v20 = vmov 0   ;;  %v391_v24 = vld [vmem:[%s1888_s1] sm:$0xff]  ;;  %vm432_vm1 = vcmask 261120  }
   0xc   : > { %s1428_s19 = sshll.u32 %s1902_s18, 5  ;;  %1451 = vset.pattern.permute.xlu2 %v1512_v20  ;;  %1450 = vset.pattern.permute.xlu0 %v1512_v20  ;;  %v392_v25 = vld [vmem:[%s1888_s1 + $0x8] sm:$0xff]  ;;  %v401_v26 = vld [vmem:[%s1890_s3 + $0x10] sm:$0xff]  ;;  %v394_v30 = vld [vmem:[%s1888_s1 + $0x18] sm:$0xff] }
   0xd   : > { %s1591_s22 = scalar_lea.vmem %s1887_s0, %s1428_s19  ;;  %1449 = vset.pattern.permute.xlu1 %v1512_v20  ;;  %v393_v29 = vld [vmem:[%s1888_s1 + $0x10] sm:$0xff]  ;;  %v396_v32 = vld [vmem:[%s1889_s2 + $0x8] sm:$0xff]  ;;  %v398_v33 = vld [vmem:[%s1889_s2 + $0x18] sm:$0xff]  ;;  %s386_s23 = scalar_lea.vmem %s1898_s11, %s1428_s19 }
   0xe   : > { %v1594_v0 = vld [vmem:[%s1591_s22 + $0x18] sm:$0xff]  ;;  %v1597_v1 = vld [vmem:[%s1591_s22 + $0x8] sm:$0xff]  ;;  %v1607_v6 = vld [vmem:[%s1591_s22 + $0x10] sm:$0xff] }
   0xf   : > { %v413_v2 = vsel %vm403_vm0, %v1594_v0, 0.0  ;;  %v407_v3 = vsel %vm403_vm0, %v1597_v1, 0.0  ;;  %v419_v4 = vmul.f32 %v1594_v0, %v1594_v0  ;;  %v1610_v7 = vld [vmem:[%s1591_s22] sm:$0xff]  ;;  %v418_v8 = vmul.f32 %v1607_v6, %v1607_v6  ;;  %v397_v31 = vld [vmem:[%s1889_s2 + $0x10] sm:$0xff]  ;;  %v400_v60 = vld [vmem:[%s1890_s3 + $0x8] sm:$0xff] }
  0x10   : > { %414 = vadd.xlane.f32.xlu0 %v413_v2  ;;  %408 = vadd.xlane.f32.xlu1 %v407_v3  ;;  %v410_v9 = vsel %vm403_vm0, %v1607_v6, 0.0  ;;  %v404_v10 = vsel %vm403_vm0, %v1610_v7, 0.0  ;;  %v417_v12 = vmul.f32 %v1597_v1, %v1597_v1  ;;  %v416_v13 = vmul.f32 %v1610_v7, %v1610_v7 }
  0x11   : > { %v429_v5 = vsel %vm403_vm0, %v419_v4, 0.0  ;;  %v426_v11 = vsel %vm403_vm0, %v418_v8, 0.0 }
  0x12   : > { %430 = vadd.xlane.f32.xlu2 %v429_v5  ;;  %v423_v14 = vsel %vm403_vm0, %v417_v12, 0.0  ;;  %v420_v15 = vsel %vm403_vm0, %v416_v13, 0.0 }
  0x18   : > { %411 = vadd.xlane.f32.xlu0 %v410_v9  ;;  %405 = vadd.xlane.f32.xlu1 %v404_v10 }
  0x1a   : > { %427 = vadd.xlane.f32.xlu2 %v426_v11 }
  0x20   : > { %424 = vadd.xlane.f32.xlu0 %v423_v14  ;;  %421 = vadd.xlane.f32.xlu1 %v420_v15 }
  0x32   : > { %652 = vperm.xlu2 %1451, %v402_v19  }
  0x34   : > { %623 = vperm.xlu0 %1450, %v397_v31  }
  0x39   : > { %628 = vperm.xlu1 %1449, %v398_v33  }
  0x3a   : > { %647 = vperm.xlu2 %1451, %v401_v26  }
  0x3c   : > { %618 = vperm.xlu0 %1450, %v396_v32   ;;  %v395_v32 = vld [vmem:[%s1889_s2] sm:$0xff] }
  0x83   : > { %v415_v16 = vpop.xlane.xlu0 %414  ;;  %v409_v17 = vpop.xlane.xlu1 %408 }
  0x84   : > { %457 = vmatpush.msra.mxu0 %v415_v16  ;;  %1430 = vmatpush.msra.mxu3 %v415_v16 }
  0x85   : > { %v431_v18 = vpop.xlane.xlu2 %430 }
  0x86   : > { %1434 = vmatpush.msra.mxu1 %v431_v18 }
  0x8b   : > { %v412_v21 = vpop.xlane.xlu0 %411  ;;  %v406_v22 = vpop.xlane.xlu1 %405 }
  0x8c   : > { %458 = vmatpush.msra.mxu0 %v412_v21  ;;  %1431 = vmatpush.msra.mxu3 %v412_v21 }
  0x8d   : > { %v428_v23 = vpop.xlane.xlu2 %427 }
  0x8e   : > { %459 = vmatpush.msra.mxu0 %v409_v17  ;;  %1432 = vmatpush.msra.mxu3 %v409_v17 }
  0x8f   : > { %1435 = vmatpush.msra.mxu1 %v428_v23 }
  0x90   : > { %460 = vmatpush.msra.mxu0 %v406_v22  ;;  %1433 = vmatpush.msra.mxu3 %v406_v22 }
  0x91   : > { %1370 = vmatmul.msk.f32.vlgmr.msra.gmra.mxu0 %vm432_vm1, %v391_v24  ;;  %1371 = vmatmul.msk.f32.vlgmr.msra.gmra.mxu3 %vm432_vm1, %v392_v25 }
  0x92   : > { %486 = vmatpush.msrb.mxu0 %v431_v18 }
  0x93   : > { %v425_v27 = vpop.xlane.xlu0 %424  ;;  %v422_v28 = vpop.xlane.xlu1 %421 }
  0x94   : > { %487 = vmatpush.msrb.mxu0 %v428_v23  ;;  %1436 = vmatpush.msra.mxu1 %v425_v27 }
  0x95   : > { %v653_v33 = vpop.permute.xlu2 %652 }
  0x96   : > { %488 = vmatpush.msrb.mxu0 %v425_v27  ;;  %1437 = vmatpush.msra.mxu1 %v422_v28 }
  0x97   : > { %1375 = vmatmul.msk.f32.vlgmr.msra.gmra.mxu1 %vm432_vm1, %v392_v25 }
  0x98   : > { %489 = vmatpush.msrb.mxu0 %v422_v28 }
  0x99   : > { %1372 = vmatmul.msk.f32.gmra.mxu3 %vm432_vm1, %v393_v29  ;;  %1374 = vmatmul.msk.f32.vlgmr.msrb.gmra.mxu0 %vm432_vm1, %v391_v24 }
  0x9f   : > { %1376 = vmatmul.msk.f32.gmra.mxu1 %vm432_vm1, %v393_v29  ;;  %v399_v29 = vld [vmem:[%s1890_s3] sm:$0xff] }
  0xa1   : > { %1373 = vmatmul.msk.f32.gmra.mxu3 %vm432_vm1, %v394_v30 }
  0xa7   : > { %1377 = vmatmul.msk.f32.gmra.mxu1 %vm432_vm1, %v394_v30 }
 0x10e   : > { %v462_v34 = vpop.f32.mrf.mxu0 }
 0x10f   : > { %v503_v35 = vmul.f32 0.0078125, %v462_v34  ;;  %v648_v34 = vpop.permute.xlu2 %647 }
 0x111   : > { %565 = vperm.xlu2 %1451, %v503_v35   ;;  %v511_v38 = vmul.f32 %v503_v35, %v503_v35 }
 0x114   : > { %v465_v36 = vpop.f32.mrf.mxu3  ;;  %v494_v37 = vpop.f32.mrf.mxu1 }
 0x115   : > { %v504_v39 = vmul.f32 0.0078125, %v465_v36  ;;  %v508_v40 = vmul.f32 0.0078125, %v494_v37  ;;  %v624_v36 = vpop.permute.xlu0 %623 }
 0x116   : > { %v491_v41 = vpop.f32.mrf.mxu0 }
 0x117   : > { %v512_v42 = vmul.f32 %v504_v39, %v504_v39  ;;  %v507_v43 = vmul.f32 0.0078125, %v491_v41 }
 0x119   : > { %v515_v44 = vsub.f32 %v507_v43, %v511_v38  ;;  %v516_v45 = vsub.f32 %v508_v40, %v512_v42  ;;  %570 = vperm.xlu2 %1451, %v504_v39  }
 0x11b   : > { %v519_v46 = vadd.f32 1e-06, %v515_v44  ;;  %v520_v47 = vadd.f32 1e-06, %v516_v45 }
 0x11c   : > { %v468_v48 = vpop.f32.mrf.mxu3  ;;  %v497_v49 = vpop.f32.mrf.mxu1 }
 0x11d   : > { %1452 = vrsqrt.f32 %v519_v46  ;;  %v505_v50 = vmul.f32 0.0078125, %v468_v48  ;;  %v509_v51 = vmul.f32 0.0078125, %v497_v49  ;;  %vm539_vm3 = vweird.f32 %v520_v47  ;;  %v619_v38 = vpop.permute.xlu0 %618 }
 0x11e   : > { %1454 = vrsqrt.f32 %v520_v47  ;;  %vm529_vm9 = vweird.f32 %v519_v46 }
 0x11f   : > { %v513_v52 = vmul.f32 %v505_v50, %v505_v50  ;;  %575 = vperm.xlu0 %1450, %v505_v50  }
 0x121   : > { %v517_v53 = vsub.f32 %v509_v51, %v513_v52 }
 0x123   : > { %v1453_v54 = vpop.eup %1452  ;;  %v521_v55 = vadd.f32 1e-06, %v517_v53 }
 0x124   : > { %v1455_v56 = vpop.eup %1454  ;;  %v524_v57 = vmul.f32 %v1453_v54, %v519_v46  ;;  %v471_v58 = vpop.f32.mrf.mxu3  ;;  %vm530_vm6 = vweird.f32 %v1453_v54 }
 0x125   : > { %v500_v59 = vpop.f32.mrf.mxu1  ;;  %v534_v61 = vmul.f32 %v1455_v56, %v520_v47  ;;  %1456 = vrsqrt.f32 %v521_v55  ;;  %v506_v62 = vmul.f32 0.0078125, %v471_v58  ;;  %vm540_vm2 = vweird.f32 %v1455_v56  ;;  %vm531_vm10 = vmor %vm529_vm9, %vm530_vm6  ;;  %v629_v46 = vpop.permute.xlu1 %628 }
 0x126   : > { %v510_v63 = vmul.f32 0.0078125, %v500_v59  ;;  %v525_v4 = vmul.f32 %v1453_v54, %v524_v57  ;;  %vm541_vm4 = vmor %vm539_vm3, %vm540_vm2  ;;  %vm549_vm7 = vweird.f32 %v521_v55 }
 0x127   : > { %v514_v2 = vmul.f32 %v506_v62, %v506_v62  ;;  %580 = vperm.xlu2 %1451, %v506_v62   ;;  %v535_v3 = vmul.f32 %v1455_v56, %v534_v61  ;;  %642 = vperm.xlu0 %1450, %v400_v60  }
 0x128   : > { %v526_v12 = vmul.f32 0.5, %v525_v4 }
 0x129   : > { %v518_v5 = vsub.f32 %v510_v63, %v514_v2  ;;  %v536_v8 = vmul.f32 0.5, %v535_v3 }
 0x12a   : > { %v527_v17 = vsub.f32 1.5, %v526_v12 }
 0x12b   : > { %v1457_v9 = vpop.eup %1456  ;;  %v522_v10 = vadd.f32 1e-06, %v518_v5  ;;  %v537_v11 = vsub.f32 1.5, %v536_v8 }
 0x12c   : > { %v544_v13 = vmul.f32 %v1457_v9, %v521_v55  ;;  %vm550_vm5 = vweird.f32 %v1457_v9  ;;  %v528_v21 = vmul.f32 %v1453_v54, %v527_v17 }
 0x12d   : > { %1458 = vrsqrt.f32 %v522_v10  ;;  %v538_v14 = vmul.f32 %v1455_v56, %v537_v11  ;;  %vm551_vm8 = vmor %vm549_vm7, %vm550_vm5  ;;  %vm559_vm12 = vweird.f32 %v522_v10 }
 0x12e   : > { %v545_v15 = vmul.f32 %v1457_v9, %v544_v13  ;;  %v532_v26 = vsel %vm531_vm10, %v1453_v54, %v528_v21 }
 0x12f   : > { %v542_v16 = vsel %vm541_vm4, %v1455_v56, %v538_v14 }
 0x130   : > { %594 = vperm.xlu1 %1449, %v542_v16   ;;  %v546_v18 = vmul.f32 0.5, %v545_v15 }
 0x132   : > { %v547_v19 = vsub.f32 1.5, %v546_v18 }
 0x133   : > { %v1459_v20 = vpop.eup %1458 }
 0x134   : > { %v554_v22 = vmul.f32 %v1459_v20, %v522_v10  ;;  %v548_v23 = vmul.f32 %v1457_v9, %v547_v19  ;;  %vm560_vm11 = vweird.f32 %v1459_v20 }
 0x135   : > { %vm561_vm13 = vmor %vm559_vm12, %vm560_vm11 }
 0x136   : > { %v552_v24 = vsel %vm551_vm8, %v1457_v9, %v548_v23  ;;  %v555_v25 = vmul.f32 %v1459_v20, %v554_v22 }
 0x137   : > { %599 = vperm.xlu2 %1451, %v552_v24  }
 0x138   : > { %589 = vperm.xlu1 %1449, %v532_v26   ;;  %v556_v27 = vmul.f32 0.5, %v555_v25 }
 0x13a   : > { %v557_v28 = vsub.f32 1.5, %v556_v27 }
 0x13c   : > { %v558_v30 = vmul.f32 %v1459_v20, %v557_v28 }
 0x13e   : > { %v562_v31 = vsel %vm561_vm13, %v1459_v20, %v558_v30 }
 0x13f   : > { %637 = vperm.xlu2 %1451, %v399_v29  }
 0x140   : > { %604 = vperm.xlu1 %1449, %v562_v31  }
 0x148   : > { %613 = vperm.xlu1 %1449, %v395_v32  }
 0x16b   : > { %v566_v35 = vpop.permute.xlu2 %565 }
 0x16c   : > { %v583_v12 = vsub.f32 %v1610_v7, %v566_v35 }
 0x173   : > { %v571_v37 = vpop.permute.xlu2 %570 }
 0x174   : > { %v584_v48 = vsub.f32 %v1597_v1, %v571_v37 }
 0x181   : > { %v581_v39 = vpop.permute.xlu2 %580 }
 0x182   : > { %v586_v63 = vsub.f32 %v1594_v0, %v581_v39 }
 0x191   : > { %v576_v40 = vpop.permute.xlu0 %575  ;;  %v600_v42 = vpop.permute.xlu2 %599 }
 0x192   : > { %v585_v41 = vsub.f32 %v1607_v6, %v576_v40 }
 0x194   : > { %v609_v43 = vmul.f32 %v600_v42, %v585_v41 }
 0x196   : > { %v633_v44 = vmul.f32 %v624_v36, %v609_v43 }
 0x198   : > { %v657_v45 = vadd.f32 %v648_v34, %v633_v44 }
 0x199   : > { %v643_v54 = vpop.permute.xlu0 %642  ;;  %v638_v20 = vpop.permute.xlu2 %637 }
 0x19a   : > { %v1380_v47 = vmul.f32 -1.442695, %v657_v45 }
 0x19c   : > { %1460 = vpow2.f32 %v1380_v47  ;;  %v746_v47 = vld [vmem:[%s1892_s5 + $0x18] sm:$0xff] }
 0x1a2   : > { %v1461_v49 = vpop.eup %1460  ;;  %v595_v50 = vpop.permute.xlu1 %594 }
 0x1a3   : > { %v673_v51 = vadd.f32 1.0, %v1461_v49  ;;  %v608_v52 = vmul.f32 %v595_v50, %v584_v48 }
 0x1a5   : > { %1462 = vrcp.f32 %v673_v51  ;;  %v632_v53 = vmul.f32 %v619_v38, %v608_v52  ;;  %v716_v61 = vand.u32 2147483648, %v673_v51  ;;  %v714_v1 = vand.u32 2147483647, %v673_v51 }
 0x1a6   : > { %vm710_vm15 = vweird.f32 %v673_v51 }
 0x1a7   : > { %v656_v55 = vadd.f32 %v643_v54, %v632_v53  ;;  %v717_v8 = vor.u32 1.1754944e-38, %v716_v61  ;;  %vm715_vm3 = vcmp.eq.f32.partialorder %v714_v1, 8.507059e+37 }
 0x1a9   : > { %v1379_v56 = vmul.f32 -1.442695, %v656_v55 }
 0x1aa   : > { %v590_v57 = vpop.permute.xlu1 %589 }
 0x1ab   : > { %v1463_v6 = vpop.eup %1462  ;;  %1464 = vpow2.f32 %v1379_v56  ;;  %v607_v0 = vmul.f32 %v590_v57, %v583_v12  ;;  %v743_v57 = vld [vmem:[%s1892_s5] sm:$0xff] }
 0x1ac   : > { %v706_v58 = vmul.f32 %v1463_v6, %v673_v51  ;;  %vm711_vm14 = vweird.f32 %v1463_v6 }
 0x1ad   : > { %vm712_vm2 = vmor %vm710_vm15, %vm711_vm14 }
 0x1ae   : > { %v707_v59 = vsub.f32 1.0, %v706_v58  ;;  %v744_v58 = vld [vmem:[%s1892_s5 + $0x8] sm:$0xff] }
 0x1b0   : > { %v708_v60 = vmul.f32 %v1463_v6, %v707_v59  ;;  %v745_v59 = vld [vmem:[%s1892_s5 + $0x10] sm:$0xff] }
 0x1b1   : > { %v1465_v62 = vpop.eup %1464 }
 0x1b2   : > { %v672_v2 = vadd.f32 1.0, %v1465_v62  ;;  %v605_v3 = vpop.permute.xlu1 %604  ;;  %v709_v4 = vadd.f32 %v1463_v6, %v708_v60 }
 0x1b3   : > { %v610_v5 = vmul.f32 %v605_v3, %v586_v63 }
 0x1b4   : > { %1466 = vrcp.f32 %v672_v2  ;;  %v713_v10 = vsel %vm712_vm2, %v1463_v6, %v709_v4  ;;  %v701_v23 = vand.u32 2147483648, %v672_v2  ;;  %v699_v7 = vand.u32 2147483647, %v672_v2 }
 0x1b5   : > { %v634_v9 = vmul.f32 %v629_v46, %v610_v5  ;;  %v718_v11 = vsel %vm715_vm3, %v717_v8, %v713_v10  ;;  %vm695_vm5 = vweird.f32 %v672_v2  ;;  %vm780_vm2 = vcmask 121856   ;;  %v739_v5 = vld [vmem:[%s1891_s4] sm:$0xff]  ;;  %v741_v10 = vld [vmem:[%s1891_s4 + $0x10] sm:$0xff] }
 0x1b6   : > { %v1673_v14 = vmul.f32 %v718_v11, %v657_v45  ;;  %v702_v28 = vor.u32 1.1754944e-38, %v701_v23  ;;  %vm700_vm7 = vcmp.eq.f32.partialorder %v699_v7, 8.507059e+37  ;;  %vm763_vm3 = vcmask 7168   ;;  %v742_v11 = vld [vmem:[%s1891_s4 + $0x18] sm:$0xff] }
 0x1b7   : > { %v658_v13 = vadd.f32 %v653_v33, %v634_v9  ;;  %v740_v9 = vld [vmem:[%s1891_s4 + $0x8] sm:$0xff] }
 0x1b8   : > { %772 = vrot.lane.b32.xlu0 %v1673_v14, %s1513_s13 }
 0x1b9   : > { %v1381_v15 = vmul.f32 -1.442695, %v658_v13 }
 0x1ba   : > { %v1467_v16 = vpop.eup %1466  ;;  %v614_v17 = vpop.permute.xlu1 %613 }
 0x1bb   : > { %v691_v18 = vmul.f32 %v1467_v16, %v672_v2  ;;  %1468 = vpow2.f32 %v1381_v15  ;;  %v631_v19 = vmul.f32 %v614_v17, %v607_v0  ;;  %vm696_vm4 = vweird.f32 %v1467_v16  ;;  %v1196_v2 = vld [vmem:[%s1896_s9 + $0x18] sm:$0xff] }
 0x1bc   : > { %vm697_vm6 = vmor %vm695_vm5, %vm696_vm4  ;;  %vm805_vm5 = vcmask 785408  }
 0x1bd   : > { %v692_v21 = vsub.f32 1.0, %v691_v18  ;;  %v655_v22 = vadd.f32 %v638_v20, %v631_v19  ;;  %vm1702_vm4 = vmneg %vm763_vm3 }
 0x1bf   : > { %v693_v24 = vmul.f32 %v1467_v16, %v692_v21  ;;  %v1378_v25 = vmul.f32 -1.442695, %v655_v22 }
 0x1c1   : > { %v1469_v26 = vpop.eup %1468  ;;  %v694_v27 = vadd.f32 %v1467_v16, %v693_v24  ;;  %1470 = vpow2.f32 %v1378_v25 }
 0x1c2   : > { %v674_v29 = vadd.f32 1.0, %v1469_v26 }
 0x1c3   : > { %v698_v30 = vsel %vm697_vm6, %v1467_v16, %v694_v27 }
 0x1c4   : > { %v703_v31 = vsel %vm700_vm7, %v702_v28, %v698_v30  ;;  %1472 = vrcp.f32 %v674_v29  ;;  %v731_v38 = vand.u32 2147483648, %v674_v29  ;;  %v729_v40 = vand.u32 2147483647, %v674_v29 }
 0x1c5   : > { %v736_v32 = vmul.f32 %v703_v31, %v656_v55  ;;  %vm725_vm9 = vweird.f32 %v674_v29 }
 0x1c6   : > { %v732_v44 = vor.u32 1.1754944e-38, %v731_v38  ;;  %vm730_vm11 = vcmp.eq.f32.partialorder %v729_v40, 8.507059e+37 }
 0x1c7   : > { %v1471_v33 = vpop.eup %1470  ;;  %770 = vrot.lane.b32.xlu2 %v736_v32, %s1513_s13 }
 0x1c8   : > { %v671_v34 = vadd.f32 1.0, %v1471_v33 }
 0x1ca   : > { %v1473_v35 = vpop.eup %1472  ;;  %1474 = vrcp.f32 %v671_v34  ;;  %v686_v49 = vand.u32 2147483648, %v671_v34  ;;  %v684_v52 = vand.u32 2147483647, %v671_v34  ;;  %vm680_vm13 = vweird.f32 %v671_v34 }
 0x1cb   : > { %v721_v36 = vmul.f32 %v1473_v35, %v674_v29  ;;  %vm726_vm8 = vweird.f32 %v1473_v35 }
 0x1cc   : > { %vm727_vm10 = vmor %vm725_vm9, %vm726_vm8  ;;  %v687_v54 = vor.u32 1.1754944e-38, %v686_v49  ;;  %vm685_vm15 = vcmp.eq.f32.partialorder %v684_v52, 8.507059e+37 }
 0x1cd   : > { %v722_v37 = vsub.f32 1.0, %v721_v36  ;;  %v858_v36 = vld [vmem:[%s1895_s8 + $0x18] sm:$0xff] }
 0x1cf   : > { %755 = vrot.lane.b32.xlu2 %v1673_v14, %s1514_s14  ;;  %v723_v39 = vmul.f32 %v1473_v35, %v722_v37 }
 0x1d0   : > { %v1475_v41 = vpop.eup %1474 }
 0x1d1   : > { %v724_v42 = vadd.f32 %v1473_v35, %v723_v39  ;;  %v676_v43 = vmul.f32 %v1475_v41, %v671_v34  ;;  %vm681_vm12 = vweird.f32 %v1475_v41  ;;  %v854_v34 = vld [vmem:[%s1894_s7 + $0x18] sm:$0xff] }
 0x1d2   : > { %vm682_vm14 = vmor %vm680_vm13, %vm681_vm12 }
 0x1d3   : > { %v728_v45 = vsel %vm727_vm10, %v1473_v35, %v724_v42  ;;  %v677_v46 = vsub.f32 1.0, %v676_v43  ;;  %v853_v35 = vld [vmem:[%s1894_s7 + $0x10] sm:$0xff]  ;;  %v847_v42 = vld [vmem:[%s1893_s6] sm:$0xff] }
 0x1d4   : > { %v733_v48 = vsel %vm730_vm11, %v732_v44, %v728_v45  ;;  %v848_v44 = vld [vmem:[%s1893_s6 + $0x8] sm:$0xff] }
 0x1d5   : > { %v738_v50 = vmul.f32 %v733_v48, %v658_v13  ;;  %v678_v51 = vmul.f32 %v1475_v41, %v677_v46  ;;  %v850_v48 = vld [vmem:[%s1893_s6 + $0x18] sm:$0xff] }
 0x1d7   : > { %802 = vperm.xlu2 %1451, %v746_v47   ;;  %757 = vrot.lane.b32.xlu0 %v738_v50, %s1514_s14  ;;  %v679_v53 = vadd.f32 %v1475_v41, %v678_v51  ;;  %v849_v47 = vld [vmem:[%s1893_s6 + $0x10] sm:$0xff] }
 0x1d8   : > { %774 = vrot.lane.b32.xlu1 %v738_v50, %s1513_s13 }
 0x1d9   : > { %v683_v55 = vsel %vm682_vm14, %v1475_v41, %v679_v53 }
 0x1da   : > { %v688_v56 = vsel %vm685_vm15, %v687_v54, %v683_v55 }
 0x1db   : > { %v735_v6 = vmul.f32 %v688_v56, %v655_v22 }
 0x1df   : > { %787 = vperm.xlu2 %1451, %v743_v57   ;;  %751 = vrot.lane.b32.xlu0 %v735_v6, %s1514_s14 }
 0x1e0   : > { %768 = vrot.lane.b32.xlu1 %v735_v6, %s1513_s13 }
 0x1e7   : > { %792 = vperm.xlu0 %1450, %v744_v58  }
 0x1e8   : > { %753 = vrot.lane.b32.xlu1 %v736_v32, %s1514_s14 }
 0x1f0   : > { %797 = vperm.xlu1 %1449, %v745_v59  }
 0x221   : > { %v771_v62 = vpop.permute.xlu2 %770 }
 0x229   : > { %v756_v3 = vpop.permute.xlu2 %755 }
 0x22a   : > { %v773_v61 = vpop.permute.xlu0 %772 }
 0x231   : > { %v803_v19 = vpop.permute.xlu2 %802 }
 0x239   : > { %v788_v26 = vpop.permute.xlu2 %787 }
 0x249   : > { %v758_v1 = vpop.permute.xlu0 %757 }
 0x24a   : > { %v775_v60 = vpop.permute.xlu1 %774 }
 0x24b   : > { %1382 = vmatpush.msk.msra.mxu2 %vm780_vm2, %v775_v60 }
 0x24d   : > { %1383 = vmatpush.msk.msra.mxu2 %vm780_vm2, %v773_v61 }
 0x24f   : > { %1384 = vmatpush.msk.msra.mxu2 %vm780_vm2, %v771_v62 }
 0x251   : > { %v752_v8 = vpop.permute.xlu0 %751 }
 0x252   : > { %v769_v63 = vpop.permute.xlu1 %768 }
 0x253   : > { %1385 = vmatpush.msk.msra.mxu2 %vm780_vm2, %v769_v63 }
 0x255   : > { %826 = vmatpush.msra.mxu2 %v738_v50 }
 0x257   : > { %827 = vmatpush.msra.mxu2 %v1673_v14 }
 0x259   : > { %828 = vmatpush.msra.mxu2 %v736_v32  ;;  %v793_v13 = vpop.permute.xlu0 %792 }
 0x25a   : > { %v754_v4 = vpop.permute.xlu1 %753 }
 0x25b   : > { %829 = vmatpush.msra.mxu2 %v735_v6 }
 0x25d   : > { %1387 = vmatpush.msk.msra.mxu2 %vm1702_vm4, %v758_v1 }
 0x25f   : > { %1389 = vmatpush.msk.msra.mxu2 %vm1702_vm4, %v756_v3 }
 0x261   : > { %1391 = vmatpush.msk.msra.mxu2 %vm1702_vm4, %v754_v4 }
 0x262   : > { %v798_v16 = vpop.permute.xlu1 %797 }
 0x263   : > { %1393 = vmatpush.msk.msra.mxu2 %vm1702_vm4, %v752_v8 }
 0x264   : > { %1394 = vmatmul.msk.f32.vlgmr.msra.gmra.mxu2 %vm805_vm5, %v739_v5 }
 0x26c   : > { %1395 = vmatmul.msk.f32.gmra.mxu2 %vm805_vm5, %v740_v9 }
 0x274   : > { %1396 = vmatmul.msk.f32.gmra.mxu2 %vm805_vm5, %v741_v10 }
 0x27c   : > { %1397 = vmatmul.msk.f32.gmra.mxu2 %vm805_vm5, %v742_v11 }
 0x2e7   : > { %v835_v12 = vpop.f32.mrf.mxu2 }
 0x2e8   : > { %v1747_v27 = vadd.f32 %v835_v12, %v788_v26 }
 0x2ea   : > { %v871_v29 = vmul.f32 %v1747_v27, %v1747_v27  ;;  %v859_v30 = vsel %vm403_vm0, %v1747_v27, 0.0 }
 0x2ec   : > { %v875_v31 = vsel %vm403_vm0, %v871_v29, 0.0 }
 0x2ef   : > { %v838_v14 = vpop.f32.mrf.mxu2 }
 0x2f0   : > { %v1730_v0 = vadd.f32 %v838_v14, %v793_v13 }
 0x2f2   : > { %v862_v15 = vsel %vm403_vm0, %v1730_v0, 0.0  ;;  %v872_v32 = vmul.f32 %v1730_v0, %v1730_v0 }
 0x2f3   : > { %863 = vadd.xlane.f32.xlu2 %v862_v15 }
 0x2f4   : > { %v878_v33 = vsel %vm403_vm0, %v872_v32, 0.0 }
 0x2f7   : > { %v841_v17 = vpop.f32.mrf.mxu2 }
 0x2f8   : > { %v1734_v18 = vadd.f32 %v841_v17, %v798_v16 }
 0x2fa   : > { %v865_v20 = vsel %vm403_vm0, %v1734_v18, 0.0  ;;  %v873_v21 = vmul.f32 %v1734_v18, %v1734_v18 }
 0x2fb   : > { %866 = vadd.xlane.f32.xlu0 %v865_v20 }
 0x2fc   : > { %v881_v7 = vsel %vm403_vm0, %v873_v21, 0.0 }
 0x2ff   : > { %v844_v22 = vpop.f32.mrf.mxu2 }
 0x300   : > { %v1740_v23 = vadd.f32 %v844_v22, %v803_v19 }
 0x302   : > { %v868_v24 = vsel %vm403_vm0, %v1740_v23, 0.0  ;;  %v874_v25 = vmul.f32 %v1740_v23, %v1740_v23 }
 0x303   : > { %869 = vadd.xlane.f32.xlu1 %v868_v24  ;;  %882 = vadd.xlane.f32.xlu0 %v881_v7 }
 0x304   : > { %v884_v28 = vsel %vm403_vm0, %v874_v25, 0.0 }
 0x305   : > { %885 = vadd.xlane.f32.xlu2 %v884_v28  ;;  %v852_v28 = vld [vmem:[%s1894_s7 + $0x8] sm:$0xff] }
 0x30b   : > { %860 = vadd.xlane.f32.xlu1 %v859_v30 }
 0x30d   : > { %876 = vadd.xlane.f32.xlu2 %v875_v31 }
 0x313   : > { %879 = vadd.xlane.f32.xlu1 %v878_v33 }
 0x317   : > { %1082 = vperm.xlu0 %1450, %v854_v34  }
 0x31f   : > { %1077 = vperm.xlu0 %1450, %v853_v35  }
 0x325   : > { %1106 = vperm.xlu2 %1451, %v858_v36  }
 0x366   : > { %v864_v37 = vpop.xlane.xlu2 %863 }
 0x36e   : > { %v867_v38 = vpop.xlane.xlu0 %866 }
 0x376   : > { %v870_v39 = vpop.xlane.xlu1 %869  ;;  %v883_v41 = vpop.xlane.xlu0 %882 }
 0x377   : > { %911 = vmatpush.msrb.mxu3 %v870_v39 }
 0x378   : > { %v886_v40 = vpop.xlane.xlu2 %885 }
 0x379   : > { %912 = vmatpush.msrb.mxu3 %v867_v38  ;;  %940 = vmatpush.msra.mxu0 %v886_v40 }
 0x37b   : > { %913 = vmatpush.msrb.mxu3 %v864_v37  ;;  %941 = vmatpush.msra.mxu0 %v883_v41  ;;  %v856_v37 = vld [vmem:[%s1895_s8 + $0x8] sm:$0xff] }
 0x37e   : > { %v861_v43 = vpop.xlane.xlu1 %860 }
 0x37f   : > { %914 = vmatpush.msrb.mxu3 %v861_v43 }
 0x380   : > { %1398 = vmatmul.msk.f32.vlgmr.msrb.gmra.mxu3 %vm432_vm1, %v847_v42  ;;  %v877_v46 = vpop.xlane.xlu2 %876 }
 0x386   : > { %v880_v45 = vpop.xlane.xlu1 %879 }
 0x387   : > { %942 = vmatpush.msra.mxu0 %v880_v45 }
 0x388   : > { %1399 = vmatmul.msk.f32.gmra.mxu3 %vm432_vm1, %v848_v44 }
 0x389   : > { %943 = vmatpush.msra.mxu0 %v877_v46  ;;  %v851_v46 = vld [vmem:[%s1894_s7] sm:$0xff] }
 0x38a   : > { %1402 = vmatmul.msk.f32.vlgmr.msra.gmra.mxu0 %vm432_vm1, %v847_v42 }
 0x390   : > { %1400 = vmatmul.msk.f32.gmra.mxu3 %vm432_vm1, %v849_v47 }
 0x392   : > { %1403 = vmatmul.msk.f32.gmra.mxu0 %vm432_vm1, %v848_v44 }
 0x398   : > { %1401 = vmatmul.msk.f32.gmra.mxu3 %vm432_vm1, %v850_v48 }
 0x39a   : > { %1404 = vmatmul.msk.f32.gmra.mxu0 %vm432_vm1, %v849_v47 }
 0x3a2   : > { %1405 = vmatmul.msk.f32.gmra.mxu0 %vm432_vm1, %v850_v48 }
 0x403   : > { %v916_v49 = vpop.f32.mrf.mxu3 }
 0x404   : > { %v957_v50 = vmul.f32 0.0078125, %v916_v49  ;;  %v857_v49 = vld [vmem:[%s1895_s8 + $0x10] sm:$0xff] }
 0x406   : > { %v965_v51 = vmul.f32 %v957_v50, %v957_v50  ;;  %1019 = vperm.xlu2 %1451, %v957_v50   ;;  %v855_v50 = vld [vmem:[%s1895_s8] sm:$0xff] }
 0x407   : > { %v945_v52 = vpop.f32.mrf.mxu0 }
 0x408   : > { %v961_v53 = vmul.f32 0.0078125, %v945_v52 }
 0x40a   : > { %v969_v54 = vsub.f32 %v961_v53, %v965_v51  ;;  %v1083_v51 = vpop.permute.xlu0 %1082  ;;  %v1107_v53 = vpop.permute.xlu2 %1106 }
 0x40b   : > { %v919_v55 = vpop.f32.mrf.mxu3 }
 0x40c   : > { %v973_v56 = vadd.f32 1e-06, %v969_v54  ;;  %v958_v57 = vmul.f32 0.0078125, %v919_v55 }
 0x40e   : > { %1476 = vrsqrt.f32 %v973_v56  ;;  %v966_v6 = vmul.f32 %v958_v57, %v958_v57  ;;  %1024 = vperm.xlu0 %1450, %v958_v57   ;;  %vm983_vm6 = vweird.f32 %v973_v56 }
 0x40f   : > { %v948_v58 = vpop.f32.mrf.mxu0 }
 0x410   : > { %v962_v59 = vmul.f32 0.0078125, %v948_v58 }
 0x412   : > { %v970_v60 = vsub.f32 %v962_v59, %v966_v6  ;;  %v1078_v52 = vpop.permute.xlu0 %1077 }
 0x413   : > { %v922_v61 = vpop.f32.mrf.mxu3 }
 0x414   : > { %v1477_v62 = vpop.eup %1476  ;;  %v974_v63 = vadd.f32 1e-06, %v970_v60  ;;  %v959_v1 = vmul.f32 0.0078125, %v922_v61 }
 0x415   : > { %v978_v3 = vmul.f32 %v1477_v62, %v973_v56  ;;  %vm984_vm1 = vweird.f32 %v1477_v62 }
 0x416   : > { %1478 = vrsqrt.f32 %v974_v63  ;;  %v967_v4 = vmul.f32 %v959_v1, %v959_v1  ;;  %1029 = vperm.xlu1 %1449, %v959_v1   ;;  %vm985_vm7 = vmor %vm983_vm6, %vm984_vm1  ;;  %vm993_vm9 = vweird.f32 %v974_v63 }
 0x417   : > { %v951_v5 = vpop.f32.mrf.mxu0  ;;  %v979_v8 = vmul.f32 %v1477_v62, %v978_v3 }
 0x418   : > { %v963_v9 = vmul.f32 0.0078125, %v951_v5 }
 0x419   : > { %v980_v10 = vmul.f32 0.5, %v979_v8 }
 0x41a   : > { %v971_v11 = vsub.f32 %v963_v9, %v967_v4 }
 0x41b   : > { %v925_v12 = vpop.f32.mrf.mxu3  ;;  %v981_v13 = vsub.f32 1.5, %v980_v10 }
 0x41c   : > { %v1479_v14 = vpop.eup %1478  ;;  %v975_v15 = vadd.f32 1e-06, %v971_v11  ;;  %v960_v16 = vmul.f32 0.0078125, %v925_v12 }
 0x41d   : > { %v988_v17 = vmul.f32 %v1479_v14, %v974_v63  ;;  %v982_v19 = vmul.f32 %v1477_v62, %v981_v13  ;;  %vm994_vm8 = vweird.f32 %v1479_v14 }
 0x41e   : > { %1480 = vrsqrt.f32 %v975_v15  ;;  %v968_v20 = vmul.f32 %v960_v16, %v960_v16  ;;  %1034 = vperm.xlu0 %1450, %v960_v16   ;;  %vm995_vm10 = vmor %vm993_vm9, %vm994_vm8  ;;  %vm1003_vm12 = vweird.f32 %v975_v15 }
 0x41f   : > { %v954_v21 = vpop.f32.mrf.mxu0  ;;  %v986_v22 = vsel %vm985_vm7, %v1477_v62, %v982_v19  ;;  %v989_v24 = vmul.f32 %v1479_v14, %v988_v17 }
 0x420   : > { %v964_v7 = vmul.f32 0.0078125, %v954_v21  ;;  %1043 = vperm.xlu1 %1449, %v986_v22  }
 0x421   : > { %v990_v25 = vmul.f32 0.5, %v989_v24 }
 0x422   : > { %v972_v26 = vsub.f32 %v964_v7, %v968_v20 }
 0x423   : > { %v991_v29 = vsub.f32 1.5, %v990_v25 }
 0x424   : > { %v1481_v30 = vpop.eup %1480  ;;  %v976_v31 = vadd.f32 1e-06, %v972_v26 }
 0x425   : > { %v998_v32 = vmul.f32 %v1481_v30, %v975_v15  ;;  %v992_v33 = vmul.f32 %v1479_v14, %v991_v29  ;;  %vm1004_vm11 = vweird.f32 %v1481_v30 }
 0x426   : > { %1482 = vrsqrt.f32 %v976_v31  ;;  %1072 = vperm.xlu0 %1450, %v852_v28   ;;  %vm1005_vm13 = vmor %vm1003_vm12, %vm1004_vm11  ;;  %vm1013_vm14 = vweird.f32 %v976_v31 }
 0x427   : > { %v996_v34 = vsel %vm995_vm10, %v1479_v14, %v992_v33  ;;  %v999_v35 = vmul.f32 %v1481_v30, %v998_v32 }
 0x428   : > { %1048 = vperm.xlu1 %1449, %v996_v34  }
 0x429   : > { %v1000_v36 = vmul.f32 0.5, %v999_v35 }
 0x42b   : > { %v1001_v38 = vsub.f32 1.5, %v1000_v36 }
 0x42c   : > { %v1483_v39 = vpop.eup %1482 }
 0x42d   : > { %v1008_v40 = vmul.f32 %v1483_v39, %v976_v31  ;;  %v1002_v41 = vmul.f32 %v1481_v30, %v1001_v38  ;;  %vm1014_vm15 = vweird.f32 %v1483_v39 }
 0x42e   : > { %1096 = vperm.xlu0 %1450, %v856_v37   ;;  %vm1015_vm3 = vmor %vm1013_vm14, %vm1014_vm15 }
 0x42f   : > { %v1009_v42 = vmul.f32 %v1483_v39, %v1008_v40  ;;  %v1006_v43 = vsel %vm1005_vm13, %v1481_v30, %v1002_v41 }
 0x430   : > { %1053 = vperm.xlu1 %1449, %v1006_v43  }
 0x431   : > { %v1010_v44 = vmul.f32 0.5, %v1009_v42 }
 0x433   : > { %v1011_v45 = vsub.f32 1.5, %v1010_v44 }
 0x435   : > { %v1012_v47 = vmul.f32 %v1483_v39, %v1011_v45 }
 0x437   : > { %v1016_v48 = vsel %vm1015_vm3, %v1483_v39, %v1012_v47 }
 0x438   : > { %1067 = vperm.xlu1 %1449, %v851_v46   ;;  %1058 = vperm.xlu2 %1451, %v1016_v48  }
 0x440   : > { %1101 = vperm.xlu2 %1451, %v857_v49  }
 0x448   : > { %1091 = vperm.xlu2 %1451, %v855_v50  }
 0x460   : > { %v1020_v55 = vpop.permute.xlu2 %1019 }
 0x461   : > { %v1037_v17 = vsub.f32 %v1747_v27, %v1020_v55 }
 0x480   : > { %v1025_v54 = vpop.permute.xlu0 %1024 }
 0x481   : > { %v1038_v1 = vsub.f32 %v1730_v0, %v1025_v54 }
 0x488   : > { %v1030_v56 = vpop.permute.xlu1 %1029 }
 0x489   : > { %v1039_v11 = vsub.f32 %v1734_v18, %v1030_v56 }
 0x490   : > { %v1035_v57 = vpop.permute.xlu0 %1034 }
 0x491   : > { %v1040_v6 = vsub.f32 %v1740_v23, %v1035_v57 }
 0x492   : > { %v1059_v58 = vpop.permute.xlu2 %1058  ;;  %v1044_v59 = vpop.permute.xlu1 %1043 }
 0x493   : > { %v1064_v60 = vmul.f32 %v1059_v58, %v1040_v6  ;;  %v1061_v20 = vmul.f32 %v1044_v59, %v1037_v17 }
 0x495   : > { %v1088_v61 = vmul.f32 %v1083_v51, %v1064_v60 }
 0x497   : > { %v1112_v62 = vadd.f32 %v1107_v53, %v1088_v61 }
 0x498   : > { %v1073_v63 = vpop.permute.xlu0 %1072 }
 0x499   : > { %v1409_v3 = vmul.f32 -1.442695, %v1112_v62 }
 0x49a   : > { %v1049_v4 = vpop.permute.xlu1 %1048  ;;  %v1102_v13 = vpop.permute.xlu2 %1101 }
 0x49b   : > { %1484 = vpow2.f32 %v1409_v3  ;;  %v1062_v5 = vmul.f32 %v1049_v4, %v1038_v1 }
 0x49d   : > { %v1086_v8 = vmul.f32 %v1073_v63, %v1062_v5 }
 0x4a0   : > { %v1097_v9 = vpop.permute.xlu0 %1096 }
 0x4a1   : > { %v1485_v10 = vpop.eup %1484  ;;  %v1805_v12 = vadd.f32 %v1097_v9, %v1086_v8 }
 0x4a2   : > { %v1128_v23 = vadd.f32 1.0, %v1485_v10  ;;  %v1054_v14 = vpop.permute.xlu1 %1053  ;;  %v1092_v28 = vpop.permute.xlu2 %1091 }
 0x4a3   : > { %v1407_v15 = vmul.f32 -1.442695, %v1805_v12  ;;  %v1063_v16 = vmul.f32 %v1054_v14, %v1039_v11  ;;  %v1197_v14 = vld [vmem:[%s1897_s10] sm:$0xff] }
 0x4a4   : > { %1486 = vrcp.f32 %v1128_v23  ;;  %v1185_v31 = vand.u32 2147483648, %v1128_v23  ;;  %v1183_v33 = vand.u32 2147483647, %v1128_v23  ;;  %vm1179_vm6 = vweird.f32 %v1128_v23 }
 0x4a5   : > { %1488 = vpow2.f32 %v1407_v15  ;;  %v1087_v0 = vmul.f32 %v1078_v52, %v1063_v16  ;;  %v1200_v15 = vld [vmem:[%s1897_s10 + $0x18] sm:$0xff]  ;;  %v1198_v16 = vld [vmem:[%s1897_s10 + $0x8] sm:$0xff] }
 0x4a6   : > { %v1186_v37 = vor.u32 1.1754944e-38, %v1185_v31  ;;  %vm1184_vm8 = vcmp.eq.f32.partialorder %v1183_v33, 8.507059e+37 }
 0x4a7   : > { %v1809_v19 = vadd.f32 %v1102_v13, %v1087_v0  ;;  %v1199_v0 = vld [vmem:[%s1897_s10 + $0x10] sm:$0xff] }
 0x4a9   : > { %v1408_v21 = vmul.f32 -1.442695, %v1809_v19 }
 0x4aa   : > { %v1487_v22 = vpop.eup %1486  ;;  %v1068_v18 = vpop.permute.xlu1 %1067 }
 0x4ab   : > { %v1489_v24 = vpop.eup %1488  ;;  %1490 = vpow2.f32 %v1408_v21  ;;  %v1085_v7 = vmul.f32 %v1068_v18, %v1061_v20  ;;  %v1175_v25 = vmul.f32 %v1487_v22, %v1128_v23  ;;  %vm1180_vm1 = vweird.f32 %v1487_v22 }
 0x4ac   : > { %v1126_v26 = vadd.f32 1.0, %v1489_v24  ;;  %vm1181_vm7 = vmor %vm1179_vm6, %vm1180_vm1 }
 0x4ad   : > { %v1812_v29 = vadd.f32 %v1092_v28, %v1085_v7  ;;  %v1176_v30 = vsub.f32 1.0, %v1175_v25  ;;  %v1193_v7 = vld [vmem:[%s1896_s9] sm:$0xff]  ;;  %v1195_v28 = vld [vmem:[%s1896_s9 + $0x10] sm:$0xff] }
 0x4ae   : > { %1492 = vrcp.f32 %v1126_v26  ;;  %v1155_v45 = vand.u32 2147483648, %v1126_v26  ;;  %v1153_v48 = vand.u32 2147483647, %v1126_v26  ;;  %vm1149_vm10 = vweird.f32 %v1126_v26 }
 0x4af   : > { %v1406_v27 = vmul.f32 -1.442695, %v1812_v29  ;;  %v1177_v32 = vmul.f32 %v1487_v22, %v1176_v30 }
 0x4b0   : > { %v1156_v52 = vor.u32 1.1754944e-38, %v1155_v45  ;;  %vm1154_vm12 = vcmp.eq.f32.partialorder %v1153_v48, 8.507059e+37 }
 0x4b1   : > { %v1491_v34 = vpop.eup %1490  ;;  %1494 = vpow2.f32 %v1406_v27  ;;  %v1178_v35 = vadd.f32 %v1487_v22, %v1177_v32  ;;  %v1500_v27 = vld [vmem:[%s1591_s22] sm:$0xff] }
 0x4b2   : > { %v1127_v36 = vadd.f32 1.0, %v1491_v34 }
 0x4b3   : > { %v1182_v38 = vsel %vm1181_vm7, %v1487_v22, %v1178_v35 }
 0x4b4   : > { %v1493_v39 = vpop.eup %1492  ;;  %1496 = vrcp.f32 %v1127_v36  ;;  %v1187_v40 = vsel %vm1184_vm8, %v1186_v37, %v1182_v38  ;;  %v1170_v56 = vand.u32 2147483648, %v1127_v36  ;;  %v1168_v58 = vand.u32 2147483647, %v1127_v36 }
 0x4b5   : > { %v1145_v41 = vmul.f32 %v1493_v39, %v1126_v26  ;;  %v1815_v42 = vmul.f32 %v1187_v40, %v1112_v62  ;;  %vm1150_vm9 = vweird.f32 %v1493_v39  ;;  %vm1164_vm14 = vweird.f32 %v1127_v36  ;;  %v1194_v26 = vld [vmem:[%s1896_s9 + $0x8] sm:$0xff] }
 0x4b6   : > { %vm1151_vm11 = vmor %vm1149_vm10, %vm1150_vm9  ;;  %v1171_v62 = vor.u32 1.1754944e-38, %v1170_v56  ;;  %vm1169_vm3 = vcmp.eq.f32.partialorder %v1168_v58, 8.507059e+37 }
 0x4b7   : > { %v1495_v43 = vpop.eup %1494  ;;  %v1146_v44 = vsub.f32 1.0, %v1145_v41  ;;  %1227 = vrot.lane.b32.xlu1 %v1815_v42, %s1513_s13  ;;  %v1502_v41 = vld [vmem:[%s1591_s22 + $0x10] sm:$0xff] }
 0x4b8   : > { %v1125_v46 = vadd.f32 1.0, %v1495_v43 }
 0x4b9   : > { %v1147_v47 = vmul.f32 %v1493_v39, %v1146_v44 }
 0x4ba   : > { %v1497_v49 = vpop.eup %1496  ;;  %1498 = vrcp.f32 %v1125_v46  ;;  %v1140_v4 = vand.u32 2147483648, %v1125_v46  ;;  %v1138_v9 = vand.u32 2147483647, %v1125_v46  ;;  %vm1134_vm6 = vweird.f32 %v1125_v46 }
 0x4bb   : > { %v1148_v50 = vadd.f32 %v1493_v39, %v1147_v47  ;;  %v1160_v51 = vmul.f32 %v1497_v49, %v1127_v36  ;;  %vm1165_vm13 = vweird.f32 %v1497_v49  ;;  %v1501_v36 = vld [vmem:[%s1591_s22 + $0x8] sm:$0xff] }
 0x4bc   : > { %vm1166_vm15 = vmor %vm1164_vm14, %vm1165_vm13  ;;  %v1141_v11 = vor.u32 1.1754944e-38, %v1140_v4  ;;  %vm1139_vm8 = vcmp.eq.f32.partialorder %v1138_v9, 8.507059e+37 }
 0x4bd   : > { %v1152_v53 = vsel %vm1151_vm11, %v1493_v39, %v1148_v50  ;;  %v1161_v54 = vsub.f32 1.0, %v1160_v51 }
 0x4be   : > { %v1157_v55 = vsel %vm1154_vm12, %v1156_v52, %v1152_v53 }
 0x4bf   : > { %v1190_v57 = vmul.f32 %v1157_v55, %v1805_v12  ;;  %v1162_v6 = vmul.f32 %v1497_v49, %v1161_v54 }
 0x4c0   : > { %v1499_v59 = vpop.eup %1498 }
 0x4c1   : > { %1223 = vrot.lane.b32.xlu2 %v1190_v57, %s1513_s13  ;;  %v1163_v60 = vadd.f32 %v1497_v49, %v1162_v6  ;;  %v1130_v61 = vmul.f32 %v1499_v59, %v1125_v46  ;;  %vm1135_vm1 = vweird.f32 %v1499_v59  ;;  %v1503_v46 = vld [vmem:[%s1591_s22 + $0x18] sm:$0xff] }
 0x4c2   : > { %vm1136_vm7 = vmor %vm1134_vm6, %vm1135_vm1 }
 0x4c3   : > { %v1167_v63 = vsel %vm1166_vm15, %v1497_v49, %v1163_v60  ;;  %v1131_v1 = vsub.f32 1.0, %v1130_v61 }
 0x4c4   : > { %v1172_v3 = vsel %vm1169_vm3, %v1171_v62, %v1167_v63 }
 0x4c5   : > { %v1191_v5 = vmul.f32 %v1172_v3, %v1809_v19  ;;  %v1132_v8 = vmul.f32 %v1499_v59, %v1131_v1 }
 0x4c7   : > { %1225 = vrot.lane.b32.xlu0 %v1191_v5, %s1513_s13  ;;  %v1133_v10 = vadd.f32 %v1499_v59, %v1132_v8 }
 0x4c9   : > { %1209 = vrot.lane.b32.xlu2 %v1191_v5, %s1514_s14  ;;  %v1137_v12 = vsel %vm1136_vm7, %v1499_v59, %v1133_v10 }
 0x4ca   : > { %v1142_v23 = vsel %vm1139_vm8, %v1141_v11, %v1137_v12 }
 0x4cb   : > { %v1189_v13 = vmul.f32 %v1142_v23, %v1812_v29 }
 0x4cd   : > { %1221 = vrot.lane.b32.xlu1 %v1189_v13, %s1513_s13 }
 0x4cf   : > { %1211 = vrot.lane.b32.xlu0 %v1815_v42, %s1514_s14 }
 0x4d1   : > { %1239 = vperm.xlu2 %1451, %v1197_v14  }
 0x4d5   : > { %1207 = vrot.lane.b32.xlu1 %v1190_v57, %s1514_s14 }
 0x4d7   : > { %1205 = vrot.lane.b32.xlu0 %v1189_v13, %s1514_s14 }
 0x4d9   : > { %1254 = vperm.xlu2 %1451, %v1200_v15  }
 0x4dd   : > { %1244 = vperm.xlu1 %1449, %v1198_v16  }
 0x4df   : > { %1249 = vperm.xlu0 %1450, %v1199_v0  }
 0x51b   : > { %v1224_v20 = vpop.permute.xlu2 %1223 }
 0x523   : > { %v1210_v18 = vpop.permute.xlu2 %1209 }
 0x529   : > { %v1228_v17 = vpop.permute.xlu1 %1227 }
 0x52a   : > { %1410 = vmatpush.msk.msrb.mxu1 %vm780_vm2, %v1228_v17 }
 0x52b   : > { %v1240_v29 = vpop.permute.xlu2 %1239 }
 0x533   : > { %v1255_v43 = vpop.permute.xlu2 %1254 }
 0x539   : > { %v1226_v19 = vpop.permute.xlu0 %1225 }
 0x53a   : > { %1411 = vmatpush.msk.msrb.mxu1 %vm780_vm2, %v1226_v19 }
 0x53c   : > { %1412 = vmatpush.msk.msrb.mxu1 %vm780_vm2, %v1224_v20 }
 0x53f   : > { %v1222_v21 = vpop.permute.xlu1 %1221 }
 0x540   : > { %1413 = vmatpush.msk.msrb.mxu1 %vm780_vm2, %v1222_v21 }
 0x541   : > { %v1212_v22 = vpop.permute.xlu0 %1211 }
 0x542   : > { %1277 = vmatpush.msrb.mxu1 %v1815_v42 }
 0x544   : > { %1278 = vmatpush.msrb.mxu1 %v1191_v5 }
 0x546   : > { %1279 = vmatpush.msrb.mxu1 %v1190_v57 }
 0x547   : > { %v1208_v24 = vpop.permute.xlu1 %1207 }
 0x548   : > { %1280 = vmatpush.msrb.mxu1 %v1189_v13 }
 0x549   : > { %v1206_v25 = vpop.permute.xlu0 %1205 }
 0x54a   : > { %1415 = vmatpush.msk.msrb.mxu1 %vm1702_vm4, %v1212_v22 }
 0x54c   : > { %1417 = vmatpush.msk.msrb.mxu1 %vm1702_vm4, %v1210_v18 }
 0x54e   : > { %1419 = vmatpush.msk.msrb.mxu1 %vm1702_vm4, %v1208_v24 }
 0x54f   : > { %v1245_v33 = vpop.permute.xlu1 %1244 }
 0x550   : > { %1421 = vmatpush.msk.msrb.mxu1 %vm1702_vm4, %v1206_v25 }
 0x551   : > { %1422 = vmatmul.msk.f32.vlgmr.msrb.gmra.mxu1 %vm805_vm5, %v1193_v7  ;;  %v1250_v38 = vpop.permute.xlu0 %1249 }
 0x559   : > { %1423 = vmatmul.msk.f32.gmra.mxu1 %vm805_vm5, %v1194_v26 }
 0x561   : > { %1424 = vmatmul.msk.f32.gmra.mxu1 %vm805_vm5, %v1195_v28 }
 0x569   : > { %1425 = vmatmul.msk.f32.gmra.mxu1 %vm805_vm5, %v1196_v2 }
 0x5ce   : > { %v1286_v30 = vpop.f32.mrf.mxu1 }
 0x5cf   : > { %v1287_v31 = vadd.f32 %v1286_v30, %v1240_v29 }
 0x5d1   : > { %v1298_v32 = vadd.f32 %v1500_v27, %v1287_v31 }
 0x5d3   : > { %1302 = vst.msk [vmem:[%s386_s23] sm:$0xff] %vm403_vm0, %v1298_v32 }
 0x5d6   : > { %v1289_v34 = vpop.f32.mrf.mxu1 }
 0x5d7   : > { %v1290_v35 = vadd.f32 %v1289_v34, %v1245_v33 }
 0x5d9   : > { %v1299_v37 = vadd.f32 %v1501_v36, %v1290_v35 }
 0x5db   : > { %1303 = vst.msk [vmem:[%s386_s23 + $0x8] sm:$0xff] %vm403_vm0, %v1299_v37 }
 0x5de   : > { %v1292_v39 = vpop.f32.mrf.mxu1 }
 0x5df   : > { %v1293_v40 = vadd.f32 %v1292_v39, %v1250_v38 }
 0x5e1   : > { %v1300_v42 = vadd.f32 %v1502_v41, %v1293_v40 }
 0x5e3   : > { %1304 = vst.msk [vmem:[%s386_s23 + $0x10] sm:$0xff] %vm403_vm0, %v1300_v42 }
 0x5e6   : > { %v1295_v44 = vpop.f32.mrf.mxu1 }
 0x5e7   : > { %v1296_v45 = vadd.f32 %v1295_v44, %v1255_v43 }
 0x5e9   : > { %v1301_v47 = vadd.f32 %v1503_v46, %v1296_v45 }
 0x5eb   : > { %1305 = vst.msk [vmem:[%s386_s23 + $0x18] sm:$0xff] %vm403_vm0, %v1301_v47 }
 0x5ec PF: > { %s21_s17 = sadd.s32 1, %s1510_s17  }
 0x5ed   : > { %p18_p4 = scmp.ge.s32.totalorder %s21_s17, 4  }
 0x5ef   :  { %20 = sbr.rel (!%p18_p4) target bundleno = 1 (0x1), region = 94 }

// kernel: _lambda_.18
= control target key start
LH: loop header
LB: loop body
LE: loop exit
PB: predicated region body
PF: predicated region fallthrough
CT: control target
= control target key end

     0   :  { %s1421_s25 = smov 0   ;;  %s1635_s0 = inlined_call_operand.vmem [shape: f32[2,32,32], index: 0, kind: input, shape index: {}]   ;;  %s1636_s1 = inlined_call_operand.vmem [shape: f32[32,32], index: 1, kind: input, shape index: {}]   ;;  %s1637_s2 = inlined_call_operand.vmem [shape: f32[32,1], index: 2, kind: input, shape index: {}]   ;;  %s1638_s3 = inlined_call_operand.vmem [shape: f32[32,1], index: 3, kind: input, shape index: {}]   ;;  %s1639_s4 = inlined_call_operand.vmem [shape: f32[16,96], index: 4, kind: input, shape index: {}]   ;;  %s1640_s5 = inlined_call_operand.vmem [shape: f32[16,1], index: 5, kind: input, shape index: {}]   ;;  %s1641_s6 = inlined_call_operand.vmem [shape: f32[16,16], index: 6, kind: input, shape index: {}]   ;;  %s1642_s7 = inlined_call_operand.vmem [shape: f32[16,1], index: 7, kind: input, shape index: {}]   ;;  %s1643_s8 = inlined_call_operand.vmem [shape: f32[16,1], index: 8, kind: input, shape index: {}]   ;;  %s1644_s9 = inlined_call_operand.vmem [shape: f32[16,48], index: 9, kind: input, shape index: {}]   ;;  %s1645_s10 = inlined_call_operand.vmem [shape: f32[16,1], index: 10, kind: input, shape index: {}]   ;;  %s1646_s11 = inlined_call_operand.vmem [shape: f32[16,32], index: 11, kind: input, shape index: {}]   ;;  %s1647_s12 = inlined_call_operand.vmem [shape: f32[16,1], index: 12, kind: input, shape index: {}]   ;;  %s1648_s13 = inlined_call_operand.vmem [shape: f32[2,16,32], index: 13, kind: output, shape index: {}]  }
   0x1 LB: > { %s1229_s26 = sadd.s32 4294967295, %s1346_s25   ;;  %p1233_p0 = scmp.ge.s32.totalorder %s1346_s25, 1  ;;  %s1346_s25 = sphi %s1421_s25, %s23_s25  }
   0x2   : > { %p387_p1 = scmp.lt.s32.totalorder %s1346_s25, 3 }
   0x4   : > { %p388_p2 = pnand %p1233_p0, %p387_p1 }
   0x5   : > { %p431_p3 = scmp.lt.s32.totalorder (!%p388_p2), %s1229_s26, 1  ;;  %s1349_s23 = smov (!%p388_p2), 127  }
   0x6   : > { %391 = sbr.rel (%p388_p2) target bundleno = 1463 (0x5b7), region = 72  ;;  %s1350_s24 = smov (!%p388_p2), 1  }
   0xb   : > { %s1652_s26 = smov (!%p431_p3, %s1229_s26), 1  ;;  %vm457_vm0 = vcmask 261120   ;;  %v448_v21 = vld [vmem:[%s1636_s1 + $0x18] sm:$0xff]  ;;  %v445_v22 = vld [vmem:[%s1636_s1] sm:$0xff]  ;;  %v1348_v25 = vmov 0   ;;  %v446_v28 = vld [vmem:[%s1636_s1 + $0x8] sm:$0xff] }
   0xc   : > { %s1282_s27 = sshll.u32 %s1652_s26, 5  ;;  %v456_v24 = vld [vmem:[%s1638_s3 + $0x18] sm:$0xff]  ;;  %1303 = vset.pattern.permute.xlu2 %v1348_v25  ;;  %1302 = vset.pattern.permute.xlu0 %v1348_v25  ;;  %v455_v29 = vld [vmem:[%s1638_s3 + $0x10] sm:$0xff]  ;;  %v450_v32 = vld [vmem:[%s1637_s2 + $0x8] sm:$0xff]  ;;  %s1283_s18 = sshll.u32 %s1652_s26, 4 }
   0xd   : > { %s435_s30 = scalar_lea.vmem %s1635_s0, %s1282_s27  ;;  %1301 = vset.pattern.permute.xlu1 %v1348_v25  ;;  %v447_v30 = vld [vmem:[%s1636_s1 + $0x10] sm:$0xff]  ;;  %v452_v33 = vld [vmem:[%s1637_s2 + $0x18] sm:$0xff]  ;;  %v454_v57 = vld [vmem:[%s1638_s3 + $0x8] sm:$0xff]  ;;  %s440_s21 = scalar_lea.vmem %s1648_s13, %s1283_s18 }
   0xe   : > { %v1435_v0 = vld [vmem:[%s435_s30 + $0x18] sm:$0xff]  ;;  %v1437_v1 = vld [vmem:[%s435_s30 + $0x8] sm:$0xff]  ;;  %v1446_v6 = vld [vmem:[%s435_s30 + $0x10] sm:$0xff] }
   0xf   : > { %v467_v2 = vsel %vm457_vm0, %v1435_v0, 0.0  ;;  %v461_v3 = vsel %vm457_vm0, %v1437_v1, 0.0  ;;  %v473_v4 = vmul.f32 %v1435_v0, %v1435_v0  ;;  %v1448_v7 = vld [vmem:[%s435_s30] sm:$0xff]  ;;  %v472_v8 = vmul.f32 %v1446_v6, %v1446_v6  ;;  %v451_v31 = vld [vmem:[%s1637_s2 + $0x10] sm:$0xff] }
  0x10   : > { %468 = vadd.xlane.f32.xlu0 %v467_v2  ;;  %462 = vadd.xlane.f32.xlu1 %v461_v3  ;;  %v464_v9 = vsel %vm457_vm0, %v1446_v6, 0.0  ;;  %v458_v10 = vsel %vm457_vm0, %v1448_v7, 0.0  ;;  %v471_v12 = vmul.f32 %v1437_v1, %v1437_v1  ;;  %v470_v13 = vmul.f32 %v1448_v7, %v1448_v7 }
  0x11   : > { %v483_v5 = vsel %vm457_vm0, %v473_v4, 0.0  ;;  %v480_v11 = vsel %vm457_vm0, %v472_v8, 0.0 }
  0x12   : > { %484 = vadd.xlane.f32.xlu2 %v483_v5  ;;  %v477_v14 = vsel %vm457_vm0, %v471_v12, 0.0  ;;  %v474_v15 = vsel %vm457_vm0, %v470_v13, 0.0 }
  0x18   : > { %465 = vadd.xlane.f32.xlu0 %v464_v9  ;;  %459 = vadd.xlane.f32.xlu1 %v458_v10 }
  0x1a   : > { %481 = vadd.xlane.f32.xlu2 %v480_v11 }
  0x20   : > { %478 = vadd.xlane.f32.xlu0 %v477_v14  ;;  %475 = vadd.xlane.f32.xlu1 %v474_v15 }
  0x32   : > { %705 = vperm.xlu2 %1303, %v456_v24  }
  0x34   : > { %676 = vperm.xlu0 %1302, %v451_v31  }
  0x39   : > { %681 = vperm.xlu1 %1301, %v452_v33  }
  0x3a   : > { %700 = vperm.xlu2 %1303, %v455_v29   ;;  %v453_v29 = vld [vmem:[%s1638_s3] sm:$0xff] }
  0x3c   : > { %671 = vperm.xlu0 %1302, %v450_v32   ;;  %v449_v32 = vld [vmem:[%s1637_s2] sm:$0xff] }
  0x83   : > { %v469_v16 = vpop.xlane.xlu0 %468  ;;  %v463_v17 = vpop.xlane.xlu1 %462 }
  0x84   : > { %510 = vmatpush.msra.mxu0 %v469_v16  ;;  %1284 = vmatpush.msra.mxu1 %v469_v16 }
  0x85   : > { %v485_v18 = vpop.xlane.xlu2 %484 }
  0x8b   : > { %v466_v19 = vpop.xlane.xlu0 %465  ;;  %v460_v20 = vpop.xlane.xlu1 %459 }
  0x8c   : > { %511 = vmatpush.msra.mxu0 %v466_v19  ;;  %1285 = vmatpush.msra.mxu1 %v466_v19 }
  0x8d   : > { %v482_v23 = vpop.xlane.xlu2 %481 }
  0x8e   : > { %512 = vmatpush.msra.mxu0 %v463_v17  ;;  %1286 = vmatpush.msra.mxu1 %v463_v17 }
  0x90   : > { %513 = vmatpush.msra.mxu0 %v460_v20  ;;  %1287 = vmatpush.msra.mxu1 %v460_v20 }
  0x91   : > { %1241 = vmatmul.msk.f32.vlgmr.msra.gmra.mxu1 %vm457_vm0, %v448_v21  ;;  %1238 = vmatmul.msk.f32.vlgmr.msra.gmra.mxu0 %vm457_vm0, %v445_v22 }
  0x92   : > { %539 = vmatpush.msrb.mxu1 %v485_v18  ;;  %1159 = vmatpush.msrb.mxu0 %v1435_v0 }
  0x93   : > { %v479_v26 = vpop.xlane.xlu0 %478  ;;  %v476_v27 = vpop.xlane.xlu1 %475 }
  0x94   : > { %540 = vmatpush.msrb.mxu1 %v482_v23  ;;  %1160 = vmatpush.msrb.mxu0 %v1446_v6 }
  0x95   : > { %v706_v33 = vpop.permute.xlu2 %705 }
  0x96   : > { %541 = vmatpush.msrb.mxu1 %v479_v26  ;;  %1161 = vmatpush.msrb.mxu0 %v1437_v1 }
  0x98   : > { %542 = vmatpush.msrb.mxu1 %v476_v27  ;;  %1162 = vmatpush.msrb.mxu0 %v1448_v7 }
  0x99   : > { %1242 = vmatmul.msk.f32.vlgmr.msrb.gmra.mxu1 %vm457_vm0, %v445_v22  ;;  %1239 = vmatmul.msk.f32.gmra.mxu0 %vm457_vm0, %v446_v28 }
  0xa1   : > { %1243 = vmatmul.msk.f32.gmra.mxu1 %vm457_vm0, %v446_v28  ;;  %1240 = vmatmul.msk.f32.gmra.mxu0 %vm457_vm0, %v447_v30 }
  0xa9   : > { %1244 = vmatmul.msk.f32.gmra.mxu1 %vm457_vm0, %v447_v30 }
  0xb1   : > { %1245 = vmatmul.msk.f32.gmra.mxu1 %vm457_vm0, %v448_v21 }
 0x10e   : > { %v524_v34 = vpop.f32.mrf.mxu1  ;;  %v515_v35 = vpop.f32.mrf.mxu0 }
 0x10f   : > { %v559_v36 = vmul.f32 0.00390625, %v524_v34  ;;  %v556_v37 = vmul.f32 0.00390625, %v515_v35  ;;  %v701_v34 = vpop.permute.xlu2 %700 }
 0x111   : > { %633 = vperm.xlu2 %1303, %v559_v36   ;;  %v564_v38 = vmul.f32 %v556_v37, %v556_v37  ;;  %v567_v9 = vmul.f32 %v559_v36, %v559_v36  ;;  %v677_v36 = vpop.permute.xlu0 %676 }
 0x116   : > { %v544_v39 = vpop.f32.mrf.mxu1  ;;  %v518_v40 = vpop.f32.mrf.mxu0 }
 0x117   : > { %v560_v41 = vmul.f32 0.00390625, %v544_v39  ;;  %v557_v43 = vmul.f32 0.00390625, %v518_v40 }
 0x119   : > { %v568_v42 = vsub.f32 %v560_v41, %v564_v38  ;;  %618 = vperm.xlu2 %1303, %v556_v37   ;;  %v565_v45 = vmul.f32 %v557_v43, %v557_v43  ;;  %v672_v38 = vpop.permute.xlu0 %671 }
 0x11b   : > { %v572_v44 = vadd.f32 1e-06, %v568_v42  ;;  %v682_v42 = vpop.permute.xlu1 %681 }
 0x11d   : > { %1304 = vrsqrt.f32 %v572_v44  ;;  %vm582_vm2 = vweird.f32 %v572_v44 }
 0x11e   : > { %v547_v46 = vpop.f32.mrf.mxu1  ;;  %v521_v47 = vpop.f32.mrf.mxu0 }
 0x11f   : > { %v561_v48 = vmul.f32 0.00390625, %v547_v46  ;;  %v558_v49 = vmul.f32 0.00390625, %v521_v47 }
 0x121   : > { %v569_v50 = vsub.f32 %v561_v48, %v565_v45  ;;  %628 = vperm.xlu0 %1302, %v558_v49   ;;  %623 = vperm.xlu2 %1303, %v557_v43   ;;  %v566_v54 = vmul.f32 %v558_v49, %v558_v49 }
 0x123   : > { %v1305_v51 = vpop.eup %1304  ;;  %v573_v52 = vadd.f32 1e-06, %v569_v50 }
 0x124   : > { %v577_v53 = vmul.f32 %v1305_v51, %v572_v44  ;;  %vm583_vm1 = vweird.f32 %v1305_v51 }
 0x125   : > { %1306 = vrsqrt.f32 %v573_v52  ;;  %vm584_vm3 = vmor %vm582_vm2, %vm583_vm1  ;;  %vm592_vm5 = vweird.f32 %v573_v52 }
 0x126   : > { %v550_v55 = vpop.f32.mrf.mxu1  ;;  %v578_v56 = vmul.f32 %v1305_v51, %v577_v53 }
 0x127   : > { %v562_v58 = vmul.f32 0.00390625, %v550_v55 }
 0x128   : > { %v579_v59 = vmul.f32 0.5, %v578_v56 }
 0x129   : > { %v570_v60 = vsub.f32 %v562_v58, %v566_v54  ;;  %695 = vperm.xlu0 %1302, %v454_v57  }
 0x12a   : > { %v580_v61 = vsub.f32 1.5, %v579_v59 }
 0x12b   : > { %v1307_v62 = vpop.eup %1306  ;;  %v574_v63 = vadd.f32 1e-06, %v570_v60 }
 0x12c   : > { %v587_v2 = vmul.f32 %v1307_v62, %v573_v52  ;;  %v581_v3 = vmul.f32 %v1305_v51, %v580_v61  ;;  %vm593_vm4 = vweird.f32 %v1307_v62 }
 0x12d   : > { %1308 = vrsqrt.f32 %v574_v63  ;;  %vm594_vm6 = vmor %vm592_vm5, %vm593_vm4  ;;  %vm602_vm8 = vweird.f32 %v574_v63 }
 0x12e   : > { %v553_v4 = vpop.f32.mrf.mxu1  ;;  %v585_v5 = vsel %vm584_vm3, %v1305_v51, %v581_v3  ;;  %v588_v8 = vmul.f32 %v1307_v62, %v587_v2 }
 0x12f   : > { %v563_v10 = vmul.f32 0.00390625, %v553_v4  ;;  %642 = vperm.xlu1 %1301, %v585_v5  }
 0x130   : > { %v589_v11 = vmul.f32 0.5, %v588_v8 }
 0x131   : > { %v571_v12 = vsub.f32 %v563_v10, %v567_v9 }
 0x132   : > { %v590_v13 = vsub.f32 1.5, %v589_v11 }
 0x133   : > { %v1309_v14 = vpop.eup %1308  ;;  %v575_v15 = vadd.f32 1e-06, %v571_v12 }
 0x134   : > { %v597_v16 = vmul.f32 %v1309_v14, %v574_v63  ;;  %v591_v17 = vmul.f32 %v1307_v62, %v590_v13  ;;  %vm603_vm7 = vweird.f32 %v1309_v14 }
 0x135   : > { %1310 = vrsqrt.f32 %v575_v15  ;;  %vm604_vm9 = vmor %vm602_vm8, %vm603_vm7  ;;  %vm612_vm11 = vweird.f32 %v575_v15 }
 0x136   : > { %v595_v18 = vsel %vm594_vm6, %v1307_v62, %v591_v17  ;;  %v598_v19 = vmul.f32 %v1309_v14, %v597_v16 }
 0x137   : > { %647 = vperm.xlu1 %1301, %v595_v18  }
 0x138   : > { %v599_v20 = vmul.f32 0.5, %v598_v19 }
 0x13a   : > { %v600_v21 = vsub.f32 1.5, %v599_v20 }
 0x13b   : > { %v1311_v22 = vpop.eup %1310 }
 0x13c   : > { %v607_v23 = vmul.f32 %v1311_v22, %v575_v15  ;;  %v601_v24 = vmul.f32 %v1309_v14, %v600_v21  ;;  %vm613_vm10 = vweird.f32 %v1311_v22 }
 0x13d   : > { %vm614_vm12 = vmor %vm612_vm11, %vm613_vm10 }
 0x13e   : > { %v608_v25 = vmul.f32 %v1311_v22, %v607_v23  ;;  %v605_v26 = vsel %vm604_vm9, %v1309_v14, %v601_v24 }
 0x13f   : > { %652 = vperm.xlu2 %1303, %v605_v26  }
 0x140   : > { %v609_v27 = vmul.f32 0.5, %v608_v25 }
 0x142   : > { %v610_v28 = vsub.f32 1.5, %v609_v27 }
 0x144   : > { %v611_v30 = vmul.f32 %v1311_v22, %v610_v28 }
 0x146   : > { %v615_v31 = vsel %vm614_vm12, %v1311_v22, %v611_v30 }
 0x147   : > { %690 = vperm.xlu2 %1303, %v453_v29   ;;  %657 = vperm.xlu1 %1301, %v615_v31  }
 0x14f   : > { %666 = vperm.xlu1 %1301, %v449_v32  }
 0x16b   : > { %v634_v35 = vpop.permute.xlu2 %633 }
 0x16c   : > { %v639_v2 = vsub.f32 %v1435_v0, %v634_v35 }
 0x173   : > { %v619_v37 = vpop.permute.xlu2 %618 }
 0x174   : > { %v636_v13 = vsub.f32 %v1448_v7, %v619_v37 }
 0x17b   : > { %v624_v39 = vpop.permute.xlu2 %623 }
 0x17c   : > { %v637_v50 = vsub.f32 %v1437_v1, %v624_v39 }
 0x193   : > { %v629_v40 = vpop.permute.xlu0 %628 }
 0x194   : > { %v638_v41 = vsub.f32 %v1446_v6, %v629_v40 }
 0x199   : > { %v653_v43 = vpop.permute.xlu2 %652 }
 0x19a   : > { %v662_v44 = vmul.f32 %v653_v43, %v638_v41 }
 0x19b   : > { %v696_v55 = vpop.permute.xlu0 %695 }
 0x19c   : > { %v686_v45 = vmul.f32 %v677_v36, %v662_v44 }
 0x19e   : > { %v710_v46 = vadd.f32 %v701_v34, %v686_v45 }
 0x1a0   : > { %v1248_v47 = vmul.f32 -1.442695, %v710_v46 }
 0x1a1   : > { %v643_v48 = vpop.permute.xlu1 %642  ;;  %v691_v20 = vpop.permute.xlu2 %690 }
 0x1a2   : > { %1312 = vpow2.f32 %v1248_v47  ;;  %v660_v0 = vmul.f32 %v643_v48, %v636_v13  ;;  %v795_v47 = vld [vmem:[%s1640_s5 + $0x8] sm:$0xff] }
 0x1a8   : > { %v1313_v49 = vpop.eup %1312 }
 0x1a9   : > { %v726_v51 = vadd.f32 1.0, %v1313_v49  ;;  %v648_v52 = vpop.permute.xlu1 %647 }
 0x1aa   : > { %v661_v53 = vmul.f32 %v648_v52, %v637_v50 }
 0x1ab   : > { %1314 = vrcp.f32 %v726_v51  ;;  %v769_v61 = vand.u32 2147483648, %v726_v51  ;;  %v767_v62 = vand.u32 2147483647, %v726_v51  ;;  %vm763_vm14 = vweird.f32 %v726_v51 }
 0x1ac   : > { %v685_v54 = vmul.f32 %v672_v38, %v661_v53 }
 0x1ad   : > { %v770_v9 = vor.u32 1.1754944e-38, %v769_v61  ;;  %vm768_vm1 = vcmp.eq.f32.partialorder %v767_v62, 8.507059e+37 }
 0x1ae   : > { %v709_v56 = vadd.f32 %v696_v55, %v685_v54 }
 0x1b0   : > { %v1247_v57 = vmul.f32 -1.442695, %v709_v56 }
 0x1b1   : > { %v1315_v6 = vpop.eup %1314 }
 0x1b2   : > { %1316 = vpow2.f32 %v1247_v57  ;;  %v759_v58 = vmul.f32 %v1315_v6, %v726_v51  ;;  %vm764_vm13 = vweird.f32 %v1315_v6 }
 0x1b3   : > { %vm765_vm15 = vmor %vm763_vm14, %vm764_vm13  ;;  %vm829_vm14 = vcmask 252928  }
 0x1b4   : > { %v760_v59 = vsub.f32 1.0, %v759_v58 }
 0x1b6   : > { %v761_v60 = vmul.f32 %v1315_v6, %v760_v59 }
 0x1b8   : > { %v1317_v63 = vpop.eup %1316  ;;  %v762_v1 = vadd.f32 %v1315_v6, %v761_v60 }
 0x1b9   : > { %v725_v3 = vadd.f32 1.0, %v1317_v63  ;;  %v658_v4 = vpop.permute.xlu1 %657 }
 0x1ba   : > { %v663_v5 = vmul.f32 %v658_v4, %v639_v2  ;;  %v766_v8 = vsel %vm765_vm15, %v1315_v6, %v762_v1  ;;  %v794_v6 = vld [vmem:[%s1640_s5] sm:$0xff]  ;;  %vm812_vm15 = vcmask 7168  }
 0x1bb   : > { %1318 = vrcp.f32 %v725_v3  ;;  %v771_v11 = vsel %vm768_vm1, %v770_v9, %v766_v8  ;;  %v754_v23 = vand.u32 2147483648, %v725_v3  ;;  %v752_v25 = vand.u32 2147483647, %v725_v3  ;;  %vm1538_vm1 = vmneg %vm812_vm15 }
 0x1bc   : > { %v687_v10 = vmul.f32 %v682_v42, %v663_v5  ;;  %v1514_v12 = vmul.f32 %v771_v11, %v710_v46  ;;  %vm748_vm3 = vweird.f32 %v725_v3  ;;  %v793_v5 = vld [vmem:[%s1639_s4 + $0x8] sm:$0xff] }
 0x1bd   : > { %v755_v28 = vor.u32 1.1754944e-38, %v754_v23  ;;  %vm753_vm5 = vcmp.eq.f32.partialorder %v752_v25, 8.507059e+37  ;;  %v875_v23 = vld [vmem:[%s1641_s6 + $0x8] sm:$0xff] }
 0x1be   : > { %v711_v14 = vadd.f32 %v706_v33, %v687_v10  ;;  %821 = vrot.lane.b32.xlu0 %v1514_v12, %s1349_s23 }
 0x1c0   : > { %v1249_v15 = vmul.f32 -1.442695, %v711_v14 }
 0x1c1   : > { %v1319_v16 = vpop.eup %1318  ;;  %v667_v17 = vpop.permute.xlu1 %666 }
 0x1c2   : > { %v744_v18 = vmul.f32 %v1319_v16, %v725_v3  ;;  %1320 = vpow2.f32 %v1249_v15  ;;  %v684_v19 = vmul.f32 %v667_v17, %v660_v0  ;;  %vm749_vm2 = vweird.f32 %v1319_v16  ;;  %v792_v3 = vld [vmem:[%s1639_s4] sm:$0xff] }
 0x1c3   : > { %vm750_vm4 = vmor %vm748_vm3, %vm749_vm2  ;;  %vm844_vm2 = vcmask 785408   ;;  %vm894_vm3 = vcmask 130048  }
 0x1c4   : > { %v745_v21 = vsub.f32 1.0, %v744_v18  ;;  %v708_v22 = vadd.f32 %v691_v20, %v684_v19  ;;  %v877_v19 = vld [vmem:[%s1642_s7 + $0x8] sm:$0xff] }
 0x1c6   : > { %v746_v24 = vmul.f32 %v1319_v16, %v745_v21  ;;  %v1246_v7 = vmul.f32 -1.442695, %v708_v22 }
 0x1c8   : > { %v1321_v26 = vpop.eup %1320  ;;  %v747_v27 = vadd.f32 %v1319_v16, %v746_v24  ;;  %1322 = vpow2.f32 %v1246_v7 }
 0x1c9   : > { %v727_v29 = vadd.f32 1.0, %v1321_v26 }
 0x1ca   : > { %v751_v30 = vsel %vm750_vm4, %v1319_v16, %v747_v27 }
 0x1cb   : > { %v756_v31 = vsel %vm753_vm5, %v755_v28, %v751_v30  ;;  %1324 = vrcp.f32 %v727_v29  ;;  %v784_v38 = vand.u32 2147483648, %v727_v29  ;;  %v782_v40 = vand.u32 2147483647, %v727_v29 }
 0x1cc   : > { %v789_v32 = vmul.f32 %v756_v31, %v709_v56  ;;  %vm778_vm7 = vweird.f32 %v727_v29  ;;  %v878_v31 = vld [vmem:[%s1643_s8] sm:$0xff] }
 0x1cd   : > { %v785_v44 = vor.u32 1.1754944e-38, %v784_v38  ;;  %vm783_vm9 = vcmp.eq.f32.partialorder %v782_v40, 8.507059e+37 }
 0x1ce   : > { %v1323_v33 = vpop.eup %1322  ;;  %819 = vrot.lane.b32.xlu2 %v789_v32, %s1349_s23 }
 0x1cf   : > { %v724_v34 = vadd.f32 1.0, %v1323_v33 }
 0x1d1   : > { %v1325_v35 = vpop.eup %1324  ;;  %1326 = vrcp.f32 %v724_v34  ;;  %v739_v49 = vand.u32 2147483648, %v724_v34  ;;  %v737_v52 = vand.u32 2147483647, %v724_v34  ;;  %vm733_vm11 = vweird.f32 %v724_v34 }
 0x1d2   : > { %v774_v36 = vmul.f32 %v1325_v35, %v727_v29  ;;  %vm779_vm6 = vweird.f32 %v1325_v35 }
 0x1d3   : > { %vm780_vm8 = vmor %vm778_vm7, %vm779_vm6  ;;  %v740_v54 = vor.u32 1.1754944e-38, %v739_v49  ;;  %vm738_vm13 = vcmp.eq.f32.partialorder %v737_v52, 8.507059e+37  ;;  %v876_v52 = vld [vmem:[%s1642_s7] sm:$0xff] }
 0x1d4   : > { %v775_v37 = vsub.f32 1.0, %v774_v36 }
 0x1d6   : > { %804 = vrot.lane.b32.xlu2 %v1514_v12, %s1350_s24  ;;  %v776_v39 = vmul.f32 %v1325_v35, %v775_v37 }
 0x1d7   : > { %v1327_v41 = vpop.eup %1326 }
 0x1d8   : > { %v777_v42 = vadd.f32 %v1325_v35, %v776_v39  ;;  %v729_v43 = vmul.f32 %v1327_v41, %v724_v34  ;;  %vm734_vm10 = vweird.f32 %v1327_v41 }
 0x1d9   : > { %vm735_vm12 = vmor %vm733_vm11, %vm734_vm10 }
 0x1da   : > { %v781_v45 = vsel %vm780_vm8, %v1325_v35, %v777_v42  ;;  %v730_v46 = vsub.f32 1.0, %v729_v43 }
 0x1db   : > { %v786_v48 = vsel %vm783_vm9, %v785_v44, %v781_v45 }
 0x1dc   : > { %v791_v50 = vmul.f32 %v786_v48, %v711_v14  ;;  %v731_v51 = vmul.f32 %v1327_v41, %v730_v46 }
 0x1de   : > { %841 = vperm.xlu2 %1303, %v795_v47   ;;  %806 = vrot.lane.b32.xlu0 %v791_v50, %s1350_s24  ;;  %v732_v53 = vadd.f32 %v1327_v41, %v731_v51 }
 0x1df   : > { %823 = vrot.lane.b32.xlu1 %v791_v50, %s1349_s23 }
 0x1e0   : > { %v736_v55 = vsel %vm735_vm12, %v1327_v41, %v732_v53 }
 0x1e1   : > { %v741_v56 = vsel %vm738_vm13, %v740_v54, %v736_v55  ;;  %v879_v55 = vld [vmem:[%s1643_s8 + $0x8] sm:$0xff] }
 0x1e2   : > { %v788_v57 = vmul.f32 %v741_v56, %v708_v22  ;;  %v874_v22 = vld [vmem:[%s1641_s6] sm:$0xff] }
 0x1e6   : > { %800 = vrot.lane.b32.xlu0 %v788_v57, %s1350_s24 }
 0x1e7   : > { %817 = vrot.lane.b32.xlu1 %v788_v57, %s1349_s23 }
 0x1ef   : > { %802 = vrot.lane.b32.xlu1 %v789_v32, %s1350_s24 }
 0x1f7   : > { %836 = vperm.xlu1 %1301, %v794_v6   ;;  %v1127_v6 = vld [vmem:[%s1646_s11] sm:$0xff] }
 0x1f8   : > { %1278 = vmatmul.msk.f32.vlgmr.msrb.gmra.mxu0 %vm457_vm0, %v1127_v6 }
 0x228   : > { %v820_v60 = vpop.permute.xlu2 %819 }
 0x230   : > { %v822_v59 = vpop.permute.xlu0 %821  ;;  %v805_v2 = vpop.permute.xlu2 %804 }
 0x238   : > { %v842_v13 = vpop.permute.xlu2 %841 }
 0x250   : > { %v807_v62 = vpop.permute.xlu0 %806 }
 0x251   : > { %v824_v58 = vpop.permute.xlu1 %823 }
 0x252   : > { %1250 = vmatpush.msk.msra.mxu2 %vm829_vm14, %v824_v58 }
 0x254   : > { %1251 = vmatpush.msk.msra.mxu2 %vm829_vm14, %v822_v59 }
 0x256   : > { %1252 = vmatpush.msk.msra.mxu2 %vm829_vm14, %v820_v60 }
 0x258   : > { %v801_v4 = vpop.permute.xlu0 %800 }
 0x259   : > { %v818_v61 = vpop.permute.xlu1 %817 }
 0x25a   : > { %1253 = vmatpush.msk.msra.mxu2 %vm829_vm14, %v818_v61 }
 0x25c   : > { %859 = vmatpush.msra.mxu2 %v791_v50 }
 0x25e   : > { %860 = vmatpush.msra.mxu2 %v1514_v12 }
 0x260   : > { %861 = vmatpush.msra.mxu2 %v789_v32 }
 0x261   : > { %v803_v1 = vpop.permute.xlu1 %802 }
 0x262   : > { %862 = vmatpush.msra.mxu2 %v788_v57 }
 0x264   : > { %1255 = vmatpush.msk.msra.mxu2 %vm1538_vm1, %v807_v62 }
 0x266   : > { %1257 = vmatpush.msk.msra.mxu2 %vm1538_vm1, %v805_v2  ;;  %v1128_v2 = vld [vmem:[%s1646_s11 + $0x8] sm:$0xff] }
 0x267   : > { %1279 = vmatmul.msk.f32.gmra.mxu0 %vm457_vm0, %v1128_v2 }
 0x268   : > { %1259 = vmatpush.msk.msra.mxu2 %vm1538_vm1, %v803_v1 }
 0x269   : > { %v837_v8 = vpop.permute.xlu1 %836 }
 0x26a   : > { %1261 = vmatpush.msk.msra.mxu2 %vm1538_vm1, %v801_v4 }
 0x26b   : > { %1262 = vmatmul.msk.f32.vlgmr.msra.gmra.mxu2 %vm844_vm2, %v792_v3 }
 0x273   : > { %1263 = vmatmul.msk.f32.gmra.mxu2 %vm844_vm2, %v793_v5 }
 0x2ee   : > { %v868_v9 = vpop.f32.mrf.mxu2 }
 0x2ef   : > { %v1556_v10 = vadd.f32 %v868_v9, %v837_v8 }
 0x2f1   : > { %v880_v11 = vsel %vm457_vm0, %v1556_v10, 0.0  ;;  %v886_v12 = vmul.f32 %v1556_v10, %v1556_v10 }
 0x2f2   : > { %881 = vadd.xlane.f32.xlu2 %v880_v11 }
 0x2f3   : > { %v888_v16 = vsel %vm457_vm0, %v886_v12, 0.0 }
 0x2f6   : > { %v871_v14 = vpop.f32.mrf.mxu2 }
 0x2f7   : > { %v1562_v0 = vadd.f32 %v871_v14, %v842_v13 }
 0x2f9   : > { %v883_v15 = vsel %vm457_vm0, %v1562_v0, 0.0  ;;  %v887_v17 = vmul.f32 %v1562_v0, %v1562_v0 }
 0x2fa   : > { %884 = vadd.xlane.f32.xlu0 %v883_v15  ;;  %889 = vadd.xlane.f32.xlu2 %v888_v16 }
 0x2fb   : > { %v891_v18 = vsel %vm457_vm0, %v887_v17, 0.0 }
 0x2fc   : > { %892 = vadd.xlane.f32.xlu1 %v891_v18 }
 0x315   : > { %1008 = vperm.xlu1 %1301, %v877_v19  }
 0x365   : > { %v882_v20 = vpop.xlane.xlu2 %881 }
 0x36d   : > { %v885_v21 = vpop.xlane.xlu0 %884  ;;  %v890_v25 = vpop.xlane.xlu2 %889 }
 0x36e   : > { %915 = vmatpush.msrb.mxu2 %v885_v21  ;;  %1288 = vmatpush.msra.mxu3 %v885_v21 }
 0x36f   : > { %v893_v24 = vpop.xlane.xlu1 %892 }
 0x370   : > { %916 = vmatpush.msrb.mxu2 %v882_v20  ;;  %1289 = vmatpush.msra.mxu3 %v882_v20 }
 0x371   : > { %1264 = vmatmul.msk.f32.vlgmr.msrb.gmra.mxu2 %vm894_vm3, %v874_v22  ;;  %1265 = vmatmul.msk.f32.vlgmr.msra.gmra.mxu3 %vm894_vm3, %v875_v23 }
 0x372   : > { %938 = vmatpush.msrb.mxu3 %v893_v24 }
 0x374   : > { %939 = vmatpush.msrb.mxu3 %v890_v25 }
 0x379   : > { %1266 = vmatmul.msk.f32.vlgmr.msrb.gmra.mxu3 %vm894_vm3, %v874_v22 }
 0x381   : > { %1267 = vmatmul.msk.f32.gmra.mxu3 %vm894_vm3, %v875_v23 }
 0x387   : > { %v1009_v60 = vpop.permute.xlu1 %1008 }
 0x3f4   : > { %v918_v7 = vpop.f32.mrf.mxu2  ;;  %v921_v26 = vpop.f32.mrf.mxu3 }
 0x3f5   : > { %v947_v27 = vmul.f32 0.0078125, %v918_v7  ;;  %v948_v28 = vmul.f32 0.0078125, %v921_v26 }
 0x3f7   : > { %984 = vperm.xlu0 %1302, %v948_v28   ;;  %979 = vperm.xlu1 %1301, %v947_v27   ;;  %v951_v29 = vmul.f32 %v947_v27, %v947_v27  ;;  %v952_v36 = vmul.f32 %v948_v28, %v948_v28 }
 0x3fc   : > { %v941_v30 = vpop.f32.mrf.mxu3 }
 0x3fd   : > { %v949_v32 = vmul.f32 0.0078125, %v941_v30 }
 0x3ff   : > { %v953_v33 = vsub.f32 %v949_v32, %v951_v29  ;;  %1015 = vperm.xlu1 %1301, %v878_v31   ;;  %v1068_v29 = vld [vmem:[%s1645_s10 + $0x8] sm:$0xff] }
 0x401   : > { %v955_v34 = vadd.f32 1e-06, %v953_v33 }
 0x403   : > { %1328 = vrsqrt.f32 %v955_v34  ;;  %vm963_vm5 = vweird.f32 %v955_v34 }
 0x404   : > { %v944_v35 = vpop.f32.mrf.mxu3 }
 0x405   : > { %v950_v37 = vmul.f32 0.0078125, %v944_v35 }
 0x407   : > { %v954_v38 = vsub.f32 %v950_v37, %v952_v36 }
 0x409   : > { %v1329_v39 = vpop.eup %1328  ;;  %v956_v40 = vadd.f32 1e-06, %v954_v38 }
 0x40a   : > { %v958_v41 = vmul.f32 %v1329_v39, %v955_v34  ;;  %vm964_vm4 = vweird.f32 %v1329_v39 }
 0x40b   : > { %1330 = vrsqrt.f32 %v956_v40  ;;  %vm965_vm6 = vmor %vm963_vm5, %vm964_vm4  ;;  %vm973_vm8 = vweird.f32 %v956_v40  ;;  %vm1097_vm5 = vcmask 392192  }
 0x40c   : > { %v959_v42 = vmul.f32 %v1329_v39, %v958_v41  ;;  %v1067_v41 = vld [vmem:[%s1645_s10] sm:$0xff] }
 0x40e   : > { %v960_v43 = vmul.f32 0.5, %v959_v42  ;;  %v1130_v42 = vld [vmem:[%s1647_s12 + $0x8] sm:$0xff] }
 0x410   : > { %v961_v44 = vsub.f32 1.5, %v960_v43 }
 0x411   : > { %v1331_v45 = vpop.eup %1330 }
 0x412   : > { %v968_v46 = vmul.f32 %v1331_v45, %v956_v40  ;;  %v962_v47 = vmul.f32 %v1329_v39, %v961_v44  ;;  %vm974_vm7 = vweird.f32 %v1331_v45  ;;  %v1129_v40 = vld [vmem:[%s1647_s12] sm:$0xff] }
 0x413   : > { %vm975_vm9 = vmor %vm973_vm8, %vm974_vm7 }
 0x414   : > { %v966_v48 = vsel %vm965_vm6, %v1329_v39, %v962_v47  ;;  %v969_v49 = vmul.f32 %v1331_v45, %v968_v46  ;;  %v1065_v46 = vld [vmem:[%s1644_s9] sm:$0xff] }
 0x415   : > { %991 = vperm.xlu0 %1302, %v966_v48   ;;  %v1066_v48 = vld [vmem:[%s1644_s9 + $0x8] sm:$0xff] }
 0x416   : > { %v970_v50 = vmul.f32 0.5, %v969_v49  ;;  %v1164_v49 = vpop.f32.mrf.mxu0 }
 0x418   : > { %v971_v51 = vsub.f32 1.5, %v970_v50 }
 0x41a   : > { %v972_v53 = vmul.f32 %v1331_v45, %v971_v51 }
 0x41c   : > { %v976_v54 = vsel %vm975_vm9, %v1331_v45, %v972_v53 }
 0x41d   : > { %1003 = vperm.xlu0 %1302, %v876_v52   ;;  %996 = vperm.xlu2 %1303, %v976_v54  }
 0x41e   : > { %v1167_v63 = vpop.f32.mrf.mxu0 }
 0x425   : > { %1020 = vperm.xlu2 %1303, %v879_v55  }
 0x469   : > { %v985_v56 = vpop.permute.xlu0 %984  ;;  %v980_v4 = vpop.permute.xlu1 %979 }
 0x46a   : > { %v988_v58 = vsub.f32 %v1562_v0, %v985_v56  ;;  %v987_v11 = vsub.f32 %v1556_v10, %v980_v4 }
 0x471   : > { %v1016_v0 = vpop.permute.xlu1 %1015 }
 0x477   : > { %v997_v57 = vpop.permute.xlu2 %996 }
 0x478   : > { %v1000_v59 = vmul.f32 %v997_v57, %v988_v58 }
 0x47a   : > { %v1012_v61 = vmul.f32 %v1009_v60, %v1000_v59 }
 0x47f   : > { %v1021_v62 = vpop.permute.xlu2 %1020 }
 0x480   : > { %v1024_v1 = vadd.f32 %v1021_v62, %v1012_v61 }
 0x482   : > { %v1269_v3 = vmul.f32 -1.442695, %v1024_v1 }
 0x484   : > { %1332 = vpow2.f32 %v1269_v3 }
 0x487   : > { %v992_v5 = vpop.permute.xlu0 %991 }
 0x488   : > { %v999_v12 = vmul.f32 %v992_v5, %v987_v11 }
 0x48a   : > { %v1333_v8 = vpop.eup %1332 }
 0x48b   : > { %v1032_v9 = vadd.f32 1.0, %v1333_v8 }
 0x48d   : > { %1334 = vrcp.f32 %v1032_v9  ;;  %v1059_v20 = vand.u32 2147483648, %v1032_v9  ;;  %v1057_v22 = vand.u32 2147483647, %v1032_v9  ;;  %vm1053_vm11 = vweird.f32 %v1032_v9 }
 0x48f   : > { %v1004_v13 = vpop.permute.xlu0 %1003  ;;  %v1060_v24 = vor.u32 1.1754944e-38, %v1059_v20  ;;  %vm1058_vm13 = vcmp.eq.f32.partialorder %v1057_v22, 8.507059e+37 }
 0x490   : > { %v1011_v14 = vmul.f32 %v1004_v13, %v999_v12 }
 0x492   : > { %v1023_v15 = vadd.f32 %v1016_v0, %v1011_v14 }
 0x493   : > { %v1335_v16 = vpop.eup %1334 }
 0x494   : > { %v1049_v17 = vmul.f32 %v1335_v16, %v1032_v9  ;;  %v1268_v18 = vmul.f32 -1.442695, %v1023_v15  ;;  %vm1054_vm10 = vweird.f32 %v1335_v16 }
 0x495   : > { %vm1055_vm12 = vmor %vm1053_vm11, %vm1054_vm10 }
 0x496   : > { %v1050_v19 = vsub.f32 1.0, %v1049_v17  ;;  %1336 = vpow2.f32 %v1268_v18 }
 0x498   : > { %v1051_v21 = vmul.f32 %v1335_v16, %v1050_v19 }
 0x49a   : > { %v1052_v23 = vadd.f32 %v1335_v16, %v1051_v21 }
 0x49c   : > { %v1337_v10 = vpop.eup %1336  ;;  %v1056_v25 = vsel %vm1055_vm12, %v1335_v16, %v1052_v23 }
 0x49d   : > { %v1061_v7 = vsel %vm1058_vm13, %v1060_v24, %v1056_v25  ;;  %v1031_v26 = vadd.f32 1.0, %v1337_v10 }
 0x49e   : > { %v1064_v27 = vmul.f32 %v1061_v7, %v1024_v1 }
 0x49f   : > { %1338 = vrcp.f32 %v1031_v26  ;;  %v1044_v32 = vand.u32 2147483648, %v1031_v26  ;;  %v1042_v34 = vand.u32 2147483647, %v1031_v26  ;;  %vm1038_vm2 = vweird.f32 %v1031_v26 }
 0x4a0   : > { %1073 = vrot.lane.b32.xlu1 %v1064_v27, %s1350_s24  ;;  %1081 = vrot.lane.b32.xlu0 %v1064_v27, %s1349_s23 }
 0x4a1   : > { %v1045_v36 = vor.u32 1.1754944e-38, %v1044_v32  ;;  %vm1043_vm4 = vcmp.eq.f32.partialorder %v1042_v34, 8.507059e+37 }
 0x4a5   : > { %v1339_v28 = vpop.eup %1338 }
 0x4a6   : > { %v1034_v30 = vmul.f32 %v1339_v28, %v1031_v26  ;;  %vm1039_vm15 = vweird.f32 %v1339_v28 }
 0x4a7   : > { %vm1040_vm3 = vmor %vm1038_vm2, %vm1039_vm15 }
 0x4a8   : > { %1094 = vperm.xlu1 %1301, %v1068_v29   ;;  %v1035_v31 = vsub.f32 1.0, %v1034_v30 }
 0x4aa   : > { %v1036_v33 = vmul.f32 %v1339_v28, %v1035_v31 }
 0x4ac   : > { %v1037_v35 = vadd.f32 %v1339_v28, %v1036_v33 }
 0x4ae   : > { %v1041_v37 = vsel %vm1040_vm3, %v1339_v28, %v1037_v35 }
 0x4af   : > { %v1046_v38 = vsel %vm1043_vm4, %v1045_v36, %v1041_v37 }
 0x4b0   : > { %v1063_v39 = vmul.f32 %v1046_v38, %v1023_v15 }
 0x4b2   : > { %1071 = vrot.lane.b32.xlu0 %v1063_v39, %s1350_s24  ;;  %1079 = vrot.lane.b32.xlu2 %v1063_v39, %s1349_s23 }
 0x4ba   : > { %1133 = vperm.xlu0 %1302, %v1129_v40   ;;  %1089 = vperm.xlu2 %1303, %v1067_v41  }
 0x4c2   : > { %1138 = vperm.xlu2 %1303, %v1130_v42  }
 0x50c   : > { %v1080_v44 = vpop.permute.xlu2 %1079 }
 0x512   : > { %v1082_v43 = vpop.permute.xlu0 %1081  ;;  %v1074_v45 = vpop.permute.xlu1 %1073 }
 0x513   : > { %1270 = vmatpush.msk.msra.mxu3 %vm829_vm14, %v1082_v43 }
 0x514   : > { %v1090_v50 = vpop.permute.xlu2 %1089 }
 0x515   : > { %1271 = vmatpush.msk.msra.mxu3 %vm829_vm14, %v1080_v44 }
 0x517   : > { %1116 = vmatpush.msra.mxu3 %v1064_v27 }
 0x519   : > { %1117 = vmatpush.msra.mxu3 %v1063_v39 }
 0x51a   : > { %v1095_v57 = vpop.permute.xlu1 %1094 }
 0x51b   : > { %1273 = vmatpush.msk.msra.mxu3 %vm1538_vm1, %v1074_v45 }
 0x51c   : > { %v1139_v56 = vpop.permute.xlu2 %1138 }
 0x51d   : > { %v1168_v58 = vadd.f32 %v1167_v63, %v1139_v56 }
 0x524   : > { %v1072_v47 = vpop.permute.xlu0 %1071 }
 0x525   : > { %1275 = vmatpush.msk.msra.mxu3 %vm1538_vm1, %v1072_v47 }
 0x526   : > { %1276 = vmatmul.msk.f32.vlgmr.msra.gmra.mxu3 %vm1097_vm5, %v1065_v46 }
 0x52c   : > { %v1134_v51 = vpop.permute.xlu0 %1133 }
 0x52d   : > { %v1165_v53 = vadd.f32 %v1164_v49, %v1134_v51 }
 0x52e   : > { %1277 = vmatmul.msk.f32.gmra.mxu3 %vm1097_vm5, %v1066_v48 }
 0x5a9   : > { %v1121_v52 = vpop.f32.mrf.mxu3 }
 0x5aa   : > { %v1122_v54 = vadd.f32 %v1121_v52, %v1090_v50 }
 0x5ac   : > { %v1170_v55 = vadd.f32 %v1165_v53, %v1122_v54 }
 0x5ae   : > { %1172 = vst.msk [vmem:[%s440_s21] sm:$0xff] %vm457_vm0, %v1170_v55 }
 0x5b1   : > { %v1124_v6 = vpop.f32.mrf.mxu3 }
 0x5b2   : > { %v1125_v59 = vadd.f32 %v1124_v6, %v1095_v57 }
 0x5b4   : > { %v1171_v60 = vadd.f32 %v1168_v58, %v1125_v59 }
 0x5b6   : > { %1173 = vst.msk [vmem:[%s440_s21 + $0x8] sm:$0xff] %vm457_vm0, %v1171_v60 }
 0x5b7 PF: > { %s23_s25 = sadd.s32 1, %s1346_s25  }
 0x5b8   : > { %p20_p4 = scmp.ge.s32.totalorder %s23_s25, 4  }
 0x5ba   :  { %22 = sbr.rel (!%p20_p4) target bundleno = 1 (0x1), region = 102 }

// kernel: _lambda_.21
= control target key start
LH: loop header
LB: loop body
LE: loop exit
PB: predicated region body
PF: predicated region fallthrough
CT: control target
= control target key end

     0   :  { %s438_s15 = smov 0   ;;  %s486_s0 = inlined_call_operand.vmem [shape: f32[2,16,32], index: 0, kind: input, shape index: {}]   ;;  %s487_s1 = inlined_call_operand.vmem [shape: f32[32,64], index: 1, kind: input, shape index: {}]   ;;  %s488_s2 = inlined_call_operand.vmem [shape: f32[16,48], index: 2, kind: input, shape index: {}]   ;;  %s489_s3 = inlined_call_operand.vmem [shape: f32[16,1], index: 3, kind: input, shape index: {}]   ;;  %s490_s4 = inlined_call_operand.vmem [shape: f32[2,16,64], index: 4, kind: output, shape index: {}]  }
   0x1 LB: > { %s356_s16 = sadd.s32 4294967295, %s408_s15   ;;  %p360_p0 = scmp.ge.s32.totalorder %s408_s15, 1  ;;  %s408_s15 = sphi %s438_s15, %s14_s15  }
   0x2   : > { %p162_p1 = scmp.lt.s32.totalorder %s408_s15, 3 }
   0x4   : > { %p163_p2 = pnand %p360_p0, %p162_p1 }
   0x5   : > { %p188_p3 = scmp.lt.s32.totalorder (!%p163_p2), %s356_s16, 1  ;;  %s410_s29 = smov (!%p163_p2), 1  }
   0x6   : > { %166 = sbr.rel (%p163_p2) target bundleno = 418 (0x1a2), region = 36  ;;  %s411_s30 = smov (!%p163_p2), 127  }
   0xb   : > { %v203_v0 = vld [vmem:[%s487_s1 + $0x18] sm:$0xff]  ;;  %v202_v1 = vld [vmem:[%s487_s1 + $0x10] sm:$0xff]  ;;  %v201_v2 = vld [vmem:[%s487_s1 + $0x8] sm:$0xff]  ;;  %s492_s16 = smov (!%p188_p3, %s356_s16), 1  ;;  %vm204_vm0 = vcmask 261120   ;;  %v412_v9 = vmov 0  }
   0xc   : > { %379 = vmatpush.msra.mxu3 %v203_v0  ;;  %223 = vmatpush.msra.mxu0 %v203_v0  ;;  %v200_v3 = vld [vmem:[%s487_s1] sm:$0xff]  ;;  %s377_s25 = sshll.u32 %s492_s16, 4  ;;  %v237_v10 = vld [vmem:[%s489_s3 + $0x8] sm:$0xff]  ;;  %vm255_vm1 = vcmask 515072   ;;  %vm246_vm2 = vcmask 7168   ;;  %vm268_vm4 = vcmask 392192  }
   0xd   : > { %s192_s28 = scalar_lea.vmem %s486_s0, %s377_s25  ;;  %v236_v8 = vld [vmem:[%s489_s3] sm:$0xff]  ;;  %400 = vset.pattern.permute.xlu2 %v412_v9  ;;  %401 = vset.pattern.permute.xlu0 %v412_v9  ;;  %vm369_vm3 = vmneg %vm246_vm2  ;;  %v235_v15 = vld [vmem:[%s488_s2 + $0x8] sm:$0xff]  ;;  %s197_s17 = scalar_lea.vmem %s490_s4, %s377_s25  ;;  %vm298_vm5 = vcmask 523264  }
   0xe   : > { %380 = vmatpush.msra.mxu3 %v202_v1  ;;  %224 = vmatpush.msra.mxu0 %v202_v1  ;;  %v199_v4 = vld [vmem:[%s192_s28 + $0x8] sm:$0xff]  ;;  %v198_v5 = vld [vmem:[%s192_s28] sm:$0xff] }
   0xf   : > { %260 = vperm.xlu2 %400, %v236_v8   ;;  %v234_v14 = vld [vmem:[%s488_s2] sm:$0xff] }
  0x10   : > { %381 = vmatpush.msra.mxu3 %v201_v2  ;;  %225 = vmatpush.msra.mxu0 %v201_v2 }
  0x12   : > { %382 = vmatpush.msra.mxu3 %v200_v3  ;;  %226 = vmatpush.msra.mxu0 %v200_v3 }
  0x13   : > { %366 = vmatmul.msk.f32.vlgmr.msra.gmra.mxu3 %vm204_vm0, %v199_v4  ;;  %365 = vmatmul.msk.f32.vlgmr.msra.gmra.mxu0 %vm204_vm0, %v198_v5 }
  0x17   : > { %265 = vperm.xlu2 %400, %v237_v10  }
  0x69   : > { %v261_v17 = vpop.permute.xlu2 %260 }
  0x71   : > { %v266_v20 = vpop.permute.xlu2 %265 }
  0x90   : > { %v228_v7 = vpop.f32.mrf.mxu0 }
  0x96   : > { %v231_v6 = vpop.f32.mrf.mxu3 }
  0x97   : > { %242 = vrot.lane.b32.xlu1 %v231_v6, %s410_s29  ;;  %251 = vrot.lane.b32.xlu0 %v231_v6, %s411_s30 }
  0x9f   : > { %240 = vrot.lane.b32.xlu1 %v228_v7, %s410_s29  ;;  %249 = vrot.lane.b32.xlu0 %v228_v7, %s411_s30 }
 0x109   : > { %v252_v11 = vpop.permute.xlu0 %251  ;;  %v243_v12 = vpop.permute.xlu1 %242 }
 0x10a   : > { %367 = vmatpush.msk.msra.mxu1 %vm255_vm1, %v252_v11  ;;  %383 = vmatpush.msk.msra.mxu2 %vm255_vm1, %v252_v11 }
 0x111   : > { %v250_v13 = vpop.permute.xlu0 %249  ;;  %v241_v16 = vpop.permute.xlu1 %240 }
 0x112   : > { %368 = vmatpush.msk.msra.mxu1 %vm255_vm1, %v250_v13  ;;  %384 = vmatpush.msk.msra.mxu2 %vm255_vm1, %v250_v13 }
 0x114   : > { %287 = vmatpush.msra.mxu1 %v231_v6  ;;  %385 = vmatpush.msra.mxu2 %v231_v6 }
 0x116   : > { %288 = vmatpush.msra.mxu1 %v228_v7  ;;  %386 = vmatpush.msra.mxu2 %v228_v7 }
 0x118   : > { %370 = vmatpush.msk.msra.mxu1 %vm369_vm3, %v243_v12  ;;  %387 = vmatpush.msk.msra.mxu2 %vm369_vm3, %v243_v12 }
 0x11a   : > { %372 = vmatpush.msk.msra.mxu1 %vm369_vm3, %v241_v16  ;;  %388 = vmatpush.msk.msra.mxu2 %vm369_vm3, %v241_v16 }
 0x11b   : > { %373 = vmatmul.msk.f32.vlgmr.msra.gmra.mxu1 %vm268_vm4, %v234_v14  ;;  %374 = vmatmul.msk.f32.vlgmr.msra.gmra.mxu2 %vm268_vm4, %v235_v15 }
 0x198   : > { %v292_v18 = vpop.f32.mrf.mxu1 }
 0x199   : > { %v293_v19 = vadd.f32 %v292_v18, %v261_v17 }
 0x19b   : > { %299 = vst.msk [vmem:[%s197_s17] sm:$0xff] %vm298_vm5, %v293_v19 }
 0x19e   : > { %v295_v21 = vpop.f32.mrf.mxu2 }
 0x19f   : > { %v296_v22 = vadd.f32 %v295_v21, %v266_v20 }
 0x1a1   : > { %300 = vst.msk [vmem:[%s197_s17 + $0x8] sm:$0xff] %vm298_vm5, %v296_v22 }
 0x1a2 PF: > { %s14_s15 = sadd.s32 1, %s408_s15  }
 0x1a3   : > { %p11_p4 = scmp.ge.s32.totalorder %s14_s15, 4  }
 0x1a5   :  { %13 = sbr.rel (!%p11_p4) target bundleno = 1 (0x1), region = 66 }

// kernel: _lambda_.19
= control target key start
LH: loop header
LB: loop body
LE: loop exit
PB: predicated region body
PF: predicated region fallthrough
CT: control target
= control target key end

     0   :  { %s1107_s17 = smov 0   ;;  %s1263_s0 = inlined_call_operand.vmem [shape: f32[2,16,32], index: 0, kind: input, shape index: {}]   ;;  %s1264_s1 = inlined_call_operand.vmem [shape: f32[16,16], index: 1, kind: input, shape index: {}]   ;;  %s1265_s2 = inlined_call_operand.vmem [shape: f32[16,1], index: 2, kind: input, shape index: {}]   ;;  %s1266_s3 = inlined_call_operand.vmem [shape: f32[16,1], index: 3, kind: input, shape index: {}]   ;;  %s1267_s4 = inlined_call_operand.vmem [shape: f32[16,48], index: 4, kind: input, shape index: {}]   ;;  %s1268_s5 = inlined_call_operand.vmem [shape: f32[16,1], index: 5, kind: input, shape index: {}]   ;;  %s1269_s6 = inlined_call_operand.vmem [shape: f32[16,16], index: 6, kind: input, shape index: {}]   ;;  %s1270_s7 = inlined_call_operand.vmem [shape: f32[16,1], index: 7, kind: input, shape index: {}]   ;;  %s1271_s8 = inlined_call_operand.vmem [shape: f32[16,1], index: 8, kind: input, shape index: {}]   ;;  %s1272_s9 = inlined_call_operand.vmem [shape: f32[16,48], index: 9, kind: input, shape index: {}]   ;;  %s1273_s10 = inlined_call_operand.vmem [shape: f32[16,1], index: 10, kind: input, shape index: {}]   ;;  %s1274_s11 = inlined_call_operand.vmem [shape: f32[2,16,32], index: 11, kind: output, shape index: {}]  }
   0x1 LB: > { %s955_s18 = sadd.s32 4294967295, %s1042_s17   ;;  %p959_p0 = scmp.ge.s32.totalorder %s1042_s17, 1  ;;  %s1042_s17 = sphi %s1107_s17, %s21_s17  }
   0x2   : > { %p337_p1 = scmp.lt.s32.totalorder %s1042_s17, 3 }
   0x4   : > { %p338_p2 = pnand %p959_p0, %p337_p1 }
   0x5   : > { %p377_p3 = scmp.lt.s32.totalorder (!%p338_p2), %s955_s18, 1  ;;  %s1045_s16 = smov (!%p338_p2), 127  }
   0x6   : > { %341 = sbr.rel (%p338_p2) target bundleno = 1410 (0x582), region = 64  ;;  %s1046_s20 = smov (!%p338_p2), 1  }
   0xb   : > { %s1278_s18 = smov (!%p377_p3, %s955_s18), 1  ;;  %vm395_vm0 = vcmask 261120   ;;  %v389_v10 = vld [vmem:[%s1264_s1] sm:$0xff]  ;;  %vm410_vm1 = vcmask 130048   ;;  %v390_v11 = vld [vmem:[%s1264_s1 + $0x8] sm:$0xff]  ;;  %v1044_v14 = vmov 0  }
   0xc   : > { %s994_s19 = sshll.u32 %s1278_s18, 4  ;;  %1009 = vset.pattern.permute.xlu2 %v1044_v14  ;;  %1011 = vset.pattern.permute.xlu1 %v1044_v14  ;;  %v392_v26 = vld [vmem:[%s1265_s2 + $0x8] sm:$0xff]  ;;  %v391_v32 = vld [vmem:[%s1265_s2] sm:$0xff] }
   0xd   : > { %s381_s22 = scalar_lea.vmem %s1263_s0, %s994_s19  ;;  %1010 = vset.pattern.permute.xlu0 %v1044_v14  ;;  %v394_v40 = vld [vmem:[%s1266_s3 + $0x8] sm:$0xff]  ;;  %v393_v46 = vld [vmem:[%s1266_s3] sm:$0xff]  ;;  %s386_s21 = scalar_lea.vmem %s1274_s11, %s994_s19 }
   0xe   : > { %v1123_v0 = vld [vmem:[%s381_s22 + $0x8] sm:$0xff]  ;;  %v1125_v1 = vld [vmem:[%s381_s22] sm:$0xff] }
   0xf   : > { %v399_v2 = vsel %vm395_vm0, %v1123_v0, 0.0  ;;  %v396_v3 = vsel %vm395_vm0, %v1125_v1, 0.0  ;;  %v403_v4 = vmul.f32 %v1123_v0, %v1123_v0  ;;  %v402_v5 = vmul.f32 %v1125_v1, %v1125_v1 }
  0x10   : > { %400 = vadd.xlane.f32.xlu0 %v399_v2  ;;  %397 = vadd.xlane.f32.xlu1 %v396_v3 }
  0x11   : > { %v407_v6 = vsel %vm395_vm0, %v403_v4, 0.0  ;;  %v404_v7 = vsel %vm395_vm0, %v402_v5, 0.0 }
  0x18   : > { %408 = vadd.xlane.f32.xlu0 %v407_v6  ;;  %405 = vadd.xlane.f32.xlu1 %v404_v7 }
  0x83   : > { %v401_v8 = vpop.xlane.xlu0 %400  ;;  %v398_v9 = vpop.xlane.xlu1 %397 }
  0x84   : > { %431 = vmatpush.msra.mxu0 %v401_v8  ;;  %996 = vmatpush.msra.mxu3 %v401_v8 }
  0x86   : > { %432 = vmatpush.msra.mxu0 %v398_v9  ;;  %997 = vmatpush.msra.mxu3 %v398_v9 }
  0x87   : > { %964 = vmatmul.msk.f32.vlgmr.msra.gmra.mxu0 %vm410_vm1, %v389_v10  ;;  %965 = vmatmul.msk.f32.vlgmr.msra.gmra.mxu3 %vm410_vm1, %v390_v11 }
  0x8b   : > { %v409_v12 = vpop.xlane.xlu0 %408  ;;  %v406_v13 = vpop.xlane.xlu1 %405 }
  0x8c   : > { %454 = vmatpush.msra.mxu1 %v409_v12 }
  0x8e   : > { %455 = vmatpush.msra.mxu1 %v406_v13 }
  0x8f   : > { %966 = vmatmul.msk.f32.vlgmr.msra.gmra.mxu1 %vm410_vm1, %v389_v10 }
  0x97   : > { %967 = vmatmul.msk.f32.gmra.mxu1 %vm410_vm1, %v390_v11 }
 0x104   : > { %v434_v15 = vpop.f32.mrf.mxu0 }
 0x105   : > { %v463_v16 = vmul.f32 0.0078125, %v434_v15 }
 0x107   : > { %495 = vperm.xlu2 %1009, %v463_v16   ;;  %v467_v18 = vmul.f32 %v463_v16, %v463_v16 }
 0x10a   : > { %v437_v17 = vpop.f32.mrf.mxu3 }
 0x10b   : > { %v464_v19 = vmul.f32 0.0078125, %v437_v17 }
 0x10c   : > { %v457_v20 = vpop.f32.mrf.mxu1 }
 0x10d   : > { %v465_v21 = vmul.f32 0.0078125, %v457_v20  ;;  %v468_v24 = vmul.f32 %v464_v19, %v464_v19 }
 0x10f   : > { %v469_v22 = vsub.f32 %v465_v21, %v467_v18  ;;  %500 = vperm.xlu2 %1009, %v464_v19  }
 0x111   : > { %v471_v23 = vadd.f32 1e-06, %v469_v22 }
 0x113   : > { %1012 = vrsqrt.f32 %v471_v23  ;;  %vm479_vm3 = vweird.f32 %v471_v23 }
 0x114   : > { %v460_v25 = vpop.f32.mrf.mxu1 }
 0x115   : > { %v466_v27 = vmul.f32 0.0078125, %v460_v25 }
 0x117   : > { %v470_v28 = vsub.f32 %v466_v27, %v468_v24  ;;  %524 = vperm.xlu2 %1009, %v392_v26   ;;  %v584_v27 = vld [vmem:[%s1268_s5 + $0x8] sm:$0xff] }
 0x119   : > { %v1013_v29 = vpop.eup %1012  ;;  %v472_v30 = vadd.f32 1e-06, %v470_v28 }
 0x11a   : > { %v474_v31 = vmul.f32 %v1013_v29, %v471_v23  ;;  %vm480_vm2 = vweird.f32 %v1013_v29 }
 0x11b   : > { %1014 = vrsqrt.f32 %v472_v30  ;;  %vm481_vm4 = vmor %vm479_vm3, %vm480_vm2  ;;  %vm489_vm6 = vweird.f32 %v472_v30  ;;  %vm602_vm2 = vcmask 252928   ;;  %vm593_vm3 = vcmask 7168  }
 0x11c   : > { %v475_v33 = vmul.f32 %v1013_v29, %v474_v31 }
 0x11e   : > { %v476_v34 = vmul.f32 0.5, %v475_v33 }
 0x11f   : > { %519 = vperm.xlu2 %1009, %v391_v32  }
 0x120   : > { %v477_v35 = vsub.f32 1.5, %v476_v34 }
 0x121   : > { %v1015_v36 = vpop.eup %1014 }
 0x122   : > { %v484_v37 = vmul.f32 %v1015_v36, %v472_v30  ;;  %v478_v38 = vmul.f32 %v1013_v29, %v477_v35  ;;  %vm490_vm5 = vweird.f32 %v1015_v36  ;;  %v583_v30 = vld [vmem:[%s1268_s5] sm:$0xff] }
 0x123   : > { %vm491_vm7 = vmor %vm489_vm6, %vm490_vm5  ;;  %v581_v35 = vld [vmem:[%s1267_s4] sm:$0xff]  ;;  %vm615_vm5 = vcmask 392192  }
 0x124   : > { %v482_v39 = vsel %vm481_vm4, %v1013_v29, %v478_v38  ;;  %v485_v41 = vmul.f32 %v1015_v36, %v484_v37  ;;  %vm1173_vm4 = vmneg %vm593_vm3  ;;  %v582_v37 = vld [vmem:[%s1267_s4 + $0x8] sm:$0xff] }
 0x125   : > { %507 = vperm.xlu1 %1011, %v482_v39  }
 0x126   : > { %v486_v42 = vmul.f32 0.5, %v485_v41 }
 0x127   : > { %536 = vperm.xlu2 %1009, %v394_v40  }
 0x128   : > { %v487_v43 = vsub.f32 1.5, %v486_v42 }
 0x12a   : > { %v488_v44 = vmul.f32 %v1015_v36, %v487_v43 }
 0x12c   : > { %v492_v45 = vsel %vm491_vm7, %v1015_v36, %v488_v44 }
 0x12d   : > { %512 = vperm.xlu0 %1010, %v492_v45  }
 0x12f   : > { %531 = vperm.xlu2 %1009, %v393_v46  }
 0x161   : > { %v496_v47 = vpop.permute.xlu2 %495 }
 0x162   : > { %v503_v52 = vsub.f32 %v1125_v1, %v496_v47 }
 0x169   : > { %v501_v48 = vpop.permute.xlu2 %500 }
 0x16a   : > { %v504_v58 = vsub.f32 %v1123_v0, %v501_v48 }
 0x171   : > { %v525_v49 = vpop.permute.xlu2 %524 }
 0x179   : > { %v520_v50 = vpop.permute.xlu2 %519 }
 0x181   : > { %v537_v51 = vpop.permute.xlu2 %536 }
 0x189   : > { %v532_v56 = vpop.permute.xlu2 %531 }
 0x197   : > { %v508_v53 = vpop.permute.xlu1 %507 }
 0x198   : > { %v515_v54 = vmul.f32 %v508_v53, %v503_v52  ;;  %v645_v53 = vld [vmem:[%s1269_s6] sm:$0xff] }
 0x19a   : > { %v527_v55 = vmul.f32 %v520_v50, %v515_v54  ;;  %v648_v50 = vld [vmem:[%s1270_s7 + $0x8] sm:$0xff] }
 0x19c   : > { %v539_v57 = vadd.f32 %v532_v56, %v527_v55  ;;  %v646_v56 = vld [vmem:[%s1269_s6 + $0x8] sm:$0xff] }
 0x19e   : > { %v968_v59 = vmul.f32 -1.442695, %v539_v57 }
 0x19f   : > { %v513_v60 = vpop.permute.xlu0 %512 }
 0x1a0   : > { %1016 = vpow2.f32 %v968_v59  ;;  %v516_v61 = vmul.f32 %v513_v60, %v504_v58 }
 0x1a2   : > { %v528_v62 = vmul.f32 %v525_v49, %v516_v61 }
 0x1a4   : > { %v540_v63 = vadd.f32 %v537_v51, %v528_v62 }
 0x1a6   : > { %v1017_v2 = vpop.eup %1016  ;;  %v969_v3 = vmul.f32 -1.442695, %v540_v63 }
 0x1a7   : > { %v547_v4 = vadd.f32 1.0, %v1017_v2 }
 0x1a8   : > { %1018 = vpow2.f32 %v969_v3 }
 0x1a9   : > { %1020 = vrcp.f32 %v547_v4  ;;  %v560_v10 = vand.u32 2147483648, %v547_v4  ;;  %v558_v12 = vand.u32 2147483647, %v547_v4  ;;  %vm554_vm9 = vweird.f32 %v547_v4 }
 0x1ab   : > { %v561_v15 = vor.u32 1.1754944e-38, %v560_v10  ;;  %vm559_vm11 = vcmp.eq.f32.partialorder %v558_v12, 8.507059e+37 }
 0x1ae   : > { %v1019_v5 = vpop.eup %1018 }
 0x1af   : > { %v1021_v6 = vpop.eup %1020  ;;  %v548_v7 = vadd.f32 1.0, %v1019_v5 }
 0x1b0   : > { %v550_v8 = vmul.f32 %v1021_v6, %v547_v4  ;;  %vm555_vm8 = vweird.f32 %v1021_v6  ;;  %v649_v4 = vld [vmem:[%s1271_s8] sm:$0xff] }
 0x1b1   : > { %1022 = vrcp.f32 %v548_v7  ;;  %vm556_vm10 = vmor %vm554_vm9, %vm555_vm8  ;;  %v575_v21 = vand.u32 2147483648, %v548_v7  ;;  %v573_v23 = vand.u32 2147483647, %v548_v7  ;;  %vm569_vm13 = vweird.f32 %v548_v7 }
 0x1b2   : > { %v551_v9 = vsub.f32 1.0, %v550_v8 }
 0x1b3   : > { %v576_v25 = vor.u32 1.1754944e-38, %v575_v21  ;;  %vm574_vm15 = vcmp.eq.f32.partialorder %v573_v23, 8.507059e+37 }
 0x1b4   : > { %v552_v11 = vmul.f32 %v1021_v6, %v551_v9 }
 0x1b6   : > { %v553_v13 = vadd.f32 %v1021_v6, %v552_v11 }
 0x1b7   : > { %v1023_v14 = vpop.eup %1022 }
 0x1b8   : > { %v557_v16 = vsel %vm556_vm10, %v1021_v6, %v553_v13  ;;  %v565_v17 = vmul.f32 %v1023_v14, %v548_v7  ;;  %vm570_vm12 = vweird.f32 %v1023_v14 }
 0x1b9   : > { %v562_v18 = vsel %vm559_vm11, %v561_v15, %v557_v16  ;;  %vm571_vm14 = vmor %vm569_vm13, %vm570_vm12 }
 0x1ba   : > { %v579_v19 = vmul.f32 %v562_v18, %v539_v57  ;;  %v566_v20 = vsub.f32 1.0, %v565_v17 }
 0x1bc   : > { %596 = vrot.lane.b32.xlu2 %v579_v19, %s1045_s16  ;;  %587 = vrot.lane.b32.xlu0 %v579_v19, %s1046_s20  ;;  %v567_v22 = vmul.f32 %v1023_v14, %v566_v20 }
 0x1be   : > { %v568_v24 = vadd.f32 %v1023_v14, %v567_v22  ;;  %v647_v22 = vld [vmem:[%s1270_s7] sm:$0xff] }
 0x1c0   : > { %v572_v26 = vsel %vm571_vm14, %v1023_v14, %v568_v24 }
 0x1c1   : > { %v577_v28 = vsel %vm574_vm15, %v576_v25, %v572_v26  ;;  %v650_v25 = vld [vmem:[%s1271_s8 + $0x8] sm:$0xff] }
 0x1c2   : > { %v580_v29 = vmul.f32 %v577_v28, %v540_v63 }
 0x1c4   : > { %612 = vperm.xlu2 %1009, %v584_v27   ;;  %598 = vrot.lane.b32.xlu1 %v580_v29, %s1045_s16 }
 0x1cc   : > { %589 = vrot.lane.b32.xlu1 %v580_v29, %s1046_s20 }
 0x1d4   : > { %607 = vperm.xlu1 %1011, %v583_v30  }
 0x216   : > { %v597_v32 = vpop.permute.xlu2 %596 }
 0x21e   : > { %v613_v43 = vpop.permute.xlu2 %612 }
 0x22e   : > { %v588_v36 = vpop.permute.xlu0 %587 }
 0x236   : > { %v599_v31 = vpop.permute.xlu1 %598 }
 0x237   : > { %970 = vmatpush.msk.msra.mxu2 %vm602_vm2, %v599_v31 }
 0x239   : > { %971 = vmatpush.msk.msra.mxu2 %vm602_vm2, %v597_v32 }
 0x23b   : > { %634 = vmatpush.msra.mxu2 %v580_v29 }
 0x23d   : > { %635 = vmatpush.msra.mxu2 %v579_v19 }
 0x23e   : > { %v590_v34 = vpop.permute.xlu1 %589 }
 0x23f   : > { %973 = vmatpush.msk.msra.mxu2 %vm1173_vm4, %v590_v34 }
 0x241   : > { %975 = vmatpush.msk.msra.mxu2 %vm1173_vm4, %v588_v36 }
 0x242   : > { %976 = vmatmul.msk.f32.vlgmr.msra.gmra.mxu2 %vm615_vm5, %v581_v35 }
 0x246   : > { %v608_v38 = vpop.permute.xlu1 %607 }
 0x24a   : > { %977 = vmatmul.msk.f32.gmra.mxu2 %vm615_vm5, %v582_v37 }
 0x2c5   : > { %v639_v39 = vpop.f32.mrf.mxu2 }
 0x2c6   : > { %v1189_v40 = vadd.f32 %v639_v39, %v608_v38 }
 0x2c8   : > { %v651_v41 = vsel %vm395_vm0, %v1189_v40, 0.0  ;;  %v657_v42 = vmul.f32 %v1189_v40, %v1189_v40 }
 0x2c9   : > { %652 = vadd.xlane.f32.xlu2 %v651_v41 }
 0x2ca   : > { %v659_v47 = vsel %vm395_vm0, %v657_v42, 0.0 }
 0x2cd   : > { %v642_v44 = vpop.f32.mrf.mxu2 }
 0x2ce   : > { %v1195_v45 = vadd.f32 %v642_v44, %v613_v43 }
 0x2d0   : > { %v654_v46 = vsel %vm395_vm0, %v1195_v45, 0.0  ;;  %v658_v48 = vmul.f32 %v1195_v45, %v1195_v45 }
 0x2d1   : > { %655 = vadd.xlane.f32.xlu0 %v654_v46  ;;  %660 = vadd.xlane.f32.xlu2 %v659_v47 }
 0x2d2   : > { %v662_v49 = vsel %vm395_vm0, %v658_v48, 0.0 }
 0x2d3   : > { %663 = vadd.xlane.f32.xlu1 %v662_v49 }
 0x2ec   : > { %778 = vperm.xlu1 %1011, %v648_v50  }
 0x33c   : > { %v653_v51 = vpop.xlane.xlu2 %652 }
 0x344   : > { %v656_v52 = vpop.xlane.xlu0 %655  ;;  %v661_v55 = vpop.xlane.xlu2 %660 }
 0x345   : > { %685 = vmatpush.msrb.mxu3 %v656_v52 }
 0x346   : > { %v664_v54 = vpop.xlane.xlu1 %663 }
 0x347   : > { %686 = vmatpush.msrb.mxu3 %v653_v51  ;;  %708 = vmatpush.msrb.mxu0 %v664_v54 }
 0x348   : > { %978 = vmatmul.msk.f32.vlgmr.msrb.gmra.mxu3 %vm410_vm1, %v645_v53 }
 0x349   : > { %709 = vmatpush.msrb.mxu0 %v661_v55 }
 0x34a   : > { %980 = vmatmul.msk.f32.vlgmr.msrb.gmra.mxu0 %vm410_vm1, %v645_v53 }
 0x350   : > { %979 = vmatmul.msk.f32.gmra.mxu3 %vm410_vm1, %v646_v56 }
 0x352   : > { %981 = vmatmul.msk.f32.gmra.mxu0 %vm410_vm1, %v646_v56 }
 0x35e   : > { %v779_v30 = vpop.permute.xlu1 %778 }
 0x3c7   : > { %v711_v57 = vpop.f32.mrf.mxu0 }
 0x3c8   : > { %v719_v60 = vmul.f32 0.0078125, %v711_v57 }
 0x3cb   : > { %v688_v58 = vpop.f32.mrf.mxu3 }
 0x3cc   : > { %v717_v59 = vmul.f32 0.0078125, %v688_v58 }
 0x3ce   : > { %v721_v61 = vmul.f32 %v717_v59, %v717_v59  ;;  %749 = vperm.xlu1 %1011, %v717_v59  }
 0x3cf   : > { %v714_v63 = vpop.f32.mrf.mxu0 }
 0x3d0   : > { %v723_v62 = vsub.f32 %v719_v60, %v721_v61  ;;  %v720_v6 = vmul.f32 0.0078125, %v714_v63  ;;  %v838_v61 = vld [vmem:[%s1273_s10 + $0x8] sm:$0xff] }
 0x3d2   : > { %v725_v2 = vadd.f32 1e-06, %v723_v62 }
 0x3d3   : > { %v691_v3 = vpop.f32.mrf.mxu3 }
 0x3d4   : > { %1024 = vrsqrt.f32 %v725_v2  ;;  %v718_v5 = vmul.f32 0.0078125, %v691_v3  ;;  %vm733_vm6 = vweird.f32 %v725_v2 }
 0x3d6   : > { %v722_v7 = vmul.f32 %v718_v5, %v718_v5  ;;  %785 = vperm.xlu1 %1011, %v649_v4   ;;  %754 = vperm.xlu0 %1010, %v718_v5  }
 0x3d8   : > { %v724_v8 = vsub.f32 %v720_v6, %v722_v7 }
 0x3da   : > { %v1025_v9 = vpop.eup %1024  ;;  %v726_v10 = vadd.f32 1e-06, %v724_v8 }
 0x3db   : > { %v728_v11 = vmul.f32 %v1025_v9, %v725_v2  ;;  %vm734_vm1 = vweird.f32 %v1025_v9 }
 0x3dc   : > { %1026 = vrsqrt.f32 %v726_v10  ;;  %vm735_vm7 = vmor %vm733_vm6, %vm734_vm1  ;;  %vm743_vm8 = vweird.f32 %v726_v10 }
 0x3dd   : > { %v729_v12 = vmul.f32 %v1025_v9, %v728_v11 }
 0x3df   : > { %v730_v13 = vmul.f32 0.5, %v729_v12 }
 0x3e1   : > { %v731_v14 = vsub.f32 1.5, %v730_v13 }
 0x3e2   : > { %v1027_v15 = vpop.eup %1026 }
 0x3e3   : > { %v738_v16 = vmul.f32 %v1027_v15, %v726_v10  ;;  %v732_v17 = vmul.f32 %v1025_v9, %v731_v14  ;;  %vm744_vm9 = vweird.f32 %v1027_v15  ;;  %v837_v10 = vld [vmem:[%s1273_s10] sm:$0xff] }
 0x3e4   : > { %vm745_vm10 = vmor %vm743_vm8, %vm744_vm9  ;;  %v835_v14 = vld [vmem:[%s1272_s9] sm:$0xff] }
 0x3e5   : > { %v739_v18 = vmul.f32 %v1027_v15, %v738_v16  ;;  %v736_v19 = vsel %vm735_vm7, %v1025_v9, %v732_v17  ;;  %v836_v16 = vld [vmem:[%s1272_s9 + $0x8] sm:$0xff] }
 0x3e6   : > { %761 = vperm.xlu0 %1010, %v736_v19  }
 0x3e7   : > { %v740_v20 = vmul.f32 0.5, %v739_v18 }
 0x3e9   : > { %v741_v21 = vsub.f32 1.5, %v740_v20 }
 0x3eb   : > { %v742_v23 = vmul.f32 %v1027_v15, %v741_v21 }
 0x3ed   : > { %v746_v24 = vsel %vm745_vm10, %v1027_v15, %v742_v23 }
 0x3ee   : > { %773 = vperm.xlu0 %1010, %v647_v22   ;;  %766 = vperm.xlu2 %1009, %v746_v24  }
 0x3f6   : > { %790 = vperm.xlu2 %1009, %v650_v25  }
 0x440   : > { %v750_v36 = vpop.permute.xlu1 %749 }
 0x441   : > { %v757_v39 = vsub.f32 %v1189_v40, %v750_v36 }
 0x448   : > { %v755_v26 = vpop.permute.xlu0 %754  ;;  %v767_v28 = vpop.permute.xlu2 %766 }
 0x449   : > { %v758_v27 = vsub.f32 %v1195_v45, %v755_v26  ;;  %v786_v46 = vpop.permute.xlu1 %785 }
 0x44b   : > { %v770_v29 = vmul.f32 %v767_v28, %v758_v27 }
 0x44d   : > { %v782_v31 = vmul.f32 %v779_v30, %v770_v29 }
 0x450   : > { %v791_v32 = vpop.permute.xlu2 %790 }
 0x451   : > { %v794_v34 = vadd.f32 %v791_v32, %v782_v31 }
 0x453   : > { %v983_v35 = vmul.f32 -1.442695, %v794_v34 }
 0x455   : > { %1028 = vpow2.f32 %v983_v35 }
 0x458   : > { %v762_v37 = vpop.permute.xlu0 %761 }
 0x459   : > { %v769_v42 = vmul.f32 %v762_v37, %v757_v39 }
 0x45b   : > { %v1029_v38 = vpop.eup %1028 }
 0x45c   : > { %v802_v41 = vadd.f32 1.0, %v1029_v38 }
 0x45e   : > { %1030 = vrcp.f32 %v802_v41  ;;  %v829_v51 = vand.u32 2147483648, %v802_v41  ;;  %v827_v53 = vand.u32 2147483647, %v802_v41  ;;  %vm823_vm12 = vweird.f32 %v802_v41 }
 0x460   : > { %v774_v43 = vpop.permute.xlu0 %773  ;;  %v830_v40 = vor.u32 1.1754944e-38, %v829_v51  ;;  %vm828_vm14 = vcmp.eq.f32.partialorder %v827_v53, 8.507059e+37 }
 0x461   : > { %v781_v44 = vmul.f32 %v774_v43, %v769_v42 }
 0x463   : > { %v793_v45 = vadd.f32 %v786_v46, %v781_v44 }
 0x464   : > { %v1031_v47 = vpop.eup %1030 }
 0x465   : > { %v982_v48 = vmul.f32 -1.442695, %v793_v45  ;;  %v819_v49 = vmul.f32 %v1031_v47, %v802_v41  ;;  %vm824_vm11 = vweird.f32 %v1031_v47 }
 0x466   : > { %vm825_vm13 = vmor %vm823_vm12, %vm824_vm11 }
 0x467   : > { %1032 = vpow2.f32 %v982_v48  ;;  %v820_v50 = vsub.f32 1.0, %v819_v49 }
 0x469   : > { %v821_v52 = vmul.f32 %v1031_v47, %v820_v50 }
 0x46b   : > { %v822_v54 = vadd.f32 %v1031_v47, %v821_v52 }
 0x46d   : > { %v1033_v55 = vpop.eup %1032  ;;  %v826_v56 = vsel %vm825_vm13, %v1031_v47, %v822_v54 }
 0x46e   : > { %v801_v57 = vadd.f32 1.0, %v1033_v55  ;;  %v831_v58 = vsel %vm828_vm14, %v830_v40, %v826_v56 }
 0x46f   : > { %v834_v59 = vmul.f32 %v831_v58, %v794_v34 }
 0x470   : > { %1034 = vrcp.f32 %v801_v57  ;;  %v814_v2 = vand.u32 2147483648, %v801_v57  ;;  %v812_v4 = vand.u32 2147483647, %v801_v57  ;;  %vm808_vm3 = vweird.f32 %v801_v57 }
 0x471   : > { %843 = vrot.lane.b32.xlu1 %v834_v59, %s1046_s20  ;;  %851 = vrot.lane.b32.xlu0 %v834_v59, %s1045_s16 }
 0x472   : > { %v815_v6 = vor.u32 1.1754944e-38, %v814_v2  ;;  %vm813_vm6 = vcmp.eq.f32.partialorder %v812_v4, 8.507059e+37 }
 0x476   : > { %v1035_v60 = vpop.eup %1034 }
 0x477   : > { %v804_v62 = vmul.f32 %v1035_v60, %v801_v57  ;;  %vm809_vm15 = vweird.f32 %v1035_v60 }
 0x478   : > { %vm810_vm1 = vmor %vm808_vm3, %vm809_vm15 }
 0x479   : > { %v805_v63 = vsub.f32 1.0, %v804_v62  ;;  %864 = vperm.xlu1 %1011, %v838_v61  }
 0x47b   : > { %v806_v3 = vmul.f32 %v1035_v60, %v805_v63 }
 0x47d   : > { %v807_v5 = vadd.f32 %v1035_v60, %v806_v3 }
 0x47f   : > { %v811_v7 = vsel %vm810_vm1, %v1035_v60, %v807_v5 }
 0x480   : > { %v816_v8 = vsel %vm813_vm6, %v815_v6, %v811_v7 }
 0x481   : > { %v833_v9 = vmul.f32 %v816_v8, %v793_v45 }
 0x483   : > { %849 = vrot.lane.b32.xlu2 %v833_v9, %s1045_s16  ;;  %841 = vrot.lane.b32.xlu0 %v833_v9, %s1046_s20 }
 0x48b   : > { %859 = vperm.xlu2 %1009, %v837_v10  }
 0x4dd   : > { %v850_v12 = vpop.permute.xlu2 %849 }
 0x4e3   : > { %v852_v11 = vpop.permute.xlu0 %851  ;;  %v844_v13 = vpop.permute.xlu1 %843 }
 0x4e4   : > { %984 = vmatpush.msk.msrb.mxu1 %vm602_vm2, %v852_v11 }
 0x4e5   : > { %v860_v17 = vpop.permute.xlu2 %859 }
 0x4e6   : > { %985 = vmatpush.msk.msrb.mxu1 %vm602_vm2, %v850_v12 }
 0x4e8   : > { %885 = vmatpush.msrb.mxu1 %v834_v59 }
 0x4ea   : > { %886 = vmatpush.msrb.mxu1 %v833_v9 }
 0x4eb   : > { %v865_v33 = vpop.permute.xlu1 %864 }
 0x4ec   : > { %987 = vmatpush.msk.msrb.mxu1 %vm1173_vm4, %v844_v13 }
 0x4f5   : > { %v842_v15 = vpop.permute.xlu0 %841 }
 0x4f6   : > { %989 = vmatpush.msk.msrb.mxu1 %vm1173_vm4, %v842_v15 }
 0x4f7   : > { %990 = vmatmul.msk.f32.vlgmr.msrb.gmra.mxu1 %vm615_vm5, %v835_v14 }
 0x4ff   : > { %991 = vmatmul.msk.f32.gmra.mxu1 %vm615_vm5, %v836_v16 }
 0x574   : > { %v890_v18 = vpop.f32.mrf.mxu1 }
 0x575   : > { %v891_v19 = vadd.f32 %v890_v18, %v860_v17 }
 0x577   : > { %v896_v20 = vadd.f32 %v891_v19, %v1125_v1 }
 0x579   : > { %898 = vst.msk [vmem:[%s386_s21] sm:$0xff] %vm395_vm0, %v896_v20 }
 0x57c   : > { %v893_v21 = vpop.f32.mrf.mxu1 }
 0x57d   : > { %v894_v22 = vadd.f32 %v893_v21, %v865_v33 }
 0x57f   : > { %v897_v23 = vadd.f32 %v894_v22, %v1123_v0 }
 0x581   : > { %899 = vst.msk [vmem:[%s386_s21 + $0x8] sm:$0xff] %vm395_vm0, %v897_v23 }
 0x582 PF: > { %s21_s17 = sadd.s32 1, %s1042_s17  }
 0x583   : > { %p18_p4 = scmp.ge.s32.totalorder %s21_s17, 4  }
 0x585   :  { %20 = sbr.rel (!%p18_p4) target bundleno = 1 (0x1), region = 94 }

// kernel: _lambda_.22
= control target key start
LH: loop header
LB: loop body
LE: loop exit
PB: predicated region body
PF: predicated region fallthrough
CT: control target
= control target key end

     0   :  { %s1067_s25 = smov 0   ;;  %s1178_s0 = inlined_call_operand.vmem [shape: f32[2,16,64], index: 0, kind: input, shape index: {}]   ;;  %s1179_s1 = inlined_call_operand.vmem [shape: f32[16,16], index: 1, kind: input, shape index: {}]   ;;  %s1180_s2 = inlined_call_operand.vmem [shape: f32[16,1], index: 2, kind: input, shape index: {}]   ;;  %s1181_s3 = inlined_call_operand.vmem [shape: f32[16,1], index: 3, kind: input, shape index: {}]   ;;  %s1182_s4 = inlined_call_operand.vmem [shape: f32[8,48], index: 4, kind: input, shape index: {}]   ;;  %s1183_s5 = inlined_call_operand.vmem [shape: f32[8,1], index: 5, kind: input, shape index: {}]   ;;  %s1184_s6 = inlined_call_operand.vmem [shape: f32[8,8], index: 6, kind: input, shape index: {}]   ;;  %s1185_s7 = inlined_call_operand.vmem [shape: f32[8,1], index: 7, kind: input, shape index: {}]   ;;  %s1186_s8 = inlined_call_operand.vmem [shape: f32[8,1], index: 8, kind: input, shape index: {}]   ;;  %s1187_s9 = inlined_call_operand.vmem [shape: f32[8,24], index: 9, kind: input, shape index: {}]   ;;  %s1188_s10 = inlined_call_operand.vmem [shape: f32[8,1], index: 10, kind: input, shape index: {}]   ;;  %s1189_s11 = inlined_call_operand.vmem [shape: f32[8,16], index: 11, kind: input, shape index: {}]   ;;  %s1190_s12 = inlined_call_operand.vmem [shape: f32[8,1], index: 12, kind: input, shape index: {}]   ;;  %s1191_s13 = inlined_call_operand.vmem [shape: f32[2,8,64], index: 13, kind: output, shape index: {}]  }
   0x1 LB: > { %s922_s26 = sadd.s32 4294967295, %s992_s25   ;;  %p926_p0 = scmp.ge.s32.totalorder %s992_s25, 1  ;;  %s992_s25 = sphi %s1067_s25, %s23_s25  }
   0x2   : > { %p387_p1 = scmp.lt.s32.totalorder %s992_s25, 3 }
   0x4   : > { %p388_p2 = pnand %p926_p0, %p387_p1 }
   0x5   : > { %p430_p3 = scmp.lt.s32.totalorder (!%p388_p2), %s922_s26, 1  ;;  %s995_s28 = smov (!%p388_p2), 127  }
   0x6   : > { %391 = sbr.rel (%p388_p2) target bundleno = 1378 (0x562), region = 72  ;;  %s996_s29 = smov (!%p388_p2), 1  }
   0xb   : > { %s1195_s26 = smov (!%p430_p3, %s922_s26), 1  ;;  %vm447_vm0 = vcmask 523264   ;;  %v441_v10 = vld [vmem:[%s1179_s1] sm:$0xff]  ;;  %vm462_vm1 = vcmask 130048   ;;  %v442_v13 = vld [vmem:[%s1179_s1 + $0x8] sm:$0xff]  ;;  %v994_v14 = vmov 0  }
   0xc   : > { %s953_s27 = sshll.u32 %s1195_s26, 4  ;;  %965 = vset.pattern.permute.xlu2 %v994_v14  ;;  %967 = vset.pattern.permute.xlu1 %v994_v14  ;;  %v444_v31 = vld [vmem:[%s1180_s2 + $0x8] sm:$0xff]  ;;  %v443_v38 = vld [vmem:[%s1180_s2] sm:$0xff] }
   0xd   : > { %s434_s30 = scalar_lea.vmem %s1178_s0, %s953_s27  ;;  %966 = vset.pattern.permute.xlu0 %v994_v14  ;;  %v446_v43 = vld [vmem:[%s1181_s3 + $0x8] sm:$0xff]  ;;  %v445_v46 = vld [vmem:[%s1181_s3] sm:$0xff] }
   0xe   : > { %v1081_v0 = vld [vmem:[%s434_s30 + $0x8] sm:$0xff]  ;;  %v1087_v3 = vld [vmem:[%s434_s30] sm:$0xff] }
   0xf   : > { %v451_v1 = vsel %vm447_vm0, %v1081_v0, 0.0  ;;  %v455_v2 = vmul.f32 %v1081_v0, %v1081_v0  ;;  %v454_v5 = vmul.f32 %v1087_v3, %v1087_v3  ;;  %v448_v6 = vsel %vm447_vm0, %v1087_v3, 0.0 }
  0x10   : > { %452 = vadd.xlane.f32.xlu0 %v451_v1 }
  0x11   : > { %v459_v4 = vsel %vm447_vm0, %v455_v2, 0.0  ;;  %v456_v7 = vsel %vm447_vm0, %v454_v5, 0.0 }
  0x12   : > { %460 = vadd.xlane.f32.xlu1 %v459_v4 }
  0x18   : > { %449 = vadd.xlane.f32.xlu0 %v448_v6 }
  0x1a   : > { %457 = vadd.xlane.f32.xlu1 %v456_v7 }
  0x83   : > { %v453_v8 = vpop.xlane.xlu0 %452 }
  0x84   : > { %483 = vmatpush.msra.mxu0 %v453_v8 }
  0x85   : > { %v461_v9 = vpop.xlane.xlu1 %460 }
  0x86   : > { %506 = vmatpush.msra.mxu1 %v461_v9 }
  0x8b   : > { %v450_v11 = vpop.xlane.xlu0 %449 }
  0x8c   : > { %484 = vmatpush.msra.mxu0 %v450_v11 }
  0x8d   : > { %v458_v12 = vpop.xlane.xlu1 %457  ;;  %930 = vmatmul.msk.f32.vlgmr.msra.gmra.mxu0 %vm462_vm1, %v441_v10 }
  0x8e   : > { %507 = vmatpush.msra.mxu1 %v458_v12  ;;  %861 = vmatpush.msrb.mxu0 %v1081_v0 }
  0x8f   : > { %932 = vmatmul.msk.f32.vlgmr.msra.gmra.mxu1 %vm462_vm1, %v441_v10 }
  0x90   : > { %862 = vmatpush.msrb.mxu0 %v1087_v3 }
  0x95   : > { %931 = vmatmul.msk.f32.gmra.mxu0 %vm462_vm1, %v442_v13 }
  0x97   : > { %933 = vmatmul.msk.f32.gmra.mxu1 %vm462_vm1, %v442_v13 }
 0x10a   : > { %v486_v15 = vpop.f32.mrf.mxu0 }
 0x10b   : > { %v515_v16 = vmul.f32 0.00390625, %v486_v15 }
 0x10c   : > { %v509_v17 = vpop.f32.mrf.mxu1 }
 0x10d   : > { %v519_v18 = vmul.f32 %v515_v16, %v515_v16  ;;  %v517_v19 = vmul.f32 0.00390625, %v509_v17  ;;  %547 = vperm.xlu2 %965, %v515_v16  }
 0x10f   : > { %v521_v20 = vsub.f32 %v517_v19, %v519_v18 }
 0x111   : > { %v523_v21 = vadd.f32 1e-06, %v521_v20 }
 0x112   : > { %v489_v22 = vpop.f32.mrf.mxu0 }
 0x113   : > { %968 = vrsqrt.f32 %v523_v21  ;;  %v516_v23 = vmul.f32 0.00390625, %v489_v22  ;;  %vm531_vm3 = vweird.f32 %v523_v21 }
 0x114   : > { %v512_v24 = vpop.f32.mrf.mxu1 }
 0x115   : > { %v520_v25 = vmul.f32 %v516_v23, %v516_v23  ;;  %v518_v26 = vmul.f32 0.00390625, %v512_v24  ;;  %552 = vperm.xlu2 %965, %v516_v23  }
 0x117   : > { %v522_v27 = vsub.f32 %v518_v26, %v520_v25  ;;  %v634_v25 = vld [vmem:[%s1183_s5] sm:$0xff] }
 0x119   : > { %v969_v28 = vpop.eup %968  ;;  %v524_v29 = vadd.f32 1e-06, %v522_v27 }
 0x11a   : > { %v526_v30 = vmul.f32 %v969_v28, %v523_v21  ;;  %vm532_vm2 = vweird.f32 %v969_v28 }
 0x11b   : > { %970 = vrsqrt.f32 %v524_v29  ;;  %vm533_vm4 = vmor %vm531_vm3, %vm532_vm2  ;;  %vm541_vm6 = vweird.f32 %v524_v29  ;;  %vm652_vm2 = vcmask 515072   ;;  %vm643_vm3 = vcmask 7168  }
 0x11c   : > { %v527_v32 = vmul.f32 %v969_v28, %v526_v30 }
 0x11d   : > { %576 = vperm.xlu2 %965, %v444_v31  }
 0x11e   : > { %v528_v33 = vmul.f32 0.5, %v527_v32 }
 0x120   : > { %v529_v34 = vsub.f32 1.5, %v528_v33  ;;  %v633_v33 = vld [vmem:[%s1182_s4] sm:$0xff] }
 0x121   : > { %v971_v35 = vpop.eup %970 }
 0x122   : > { %v536_v36 = vmul.f32 %v971_v35, %v524_v29  ;;  %v530_v37 = vmul.f32 %v969_v28, %v529_v34  ;;  %vm542_vm5 = vweird.f32 %v971_v35 }
 0x123   : > { %vm543_vm7 = vmor %vm541_vm6, %vm542_vm5  ;;  %vm660_vm5 = vcmask 392192  }
 0x124   : > { %v537_v39 = vmul.f32 %v971_v35, %v536_v36  ;;  %v534_v40 = vsel %vm533_vm4, %v969_v28, %v530_v37  ;;  %v685_v28 = vld [vmem:[%s1185_s7] sm:$0xff]  ;;  %vm1133_vm4 = vmneg %vm643_vm3 }
 0x125   : > { %559 = vperm.xlu1 %967, %v534_v40   ;;  %571 = vperm.xlu2 %965, %v443_v38  }
 0x126   : > { %v538_v41 = vmul.f32 0.5, %v537_v39 }
 0x128   : > { %v539_v42 = vsub.f32 1.5, %v538_v41 }
 0x12a   : > { %v540_v44 = vmul.f32 %v971_v35, %v539_v42  ;;  %v838_v42 = vld [vmem:[%s1190_s12] sm:$0xff] }
 0x12c   : > { %v544_v45 = vsel %vm543_vm7, %v971_v35, %v540_v44  ;;  %v837_v35 = vld [vmem:[%s1189_s11] sm:$0xff] }
 0x12d   : > { %588 = vperm.xlu2 %965, %v446_v43   ;;  %564 = vperm.xlu0 %966, %v544_v45   ;;  %v684_v43 = vld [vmem:[%s1184_s6] sm:$0xff] }
 0x12e   : > { %950 = vmatmul.msk.f32.vlgmr.msrb.gmra.mxu0 %vm462_vm1, %v837_v35  ;;  %vm694_vm1 = vcmask 64512  }
 0x135   : > { %583 = vperm.xlu2 %965, %v445_v46  }
 0x167   : > { %v548_v47 = vpop.permute.xlu2 %547 }
 0x168   : > { %v555_v52 = vsub.f32 %v1087_v3, %v548_v47 }
 0x16f   : > { %v553_v48 = vpop.permute.xlu2 %552 }
 0x170   : > { %v556_v58 = vsub.f32 %v1081_v0, %v553_v48 }
 0x177   : > { %v577_v49 = vpop.permute.xlu2 %576 }
 0x17f   : > { %v572_v50 = vpop.permute.xlu2 %571 }
 0x187   : > { %v589_v51 = vpop.permute.xlu2 %588 }
 0x18f   : > { %v584_v56 = vpop.permute.xlu2 %583 }
 0x197   : > { %v560_v53 = vpop.permute.xlu1 %559 }
 0x198   : > { %v567_v54 = vmul.f32 %v560_v53, %v555_v52 }
 0x19a   : > { %v579_v55 = vmul.f32 %v572_v50, %v567_v54 }
 0x19c   : > { %v591_v57 = vadd.f32 %v584_v56, %v579_v55 }
 0x19e   : > { %v934_v59 = vmul.f32 -1.442695, %v591_v57 }
 0x19f   : > { %v565_v60 = vpop.permute.xlu0 %564 }
 0x1a0   : > { %972 = vpow2.f32 %v934_v59  ;;  %v568_v61 = vmul.f32 %v565_v60, %v556_v58  ;;  %v686_v60 = vld [vmem:[%s1186_s8] sm:$0xff] }
 0x1a2   : > { %v580_v62 = vmul.f32 %v577_v49, %v568_v61 }
 0x1a4   : > { %v592_v63 = vadd.f32 %v589_v51, %v580_v62 }
 0x1a6   : > { %v973_v1 = vpop.eup %972  ;;  %v935_v2 = vmul.f32 -1.442695, %v592_v63 }
 0x1a7   : > { %v599_v4 = vadd.f32 1.0, %v973_v1 }
 0x1a8   : > { %974 = vpow2.f32 %v935_v2 }
 0x1a9   : > { %976 = vrcp.f32 %v599_v4  ;;  %v612_v9 = vand.u32 2147483648, %v599_v4  ;;  %v610_v0 = vand.u32 2147483647, %v599_v4  ;;  %vm606_vm9 = vweird.f32 %v599_v4 }
 0x1ab   : > { %v613_v13 = vor.u32 1.1754944e-38, %v612_v9  ;;  %vm611_vm11 = vcmp.eq.f32.partialorder %v610_v0, 8.507059e+37 }
 0x1ae   : > { %v975_v5 = vpop.eup %974 }
 0x1af   : > { %v977_v3 = vpop.eup %976  ;;  %v600_v6 = vadd.f32 1.0, %v975_v5 }
 0x1b0   : > { %v602_v7 = vmul.f32 %v977_v3, %v599_v4  ;;  %vm607_vm8 = vweird.f32 %v977_v3 }
 0x1b1   : > { %978 = vrcp.f32 %v600_v6  ;;  %vm608_vm10 = vmor %vm606_vm9, %vm607_vm8  ;;  %v627_v19 = vand.u32 2147483648, %v600_v6  ;;  %v625_v21 = vand.u32 2147483647, %v600_v6  ;;  %vm621_vm13 = vweird.f32 %v600_v6 }
 0x1b2   : > { %v603_v8 = vsub.f32 1.0, %v602_v7 }
 0x1b3   : > { %v628_v23 = vor.u32 1.1754944e-38, %v627_v19  ;;  %vm626_vm15 = vcmp.eq.f32.partialorder %v625_v21, 8.507059e+37  ;;  %v798_v19 = vld [vmem:[%s1188_s10] sm:$0xff] }
 0x1b4   : > { %v604_v10 = vmul.f32 %v977_v3, %v603_v8  ;;  %v797_v21 = vld [vmem:[%s1187_s9] sm:$0xff] }
 0x1b6   : > { %v605_v11 = vadd.f32 %v977_v3, %v604_v10 }
 0x1b7   : > { %v979_v12 = vpop.eup %978 }
 0x1b8   : > { %v609_v14 = vsel %vm608_vm10, %v977_v3, %v605_v11  ;;  %v617_v15 = vmul.f32 %v979_v12, %v600_v6  ;;  %vm622_vm12 = vweird.f32 %v979_v12 }
 0x1b9   : > { %v614_v16 = vsel %vm611_vm11, %v613_v13, %v609_v14  ;;  %vm623_vm14 = vmor %vm621_vm13, %vm622_vm12  ;;  %vm813_vm13 = vcmask 195584  }
 0x1ba   : > { %v631_v17 = vmul.f32 %v614_v16, %v591_v57  ;;  %v618_v18 = vsub.f32 1.0, %v617_v15 }
 0x1bc   : > { %646 = vrot.lane.b32.xlu2 %v631_v17, %s995_s28  ;;  %637 = vrot.lane.b32.xlu0 %v631_v17, %s996_s29  ;;  %v619_v20 = vmul.f32 %v979_v12, %v618_v18 }
 0x1be   : > { %v620_v22 = vadd.f32 %v979_v12, %v619_v20 }
 0x1c0   : > { %v624_v24 = vsel %vm623_vm14, %v979_v12, %v620_v22 }
 0x1c1   : > { %v629_v26 = vsel %vm626_vm15, %v628_v23, %v624_v24  ;;  %v864_v23 = vpop.f32.mrf.mxu0 }
 0x1c2   : > { %v632_v27 = vmul.f32 %v629_v26, %v592_v63 }
 0x1c4   : > { %657 = vperm.xlu2 %965, %v634_v25   ;;  %648 = vrot.lane.b32.xlu1 %v632_v27, %s995_s28 }
 0x1cc   : > { %767 = vperm.xlu2 %965, %v685_v28   ;;  %639 = vrot.lane.b32.xlu1 %v632_v27, %s996_s29 }
 0x216   : > { %v647_v30 = vpop.permute.xlu2 %646 }
 0x21e   : > { %v658_v36 = vpop.permute.xlu2 %657 }
 0x226   : > { %v768_v61 = vpop.permute.xlu2 %767 }
 0x22e   : > { %v638_v34 = vpop.permute.xlu0 %637 }
 0x236   : > { %v649_v29 = vpop.permute.xlu1 %648 }
 0x237   : > { %936 = vmatpush.msk.msra.mxu2 %vm652_vm2, %v649_v29 }
 0x239   : > { %937 = vmatpush.msk.msra.mxu2 %vm652_vm2, %v647_v30 }
 0x23b   : > { %676 = vmatpush.msra.mxu2 %v632_v27 }
 0x23d   : > { %677 = vmatpush.msra.mxu2 %v631_v17 }
 0x23e   : > { %v640_v32 = vpop.permute.xlu1 %639 }
 0x23f   : > { %939 = vmatpush.msk.msra.mxu2 %vm1133_vm4, %v640_v32 }
 0x241   : > { %941 = vmatpush.msk.msra.mxu2 %vm1133_vm4, %v638_v34 }
 0x242   : > { %942 = vmatmul.msk.f32.vlgmr.msra.gmra.mxu2 %vm660_vm5, %v633_v33 }
 0x2c5   : > { %v681_v37 = vpop.f32.mrf.mxu2 }
 0x2c6   : > { %v682_v38 = vadd.f32 %v681_v37, %v658_v36 }
 0x2c8   : > { %v687_v39 = vsel %vm447_vm0, %v682_v38, 0.0  ;;  %v690_v40 = vmul.f32 %v682_v38, %v682_v38 }
 0x2c9   : > { %688 = vadd.xlane.f32.xlu1 %v687_v39 }
 0x2ca   : > { %v691_v41 = vsel %vm447_vm0, %v690_v40, 0.0 }
 0x2cb   : > { %692 = vadd.xlane.f32.xlu0 %v691_v41 }
 0x2df   : > { %841 = vperm.xlu0 %966, %v838_v42  }
 0x33c   : > { %v689_v44 = vpop.xlane.xlu1 %688 }
 0x33d   : > { %713 = vmatpush.msra.mxu3 %v689_v44 }
 0x33e   : > { %v693_v45 = vpop.xlane.xlu0 %692  ;;  %943 = vmatmul.msk.f32.vlgmr.msra.gmra.mxu3 %vm694_vm1, %v684_v43 }
 0x33f   : > { %733 = vmatpush.msrb.mxu3 %v693_v45 }
 0x346   : > { %944 = vmatmul.msk.f32.vlgmr.msrb.gmra.mxu3 %vm694_vm1, %v684_v43 }
 0x351   : > { %v842_v24 = vpop.permute.xlu0 %841 }
 0x352   : > { %v865_v27 = vadd.f32 %v864_v23, %v842_v24 }
 0x3c1   : > { %v715_v46 = vpop.f32.mrf.mxu3 }
 0x3c2   : > { %v738_v47 = vmul.f32 0.0078125, %v715_v46 }
 0x3c4   : > { %755 = vperm.xlu2 %965, %v738_v47   ;;  %v740_v49 = vmul.f32 %v738_v47, %v738_v47 }
 0x3c9   : > { %v735_v48 = vpop.f32.mrf.mxu3 }
 0x3ca   : > { %v739_v50 = vmul.f32 0.0078125, %v735_v48 }
 0x3cc   : > { %v741_v51 = vsub.f32 %v739_v50, %v740_v49 }
 0x3ce   : > { %v742_v52 = vadd.f32 1e-06, %v741_v51 }
 0x3d0   : > { %980 = vrsqrt.f32 %v742_v52  ;;  %vm749_vm7 = vweird.f32 %v742_v52 }
 0x3d6   : > { %v981_v53 = vpop.eup %980 }
 0x3d7   : > { %v744_v54 = vmul.f32 %v981_v53, %v742_v52  ;;  %vm750_vm6 = vweird.f32 %v981_v53 }
 0x3d8   : > { %vm751_vm8 = vmor %vm749_vm7, %vm750_vm6 }
 0x3d9   : > { %v745_v55 = vmul.f32 %v981_v53, %v744_v54 }
 0x3db   : > { %v746_v56 = vmul.f32 0.5, %v745_v55 }
 0x3dd   : > { %v747_v57 = vsub.f32 1.5, %v746_v56 }
 0x3df   : > { %v748_v58 = vmul.f32 %v981_v53, %v747_v57 }
 0x3e1   : > { %v752_v59 = vsel %vm751_vm8, %v981_v53, %v748_v58 }
 0x3e2   : > { %761 = vperm.xlu2 %965, %v752_v59  }
 0x3ea   : > { %773 = vperm.xlu2 %965, %v686_v60  }
 0x41e   : > { %v756_v62 = vpop.permute.xlu2 %755 }
 0x41f   : > { %v758_v1 = vsub.f32 %v682_v38, %v756_v62 }
 0x43c   : > { %v762_v63 = vpop.permute.xlu2 %761 }
 0x43d   : > { %v764_v2 = vmul.f32 %v762_v63, %v758_v1 }
 0x43f   : > { %v770_v4 = vmul.f32 %v768_v61, %v764_v2 }
 0x444   : > { %v774_v5 = vpop.permute.xlu2 %773 }
 0x445   : > { %v776_v3 = vadd.f32 %v774_v5, %v770_v4 }
 0x447   : > { %v945_v6 = vmul.f32 -1.442695, %v776_v3 }
 0x449   : > { %982 = vpow2.f32 %v945_v6 }
 0x44f   : > { %v983_v7 = vpop.eup %982 }
 0x450   : > { %v780_v8 = vadd.f32 1.0, %v983_v7 }
 0x452   : > { %984 = vrcp.f32 %v780_v8  ;;  %v792_v11 = vand.u32 2147483648, %v780_v8  ;;  %v790_v13 = vand.u32 2147483647, %v780_v8  ;;  %vm786_vm10 = vweird.f32 %v780_v8 }
 0x454   : > { %v793_v15 = vor.u32 1.1754944e-38, %v792_v11  ;;  %vm791_vm12 = vcmp.eq.f32.partialorder %v790_v13, 8.507059e+37 }
 0x458   : > { %v985_v9 = vpop.eup %984 }
 0x459   : > { %v782_v10 = vmul.f32 %v985_v9, %v780_v8  ;;  %vm787_vm9 = vweird.f32 %v985_v9 }
 0x45a   : > { %vm788_vm11 = vmor %vm786_vm10, %vm787_vm9 }
 0x45b   : > { %v783_v0 = vsub.f32 1.0, %v782_v10 }
 0x45d   : > { %v784_v12 = vmul.f32 %v985_v9, %v783_v0 }
 0x45f   : > { %v785_v14 = vadd.f32 %v985_v9, %v784_v12 }
 0x461   : > { %v789_v16 = vsel %vm788_vm11, %v985_v9, %v785_v14 }
 0x462   : > { %v794_v17 = vsel %vm791_vm12, %v793_v15, %v789_v16 }
 0x463   : > { %v796_v18 = vmul.f32 %v794_v17, %v776_v3 }
 0x465   : > { %800 = vrot.lane.b32.xlu1 %v796_v18, %s996_s29  ;;  %804 = vrot.lane.b32.xlu2 %v796_v18, %s995_s28  ;;  %s929_s28 = sshll.u32 %s1195_s26, 3 }
 0x466   : > { %s438_s19 = scalar_lea.vmem %s1191_s13, %s929_s28 }
 0x46d   : > { %810 = vperm.xlu2 %965, %v798_v19  }
 0x4bf   : > { %v805_v20 = vpop.permute.xlu2 %804 }
 0x4c0   : > { %946 = vmatpush.msk.msra.mxu3 %vm652_vm2, %v805_v20 }
 0x4c2   : > { %831 = vmatpush.msra.mxu3 %v796_v18 }
 0x4c7   : > { %v811_v25 = vpop.permute.xlu2 %810 }
 0x4d7   : > { %v801_v22 = vpop.permute.xlu1 %800 }
 0x4d8   : > { %948 = vmatpush.msk.msra.mxu3 %vm1133_vm4, %v801_v22 }
 0x4d9   : > { %949 = vmatmul.msk.f32.vlgmr.msra.gmra.mxu3 %vm813_vm13, %v797_v21 }
 0x55c   : > { %v834_v26 = vpop.f32.mrf.mxu3 }
 0x55d   : > { %v835_v28 = vadd.f32 %v834_v26, %v811_v25 }
 0x55f   : > { %v867_v29 = vadd.f32 %v865_v27, %v835_v28 }
 0x561   : > { %868 = vst.msk [vmem:[%s438_s19] sm:$0xff] %vm447_vm0, %v867_v29 }
 0x562 PF: > { %s23_s25 = sadd.s32 1, %s992_s25  }
 0x563   : > { %p20_p4 = scmp.ge.s32.totalorder %s23_s25, 4  }
 0x565   :  { %22 = sbr.rel (!%p20_p4) target bundleno = 1 (0x1), region = 102 }

// kernel: _lambda_.25
= control target key start
LH: loop header
LB: loop body
LE: loop exit
PB: predicated region body
PF: predicated region fallthrough
CT: control target
= control target key end

     0   :  { %11 = vsyncpa [#allocation3], 0  ;;  %s751_s0 = inlined_call_operand.vmem [shape: f32[2,8,64], index: 0, kind: input, shape index: {}]   ;;  %s752_s1 = inlined_call_operand.vmem [shape: f32[8,8], index: 1, kind: input, shape index: {}]   ;;  %s753_s2 = inlined_call_operand.vmem [shape: f32[8,1], index: 2, kind: input, shape index: {}]   ;;  %s754_s3 = inlined_call_operand.vmem [shape: f32[8,1], index: 3, kind: input, shape index: {}]   ;;  %s755_s4 = inlined_call_operand.vmem [shape: f32[2,24], index: 4, kind: input, shape index: {}]   ;;  %s756_s5 = inlined_call_operand.vmem [shape: f32[2,1], index: 5, kind: input, shape index: {}]   ;;  %s757_s6 = inlined_call_operand.hbm [shape: f32[2,2,64], index: 6, kind: output, shape index: {}]  }
   0x1   :  { %13 = vsyncpa [#allocation3 + $0x1], 0  ;;  %s651_s21 = smov 0   ;;  %s653_s22 = smov 0  }
   0x2   :  { %s655_s23 = smov 0   ;;  %s657_s24 = smov 0  }
   0x3 LB: > { %s672_s25 = sadd.s32 4294967295, %s611_s24   ;;  %s481_s26 = sadd.s32 4294967294, %s611_s24   ;;  %s611_s24 = sphi %s657_s24, %s763_s24   ;;  %s607_s23 = sphi %s655_s23, %s762_s23   ;;  %s603_s22 = sphi %s653_s22, %s761_s22   ;;  %s599_s21 = sphi %s651_s21, %s760_s21  }
   0x4   : > { %s676_s27 = sadd.s32 1, %s611_s24   ;;  %s157_s28 = sadd.s32 1, %s607_s23 }
   0x5   : > { %s154_s29 = ssub.s32 %s611_s24, %s676_s27  ;;  %p167_p0 = scmp.ne.s32.totalorder %s607_s23, %s603_s22 }
   0x6   : > { %p155_p1 = scmp.eq.s32.totalorder %s154_s29, 0  ;;  %p168_p2 = scmp.eq.s32.totalorder %s672_s25, 1 }
   0x7   : > { %p173_p3 = scmp.ne.s32.totalorder %s603_s22, %s599_s21  ;;  %p174_p4 = scmp.eq.s32.totalorder %s481_s26, 1 }
   0x8   : > { %s687_s30 = scalar_select %p155_p1, %s607_s23, %s157_s28  }
   0x9   : > { %p689_p5 = por %p168_p2, %p167_p0  ;;  %p693_p6 = por %p174_p4, %p173_p3 }
   0xa   : > { %p484_p7 = scmp.ge.s32.totalorder %s611_s24, 1  ;;  %p214_p8 = scmp.lt.s32.totalorder %s611_s24, 3 }
   0xc   : > { %p215_p9 = pnand %p484_p7, %p214_p8 }
   0xd   : > { %p243_p10 = scmp.lt.s32.totalorder (!%p215_p9), %s672_s25, 1  ;;  %s614_s28 = smov (!%p215_p9), 1  }
   0xe   : > { %218 = sbr.rel (%p215_p9) target bundleno = 708 (0x2c4), region = 44  ;;  %s615_s29 = smov (!%p215_p9), 127  }
   0xf   : > { %s240_s11 = sand.u32 (!%p215_p9), 1, %s603_s22  }
  0x10   : > { %s485_s12 = sshll.u32 (!%p215_p9), %s240_s11, 1  ;;  %s407_s20 = scalar_lea.sflag (!%p215_p9), [#allocation3], %s240_s11 }
  0x11   : > { %s242_s17 = scalar_lea.vmem (!%p215_p9), [#allocation2], %s485_s12 }
  0x12   : > { %s419_s18 = sshll.u32 (!%p215_p9), %s242_s17, 4  ;;  %s420_s18 = int_to_ptr.vmem [resolvable:$true] %s419_s18 }
  0x13   : > { %s244_s9 = scalar_select %p243_p10, %s672_s25, 1  ;;  %vm251_vm0 = vcmask 523264   ;;  %v248_v4 = vld [vmem:[%s752_s1] sm:$0xff]  ;;  %vm259_vm1 = vcmask 64512   ;;  %v613_v7 = vmov 0   ;;  %vm373_vm9 = vcmask 515072  }
  0x14   : > { %540 = vset.pattern.permute.xlu1 %v613_v7  ;;  %541 = vset.pattern.permute.xlu2 %v613_v7  ;;  %v249_v10 = vld [vmem:[%s753_s2] sm:$0xff]  ;;  %vm368_vm10 = vcmask 7168   ;;  %vm380_vm12 = vcmask 195584   ;;  %vm404_vm13 = vcmask 517120  }
  0x15   : > { %s486_s10 = sshll.u32 %s244_s9, 3  ;;  %542 = vset.pattern.permute.xlu0 %v613_v7  ;;  %332 = vperm.xlu2 %541, %v249_v10   ;;  %v250_v12 = vld [vmem:[%s754_s3] sm:$0xff]  ;;  %vm491_vm11 = vmneg %vm368_vm10  ;;  %s569_s9 = scalar_lea.hbm %s757_s6, 4 }
  0x16   : > { %s246_s13 = scalar_lea.vmem %s751_s0, %s486_s10  ;;  %v363_v17 = vld [vmem:[%s756_s5] sm:$0x3] }
  0x17   : > { %v247_v0 = vld [vmem:[%s246_s13] sm:$0xff]  ;;  %s495_s13 = sshll.u32 %s672_s25, 1 }
  0x18   : > { %v252_v1 = vsel %vm251_vm0, %v247_v0, 0.0  ;;  %v255_v2 = vmul.f32 %v247_v0, %v247_v0  ;;  %v362_v48 = vld [vmem:[%s755_s4] sm:$0x3]  ;;  %s417_s16 = scalar_lea.hbm %s757_s6, %s495_s13 }
  0x19   : > { %253 = vadd.xlane.f32.xlu0 %v252_v1  ;;  %s421_s19 = sshll.u32 %s417_s16, 4  ;;  %s422_s19 = int_to_ptr.hbm [resolvable:$true] %s421_s19 }
  0x1a   : > { %v256_v3 = vsel %vm251_vm0, %v255_v2, 0.0  ;;  %s563_s26 = sshra.s32 %s422_s19, 4  ;;  %s564_s26 = int_to_ptr.hbm [resolvable:$true] %s563_s26 }
  0x1b   : > { %p570_p0 = scmp.lt.s32.totalorder %s564_s26, %s757_s6 }
  0x1d   : > { %338 = vperm.xlu2 %541, %v250_v12  }
  0x21   : > { %257 = vadd.xlane.f32.xlu0 %v256_v3 }
  0x25   : > { %377 = vperm.xlu2 %541, %v363_v17  }
  0x6f   : > { %v333_v26 = vpop.permute.xlu2 %332 }
  0x77   : > { %v339_v31 = vpop.permute.xlu2 %338 }
  0x7f   : > { %v378_v50 = vpop.permute.xlu2 %377 }
  0x8c   : > { %v254_v5 = vpop.xlane.xlu0 %253 }
  0x8d   : > { %278 = vmatpush.msra.mxu0 %v254_v5 }
  0x8e   : > { %487 = vmatmul.msk.f32.vlgmr.msra.gmra.mxu0 %vm259_vm1, %v248_v4 }
  0x94   : > { %v258_v6 = vpop.xlane.xlu0 %257 }
  0x95   : > { %298 = vmatpush.msra.mxu1 %v258_v6 }
  0x96   : > { %488 = vmatmul.msk.f32.vlgmr.msra.gmra.mxu1 %vm259_vm1, %v248_v4 }
 0x10b   : > { %v280_v8 = vpop.f32.mrf.mxu0 }
 0x10c   : > { %v303_v9 = vmul.f32 0.0078125, %v280_v8 }
 0x10e   : > { %320 = vperm.xlu1 %540, %v303_v9   ;;  %v305_v11 = vmul.f32 %v303_v9, %v303_v9 }
 0x113   : > { %v300_v13 = vpop.f32.mrf.mxu1 }
 0x114   : > { %v304_v14 = vmul.f32 0.0078125, %v300_v13 }
 0x116   : > { %v306_v15 = vsub.f32 %v304_v14, %v305_v11 }
 0x118   : > { %v307_v16 = vadd.f32 1e-06, %v306_v15 }
 0x11a   : > { %543 = vrsqrt.f32 %v307_v16  ;;  %vm314_vm3 = vweird.f32 %v307_v16 }
 0x120   : > { %v544_v18 = vpop.eup %543 }
 0x121   : > { %v309_v19 = vmul.f32 %v544_v18, %v307_v16  ;;  %vm315_vm2 = vweird.f32 %v544_v18 }
 0x122   : > { %vm316_vm4 = vmor %vm314_vm3, %vm315_vm2 }
 0x123   : > { %v310_v20 = vmul.f32 %v544_v18, %v309_v19 }
 0x125   : > { %v311_v21 = vmul.f32 0.5, %v310_v20 }
 0x127   : > { %v312_v22 = vsub.f32 1.5, %v311_v21 }
 0x129   : > { %v313_v23 = vmul.f32 %v544_v18, %v312_v22 }
 0x12b   : > { %v317_v24 = vsel %vm316_vm4, %v544_v18, %v313_v23 }
 0x12c   : > { %326 = vperm.xlu1 %540, %v317_v24  }
 0x180   : > { %v321_v25 = vpop.permute.xlu1 %320 }
 0x181   : > { %v323_v27 = vsub.f32 %v247_v0, %v321_v25 }
 0x19e   : > { %v327_v28 = vpop.permute.xlu1 %326 }
 0x19f   : > { %v329_v29 = vmul.f32 %v327_v28, %v323_v27 }
 0x1a1   : > { %v335_v30 = vmul.f32 %v333_v26, %v329_v29 }
 0x1a3   : > { %v341_v32 = vadd.f32 %v339_v31, %v335_v30 }
 0x1a5   : > { %v489_v33 = vmul.f32 -1.442695, %v341_v32 }
 0x1a7   : > { %545 = vpow2.f32 %v489_v33 }
 0x1ad   : > { %v546_v34 = vpop.eup %545 }
 0x1ae   : > { %v345_v35 = vadd.f32 1.0, %v546_v34 }
 0x1b0   : > { %547 = vrcp.f32 %v345_v35  ;;  %v357_v39 = vand.u32 2147483648, %v345_v35  ;;  %v355_v41 = vand.u32 2147483647, %v345_v35  ;;  %vm351_vm6 = vweird.f32 %v345_v35 }
 0x1b2   : > { %v358_v43 = vor.u32 1.1754944e-38, %v357_v39  ;;  %vm356_vm8 = vcmp.eq.f32.partialorder %v355_v41, 8.507059e+37 }
 0x1b6   : > { %v548_v36 = vpop.eup %547 }
 0x1b7   : > { %v347_v37 = vmul.f32 %v548_v36, %v345_v35  ;;  %vm352_vm5 = vweird.f32 %v548_v36 }
 0x1b8   : > { %vm353_vm7 = vmor %vm351_vm6, %vm352_vm5 }
 0x1b9   : > { %v348_v38 = vsub.f32 1.0, %v347_v37 }
 0x1bb   : > { %v349_v40 = vmul.f32 %v548_v36, %v348_v38 }
 0x1bd   : > { %v350_v42 = vadd.f32 %v548_v36, %v349_v40 }
 0x1bf   : > { %v354_v44 = vsel %vm353_vm7, %v548_v36, %v350_v42 }
 0x1c0   : > { %v359_v45 = vsel %vm356_vm8, %v358_v43, %v354_v44 }
 0x1c1   : > { %v361_v46 = vmul.f32 %v359_v45, %v341_v32 }
 0x1c3   : > { %365 = vrot.lane.b32.xlu1 %v361_v46, %s614_s28  ;;  %370 = vrot.lane.b32.xlu0 %v361_v46, %s615_s29  ;;  %s565_s28 = scalar_lea.hbm %s564_s26, 2 }
 0x1c4   : > { %p566_p11 = scmp.ne.s32.totalorder %s564_s26, %s565_s28  ;;  %p571_p1 = scmp.lt.s32.totalorder %s569_s9, %s565_s28 }
 0x1c6   : > { %p567_p12 = pnand %p566_p11, %p689_p5  ;;  %p572_p2 = por %p571_p1, %p570_p0 }
 0x1c8   : > { %p568_p13 = pneg %p567_p12 }
 0x1ca   : > { %p573_p3 = pnand %p572_p2, %p568_p13 }
 0x235   : > { %v371_v47 = vpop.permute.xlu0 %370  ;;  %v366_v49 = vpop.permute.xlu1 %365 }
 0x236   : > { %490 = vmatpush.msk.msra.mxu2 %vm373_vm9, %v371_v47 }
 0x238   : > { %398 = vmatpush.msra.mxu2 %v361_v46 }
 0x23a   : > { %492 = vmatpush.msk.msra.mxu2 %vm491_vm11, %v366_v49 }
 0x23b   : > { %493 = vmatmul.msk.f32.vlgmr.msra.gmra.mxu2 %vm380_vm12, %v362_v48 }
 0x2be   : > { %v401_v51 = vpop.f32.mrf.mxu2 }
 0x2bf   : > { %v402_v52 = vadd.f32 %v401_v51, %v378_v50 }
 0x2c1   : > { %405 = vst.msk [vmem:[%s242_s17] sm:$0x3] %vm404_vm13, %v402_v52 }
 0x2c2   : > { %576 = shalt.err (!%p573_p3)
}
 0x2c3   : > { %498 = dma.vmem_to_hbm [thread:$0]  (%p689_p5), %s420_s18, 32, %s422_s19, %s407_s20  }
 0x2c4 PF: > { %p504_p4 = scmp.ge.s32.totalorder %s611_s24, 2  ;;  %s433_s11 = sand.u32 1, %s599_s21  }
 0x2c5   : > { %s434_s13 = scalar_lea.sflag [#allocation3], %s433_s11 }
 0x2c6   : > { %p501_p7 = pnand %p504_p4, %p693_p6 }
 0x2c8   : > { %p502_p8 = pneg %p501_p7 }
 0x2ca   : > { %594 = dma.done.wait (%p502_p8), %s434_s13, 32  }
 0x2cb   : > { %596 = vsyncadd (%p502_p8), %s434_s13, 4294967264  ;;  %p16_p9 = scmp.ge.s32.totalorder %s676_s27, 4   ;;  %s760_s21 = smov %s603_s22 }
 0x2cc   : > { %s761_s22 = smov %s607_s23  ;;  %s762_s23 = smov %s687_s30 }
 0x2cd   : > { %s763_s24 = smov %s676_s27  ;;  %18 = sbr.rel (!%p16_p9) target bundleno = 3 (0x3), region = 79 }
 0x2d2   :  { %440 = vsyncpa [#allocation3], 1 }
 0x2d3   :  { %442 = vsyncpa [#allocation3 + $0x1], 1 }

// kernel: _lambda_.23
= control target key start
LH: loop header
LB: loop body
LE: loop exit
PB: predicated region body
PF: predicated region fallthrough
CT: control target
= control target key end

     0   :  { %s865_s17 = smov 0   ;;  %s951_s0 = inlined_call_operand.vmem [shape: f32[2,8,64], index: 0, kind: input, shape index: {}]   ;;  %s952_s1 = inlined_call_operand.vmem [shape: f32[8,8], index: 1, kind: input, shape index: {}]   ;;  %s953_s2 = inlined_call_operand.vmem [shape: f32[8,1], index: 2, kind: input, shape index: {}]   ;;  %s954_s3 = inlined_call_operand.vmem [shape: f32[8,1], index: 3, kind: input, shape index: {}]   ;;  %s955_s4 = inlined_call_operand.vmem [shape: f32[8,24], index: 4, kind: input, shape index: {}]   ;;  %s956_s5 = inlined_call_operand.vmem [shape: f32[8,1], index: 5, kind: input, shape index: {}]   ;;  %s957_s6 = inlined_call_operand.vmem [shape: f32[8,8], index: 6, kind: input, shape index: {}]   ;;  %s958_s7 = inlined_call_operand.vmem [shape: f32[8,1], index: 7, kind: input, shape index: {}]   ;;  %s959_s8 = inlined_call_operand.vmem [shape: f32[8,1], index: 8, kind: input, shape index: {}]   ;;  %s960_s9 = inlined_call_operand.vmem [shape: f32[8,24], index: 9, kind: input, shape index: {}]   ;;  %s961_s10 = inlined_call_operand.vmem [shape: f32[8,1], index: 10, kind: input, shape index: {}]   ;;  %s962_s11 = inlined_call_operand.vmem [shape: f32[2,8,64], index: 11, kind: output, shape index: {}]  }
   0x1 LB: > { %s745_s18 = sadd.s32 4294967295, %s800_s17   ;;  %p749_p0 = scmp.ge.s32.totalorder %s800_s17, 1  ;;  %s800_s17 = sphi %s865_s17, %s21_s17  }
   0x2   : > { %p336_p1 = scmp.lt.s32.totalorder %s800_s17, 3 }
   0x4   : > { %p337_p2 = pnand %p749_p0, %p336_p1 }
   0x5   : > { %p374_p3 = scmp.lt.s32.totalorder (!%p337_p2), %s745_s18, 1  ;;  %s803_s12 = smov (!%p337_p2), 1  }
   0x6   : > { %340 = sbr.rel (%p337_p2) target bundleno = 1380 (0x564), region = 64  ;;  %s804_s13 = smov (!%p337_p2), 127  }
   0xb   : > { %s966_s18 = smov (!%p374_p3, %s745_s18), 1  ;;  %vm386_vm0 = vcmask 523264   ;;  %v383_v4 = vld [vmem:[%s952_s1] sm:$0xff]  ;;  %vm394_vm1 = vcmask 64512   ;;  %v802_v7 = vmov 0   ;;  %vm508_vm9 = vcmask 515072  }
   0xc   : > { %s750_s19 = sshll.u32 %s966_s18, 3  ;;  %779 = vset.pattern.permute.xlu1 %v802_v7  ;;  %780 = vset.pattern.permute.xlu2 %v802_v7  ;;  %v384_v10 = vld [vmem:[%s953_s2] sm:$0xff]  ;;  %vm503_vm10 = vcmask 7168   ;;  %vm515_vm12 = vcmask 195584  }
   0xd   : > { %s377_s22 = scalar_lea.vmem %s951_s0, %s750_s19  ;;  %781 = vset.pattern.permute.xlu0 %v802_v7  ;;  %467 = vperm.xlu2 %780, %v384_v10   ;;  %v385_v12 = vld [vmem:[%s954_s3] sm:$0xff]  ;;  %vm906_vm11 = vmneg %vm503_vm10 }
   0xe   : > { %v881_v0 = vld [vmem:[%s377_s22] sm:$0xff] }
   0xf   : > { %v387_v1 = vsel %vm386_vm0, %v881_v0, 0.0  ;;  %v390_v2 = vmul.f32 %v881_v0, %v881_v0  ;;  %v498_v17 = vld [vmem:[%s956_s5] sm:$0xff] }
  0x10   : > { %388 = vadd.xlane.f32.xlu0 %v387_v1  ;;  %v497_v49 = vld [vmem:[%s955_s4] sm:$0xff] }
  0x11   : > { %v391_v3 = vsel %vm386_vm0, %v390_v2, 0.0  ;;  %v541_v57 = vld [vmem:[%s959_s8] sm:$0xff] }
  0x12   : > { %v539_v58 = vld [vmem:[%s957_s6] sm:$0xff] }
  0x15   : > { %473 = vperm.xlu2 %780, %v385_v12   ;;  %v540_v12 = vld [vmem:[%s958_s7] sm:$0xff] }
  0x18   : > { %392 = vadd.xlane.f32.xlu0 %v391_v3 }
  0x1d   : > { %512 = vperm.xlu2 %780, %v498_v17  }
  0x67   : > { %v468_v26 = vpop.permute.xlu2 %467 }
  0x6f   : > { %v474_v31 = vpop.permute.xlu2 %473 }
  0x77   : > { %v513_v51 = vpop.permute.xlu2 %512 }
  0x83   : > { %v389_v5 = vpop.xlane.xlu0 %388 }
  0x84   : > { %413 = vmatpush.msra.mxu0 %v389_v5 }
  0x85   : > { %752 = vmatmul.msk.f32.vlgmr.msra.gmra.mxu0 %vm394_vm1, %v383_v4 }
  0x8b   : > { %v393_v6 = vpop.xlane.xlu0 %392 }
  0x8c   : > { %433 = vmatpush.msra.mxu1 %v393_v6 }
  0x8d   : > { %753 = vmatmul.msk.f32.vlgmr.msra.gmra.mxu1 %vm394_vm1, %v383_v4 }
 0x102   : > { %v415_v8 = vpop.f32.mrf.mxu0 }
 0x103   : > { %v438_v9 = vmul.f32 0.0078125, %v415_v8 }
 0x105   : > { %455 = vperm.xlu1 %779, %v438_v9   ;;  %v440_v11 = vmul.f32 %v438_v9, %v438_v9 }
 0x10a   : > { %v435_v13 = vpop.f32.mrf.mxu1 }
 0x10b   : > { %v439_v14 = vmul.f32 0.0078125, %v435_v13 }
 0x10d   : > { %v441_v15 = vsub.f32 %v439_v14, %v440_v11 }
 0x10f   : > { %v442_v16 = vadd.f32 1e-06, %v441_v15 }
 0x111   : > { %782 = vrsqrt.f32 %v442_v16  ;;  %vm449_vm3 = vweird.f32 %v442_v16 }
 0x117   : > { %v783_v18 = vpop.eup %782 }
 0x118   : > { %v444_v19 = vmul.f32 %v783_v18, %v442_v16  ;;  %vm450_vm2 = vweird.f32 %v783_v18 }
 0x119   : > { %vm451_vm4 = vmor %vm449_vm3, %vm450_vm2 }
 0x11a   : > { %v445_v20 = vmul.f32 %v783_v18, %v444_v19 }
 0x11c   : > { %v446_v21 = vmul.f32 0.5, %v445_v20 }
 0x11e   : > { %v447_v22 = vsub.f32 1.5, %v446_v21 }
 0x120   : > { %v448_v23 = vmul.f32 %v783_v18, %v447_v22 }
 0x122   : > { %v452_v24 = vsel %vm451_vm4, %v783_v18, %v448_v23 }
 0x123   : > { %461 = vperm.xlu1 %779, %v452_v24  }
 0x177   : > { %v456_v25 = vpop.permute.xlu1 %455 }
 0x178   : > { %v458_v27 = vsub.f32 %v881_v0, %v456_v25 }
 0x195   : > { %v462_v28 = vpop.permute.xlu1 %461 }
 0x196   : > { %v464_v29 = vmul.f32 %v462_v28, %v458_v27 }
 0x198   : > { %v470_v30 = vmul.f32 %v468_v26, %v464_v29 }
 0x19a   : > { %v476_v32 = vadd.f32 %v474_v31, %v470_v30 }
 0x19c   : > { %v754_v33 = vmul.f32 -1.442695, %v476_v32 }
 0x19e   : > { %784 = vpow2.f32 %v754_v33 }
 0x1a4   : > { %v785_v34 = vpop.eup %784 }
 0x1a5   : > { %v480_v35 = vadd.f32 1.0, %v785_v34 }
 0x1a7   : > { %786 = vrcp.f32 %v480_v35  ;;  %v492_v39 = vand.u32 2147483648, %v480_v35  ;;  %v490_v41 = vand.u32 2147483647, %v480_v35  ;;  %vm486_vm6 = vweird.f32 %v480_v35 }
 0x1a9   : > { %v493_v43 = vor.u32 1.1754944e-38, %v492_v39  ;;  %vm491_vm8 = vcmp.eq.f32.partialorder %v490_v41, 8.507059e+37 }
 0x1ad   : > { %v787_v36 = vpop.eup %786 }
 0x1ae   : > { %v482_v37 = vmul.f32 %v787_v36, %v480_v35  ;;  %vm487_vm5 = vweird.f32 %v787_v36  ;;  %v652_v35 = vld [vmem:[%s961_s10] sm:$0xff] }
 0x1af   : > { %vm488_vm7 = vmor %vm486_vm6, %vm487_vm5 }
 0x1b0   : > { %v483_v38 = vsub.f32 1.0, %v482_v37  ;;  %v651_v37 = vld [vmem:[%s960_s9] sm:$0xff] }
 0x1b2   : > { %v484_v40 = vmul.f32 %v787_v36, %v483_v38 }
 0x1b4   : > { %v485_v42 = vadd.f32 %v787_v36, %v484_v40 }
 0x1b6   : > { %v489_v44 = vsel %vm488_vm7, %v787_v36, %v485_v42 }
 0x1b7   : > { %v494_v45 = vsel %vm491_vm8, %v493_v43, %v489_v44 }
 0x1b8   : > { %v496_v46 = vmul.f32 %v494_v45, %v476_v32 }
 0x1ba   : > { %500 = vrot.lane.b32.xlu1 %v496_v46, %s803_s12  ;;  %505 = vrot.lane.b32.xlu0 %v496_v46, %s804_s13 }
 0x22c   : > { %v506_v47 = vpop.permute.xlu0 %505  ;;  %v501_v50 = vpop.permute.xlu1 %500 }
 0x22d   : > { %755 = vmatpush.msk.msra.mxu2 %vm508_vm9, %v506_v47 }
 0x22f   : > { %533 = vmatpush.msra.mxu2 %v496_v46 }
 0x231   : > { %757 = vmatpush.msk.msra.mxu2 %vm906_vm11, %v501_v50 }
 0x232   : > { %758 = vmatmul.msk.f32.vlgmr.msra.gmra.mxu2 %vm515_vm12, %v497_v49 }
 0x2b5   : > { %v536_v52 = vpop.f32.mrf.mxu2 }
 0x2b6   : > { %v537_v53 = vadd.f32 %v536_v52, %v513_v51 }
 0x2b8   : > { %v542_v54 = vsel %vm386_vm0, %v537_v53, 0.0  ;;  %v545_v55 = vmul.f32 %v537_v53, %v537_v53 }
 0x2b9   : > { %543 = vadd.xlane.f32.xlu1 %v542_v54 }
 0x2ba   : > { %v546_v56 = vsel %vm386_vm0, %v545_v55, 0.0 }
 0x2bb   : > { %547 = vadd.xlane.f32.xlu2 %v546_v56 }
 0x2d3   : > { %627 = vperm.xlu2 %780, %v541_v57  }
 0x32c   : > { %v544_v59 = vpop.xlane.xlu1 %543 }
 0x32d   : > { %567 = vmatpush.msra.mxu3 %v544_v59 }
 0x32e   : > { %v548_v60 = vpop.xlane.xlu2 %547  ;;  %759 = vmatmul.msk.f32.vlgmr.msra.gmra.mxu3 %vm394_vm1, %v539_v58 }
 0x32f   : > { %587 = vmatpush.msrb.mxu0 %v548_v60 }
 0x330   : > { %760 = vmatmul.msk.f32.vlgmr.msrb.gmra.mxu0 %vm394_vm1, %v539_v58 }
 0x336   : > { %v628_v19 = vpop.permute.xlu2 %627 }
 0x3ad   : > { %v589_v61 = vpop.f32.mrf.mxu0 }
 0x3ae   : > { %v593_v1 = vmul.f32 0.0078125, %v589_v61 }
 0x3b1   : > { %v569_v62 = vpop.f32.mrf.mxu3 }
 0x3b2   : > { %v592_v63 = vmul.f32 0.0078125, %v569_v62 }
 0x3b4   : > { %v594_v2 = vmul.f32 %v592_v63, %v592_v63  ;;  %609 = vperm.xlu0 %781, %v592_v63  }
 0x3b6   : > { %v595_v3 = vsub.f32 %v593_v1, %v594_v2 }
 0x3b8   : > { %v596_v4 = vadd.f32 1e-06, %v595_v3 }
 0x3ba   : > { %788 = vrsqrt.f32 %v596_v4  ;;  %vm603_vm14 = vweird.f32 %v596_v4 }
 0x3c0   : > { %v789_v5 = vpop.eup %788 }
 0x3c1   : > { %v598_v6 = vmul.f32 %v789_v5, %v596_v4  ;;  %vm604_vm13 = vweird.f32 %v789_v5 }
 0x3c2   : > { %vm605_vm15 = vmor %vm603_vm14, %vm604_vm13 }
 0x3c3   : > { %v599_v7 = vmul.f32 %v789_v5, %v598_v6 }
 0x3c5   : > { %v600_v8 = vmul.f32 0.5, %v599_v7 }
 0x3c7   : > { %v601_v9 = vsub.f32 1.5, %v600_v8 }
 0x3c9   : > { %v602_v10 = vmul.f32 %v789_v5, %v601_v9 }
 0x3cb   : > { %v606_v11 = vsel %vm605_vm15, %v789_v5, %v602_v10 }
 0x3cc   : > { %615 = vperm.xlu0 %781, %v606_v11  }
 0x3d4   : > { %621 = vperm.xlu0 %781, %v540_v12  }
 0x426   : > { %v610_v13 = vpop.permute.xlu0 %609 }
 0x427   : > { %v612_v15 = vsub.f32 %v537_v53, %v610_v13 }
 0x43e   : > { %v616_v14 = vpop.permute.xlu0 %615 }
 0x43f   : > { %v618_v16 = vmul.f32 %v616_v14, %v612_v15 }
 0x446   : > { %v622_v17 = vpop.permute.xlu0 %621 }
 0x447   : > { %v624_v18 = vmul.f32 %v622_v17, %v618_v16 }
 0x449   : > { %v630_v20 = vadd.f32 %v628_v19, %v624_v18 }
 0x44b   : > { %v761_v21 = vmul.f32 -1.442695, %v630_v20 }
 0x44d   : > { %790 = vpow2.f32 %v761_v21 }
 0x453   : > { %v791_v22 = vpop.eup %790 }
 0x454   : > { %v634_v23 = vadd.f32 1.0, %v791_v22 }
 0x456   : > { %792 = vrcp.f32 %v634_v23  ;;  %v646_v27 = vand.u32 2147483648, %v634_v23  ;;  %v644_v29 = vand.u32 2147483647, %v634_v23  ;;  %vm640_vm2 = vweird.f32 %v634_v23 }
 0x458   : > { %v647_v31 = vor.u32 1.1754944e-38, %v646_v27  ;;  %vm645_vm4 = vcmp.eq.f32.partialorder %v644_v29, 8.507059e+37 }
 0x45c   : > { %v793_v24 = vpop.eup %792 }
 0x45d   : > { %v636_v25 = vmul.f32 %v793_v24, %v634_v23  ;;  %vm641_vm1 = vweird.f32 %v793_v24 }
 0x45e   : > { %vm642_vm3 = vmor %vm640_vm2, %vm641_vm1 }
 0x45f   : > { %v637_v26 = vsub.f32 1.0, %v636_v25 }
 0x461   : > { %v638_v28 = vmul.f32 %v793_v24, %v637_v26 }
 0x463   : > { %v639_v30 = vadd.f32 %v793_v24, %v638_v28 }
 0x465   : > { %v643_v32 = vsel %vm642_vm3, %v793_v24, %v639_v30 }
 0x466   : > { %v648_v33 = vsel %vm645_vm4, %v647_v31, %v643_v32 }
 0x467   : > { %v650_v34 = vmul.f32 %v648_v33, %v630_v20 }
 0x469   : > { %654 = vrot.lane.b32.xlu0 %v650_v34, %s803_s12  ;;  %658 = vrot.lane.b32.xlu1 %v650_v34, %s804_s13  ;;  %s381_s12 = scalar_lea.vmem %s962_s11, %s750_s19 }
 0x471   : > { %664 = vperm.xlu0 %781, %v652_v35  }
 0x4db   : > { %v659_v36 = vpop.permute.xlu1 %658  ;;  %v655_v38 = vpop.permute.xlu0 %654 }
 0x4dc   : > { %762 = vmatpush.msk.msrb.mxu1 %vm508_vm9, %v659_v36 }
 0x4de   : > { %684 = vmatpush.msrb.mxu1 %v650_v34 }
 0x4e0   : > { %764 = vmatpush.msk.msrb.mxu1 %vm906_vm11, %v655_v38 }
 0x4e1   : > { %765 = vmatmul.msk.f32.vlgmr.msrb.gmra.mxu1 %vm515_vm12, %v651_v37 }
 0x4e3   : > { %v665_v39 = vpop.permute.xlu0 %664 }
 0x55e   : > { %v687_v40 = vpop.f32.mrf.mxu1 }
 0x55f   : > { %v688_v41 = vadd.f32 %v687_v40, %v665_v39 }
 0x561   : > { %v690_v42 = vadd.f32 %v688_v41, %v881_v0 }
 0x563   : > { %691 = vst.msk [vmem:[%s381_s12] sm:$0xff] %vm386_vm0, %v690_v42 }
 0x564 PF: > { %s21_s17 = sadd.s32 1, %s800_s17  }
 0x565   : > { %p18_p4 = scmp.ge.s32.totalorder %s21_s17, 4  }
 0x567   :  { %20 = sbr.rel (!%p18_p4) target bundleno = 1 (0x1), region = 94 }

</bundles_post_ra>
